<compile_context>
chip_gen: v5e
topology: v5e:2x2
jax: 0.10.0
libtpu: 0.0.40
codegen_flags: <defaults>
</compile_context>

<pallas_src>
import math

import jax
import jax.numpy as jnp
from jax import lax
from jax.experimental import pallas as pl
from jax.experimental.pallas import tpu as pltpu

TOK_TILE = 256        # tokens gathered per grid step (amortizes per-step overhead)
PIPELINE_DEPTH = 8    # in-flight token rows (ring of DMA semaphore slots)


def _round_up(x, m):
    return (x + m - 1) // m * m


def make_gather_kernel(world_size, d_slot, tok_tile, depth):
    """Row-gather kernel: for each token in the tile, DMA one (d_slot,) row per
    shard from HBM directly into that token's slice of the output VMEM block."""
    assert depth <= tok_tile

    def kernel(ids_ref, *args):
        # args = (shard_hbm_0, ..., shard_hbm_{ws-1}, out_ref, sems)
        shard_refs = args[:world_size]
        out_ref = args[world_size]
        sems = args[world_size + 1]

        base = pl.multiple_of(pl.program_id(0) * tok_tile, tok_tile)

        def issue(t):
            slot = t % depth
            tok = ids_ref[base + t]                              # SMEM scalar read
            for s in range(world_size):
                pltpu.make_async_copy(
                    shard_refs[s].at[tok],                       # (d_slot,) HBM row
                    out_ref.at[t, pl.ds(s * d_slot, d_slot)],    # (d_slot,) VMEM dst
                    sems.at[slot, s],
                ).start()

        def wait(t):
            slot = t % depth
            for s in range(world_size):
                pltpu.make_async_copy(
                    shard_refs[s].at[0],
                    out_ref.at[t, pl.ds(s * d_slot, d_slot)],
                    sems.at[slot, s],
                ).wait()

        # Prologue: fill the DMA pipeline.
        for t in range(depth):
            issue(t)

        # Steady state: retire row t, then start row t + depth (same sem slot).
        def body(t, carry):
            wait(t)
            issue(t + depth)
            return carry

        lax.fori_loop(0, tok_tile - depth, body, 0)

        # Drain the tail so every copy lands before the block is written back.
        for t in range(tok_tile - depth, tok_tile):
            wait(t)

    return kernel


def parallel_embedding_forward(tokens, shard_weights):
    """tokens: int array (...,); shard_weights: list of (V, D/world_size) arrays.

    Equivalent to torch.cat([F.embedding(tokens, w_i) for w_i in shard_weights], -1).
    """
    world_size = len(shard_weights)
    V, d_part = shard_weights[0].shape
    dtype = shard_weights[0].dtype
    for w in shard_weights:
        assert w.shape == (V, d_part) and w.dtype == dtype
    D = world_size * d_part

    # Lane-dense per-shard slot width (multiple of 128). No-op at realistic
    # sizes; for tiny demo widths we pad each shard table once so every row
    # DMA and the output writeback stay lane-aligned.
    d_slot = _round_up(d_part, 128)
    if d_slot != d_part:
        shard_weights = [jnp.pad(w, ((0, 0), (0, d_slot - d_part)))
                         for w in shard_weights]

    orig_shape = tokens.shape
    flat = tokens.reshape(-1).astype(jnp.int32)
    # OOV guard: torch F.embedding would raise; clamp so DMA sources are in-bounds.
    flat = jnp.clip(flat, 0, V - 1)
    N = flat.shape[0]
    n_tiles = pl.cdiv(N, TOK_TILE)
    N_pad = n_tiles * TOK_TILE
    # Padding tokens (id 0) gather row 0 and are sliced off below.
    # NOTE: ids live in SMEM (~4*N_pad bytes); chunk N at a higher level if huge.
    ids = jnp.pad(flat, (0, N_pad - N))

    depth = min(PIPELINE_DEPTH, TOK_TILE)
    kernel = make_gather_kernel(world_size, d_slot, TOK_TILE, depth)

    out = pl.pallas_call(
        kernel,
        out_shape=jax.ShapeDtypeStruct((N_pad, world_size * d_slot), dtype),
        grid_spec=pltpu.PrefetchScalarGridSpec(
            num_scalar_prefetch=1,                 # token ids -> SMEM
            grid=(n_tiles,),
            in_specs=[pl.BlockSpec(memory_space=pl.ANY)] * world_size,  # tables stay in HBM
            out_specs=pl.BlockSpec(
                (TOK_TILE, world_size * d_slot), lambda i, ids: (i, 0)),
            scratch_shapes=[pltpu.SemaphoreType.DMA((depth, world_size))],
        ),
        compiler_params=pltpu.CompilerParams(
            # Token tiles are independent -> megacore-parallel on v7x.
            dimension_semantics=("parallel",),
            # Only the double-buffered output block lives in VMEM; 32 MiB is
            # safe on v5e (16 MiB default), v6e (32/128) and v7x (32/64).
            vmem_limit_bytes=32 * 1024 * 1024,
        ),
    )(ids, *shard_weights)

    out = out[:N]
    if d_slot != d_part:
        out = out.reshape(N, world_size, d_slot)[:, :, :d_part].reshape(N, D)
    return out.reshape(*orig_shape, D)


def make_shard_weights(key, num_embeddings, embedding_dim, world_size):
    """Deterministic xavier_normal_-style init per shard (matches torch init of
    each ModelParallelEmbedding weight of shape (V, D/world_size))."""
    assert embedding_dim % world_size == 0
    d_part = embedding_dim // world_size
    std = math.sqrt(2.0 / (num_embeddings + d_part))
    keys = jax.random.split(key, world_size)
    return [std * jax.random.normal(k, (num_embeddings, d_part), dtype=jnp.float32)
            for k in keys]


def _check(num_embeddings, embedding_dim, world_size, batch, seq, key):
    k_w, k_tok = jax.random.split(key)
    shard_weights = make_shard_weights(k_w, num_embeddings, embedding_dim, world_size)
    tokens = jax.random.randint(k_tok, (batch, seq), 0, num_embeddings, dtype=jnp.int32)

    out = jax.block_until_ready(parallel_embedding_forward(tokens, shard_weights))

    # Reference: plain JAX gather on the column-concatenated table.
    full_w = jnp.concatenate(shard_weights, axis=-1)
    ref = full_w[tokens]
    assert out.shape == (batch, seq, embedding_dim), out.shape
    assert out.dtype == jnp.float32, out.dtype
    assert jnp.allclose(out, ref), "mismatch vs reference embedding lookup"


if __name__ == "__main__":
    key = jax.random.PRNGKey(0)
    k0, k1 = jax.random.split(key)
    # Module-consistent tiny config (exercises the d_part < 128 padding path).
    _check(num_embeddings=32, embedding_dim=32, world_size=4, batch=2, seq=8, key=k0)
    # 128-aligned shard width (realistic layout; zero padding anywhere).
    _check(num_embeddings=64, embedding_dim=512, world_size=4, batch=2, seq=8, key=k1)
    print("KERNEL_OK")
</pallas_src>

<mosaic_0001>
module attributes {stable_mosaic.version = 11 : i64} {
  func.func @kernel(%arg0: i32, %arg1: memref<256xi32, #tpu.memory_space<smem>>, %arg2: memref<32x128xf32, #tpu.memory_space<any>>, %arg3: memref<32x128xf32, #tpu.memory_space<any>>, %arg4: memref<32x128xf32, #tpu.memory_space<any>>, %arg5: memref<32x128xf32, #tpu.memory_space<any>>, %arg6: memref<256x512xf32, #tpu.memory_space<vmem>>, %arg7: memref<8x4x!tpu.dma_semaphore, #tpu.memory_space<semaphore_mem>>) attributes {dimension_semantics = [#tpu.dimension_semantics<parallel>], iteration_bounds = array<i64: 1>, scalar_prefetch = 1 : i64, scratch_operands = 1 : i64, tpu.core_type = #tpu.core_type<tc>, window_params = [{}, {}, {}, {}, {transform_indices = @transform_4, window_bounds = array<i64: 256, 512>}]} {
    %c256_i32 = arith.constant 256 : i32
    %0 = arith.muli %arg0, %c256_i32 : i32
    %1 = tpu.assume_multiple %0, 256 : i32
    %c0_i32 = arith.constant 0 : i32
    %2 = arith.addi %1, %c0_i32 : i32
    %3 = arith.index_cast %2 : i32 to index
    %4 = memref.load %arg1[%3] : memref<256xi32, #tpu.memory_space<smem>>
    %c0_i32_0 = arith.constant 0 : i32
    %c0_i32_1 = arith.constant 0 : i32
    %c0_i32_2 = arith.constant 0 : i32
    %c0_i32_3 = arith.constant 0 : i32
    %5 = tpu.memref_slice %arg2[%4, %c0_i32_3] : memref<32x128xf32, #tpu.memory_space<any>> -> memref<1x128xf32, #tpu.memory_space<any>>
    %6 = tpu.memref_squeeze %5 : memref<1x128xf32, #tpu.memory_space<any>> -> memref<128xf32, #tpu.memory_space<any>>
    %c0_i32_4 = arith.constant 0 : i32
    %7 = tpu.memref_slice %arg6[%c0_i32_0, %c0_i32_4] : memref<256x512xf32, #tpu.memory_space<vmem>> -> memref<1x128xf32, #tpu.memory_space<vmem>>
    %8 = tpu.memref_squeeze %7 : memref<1x128xf32, #tpu.memory_space<vmem>> -> memref<128xf32, #tpu.memory_space<vmem>>
    %9 = tpu.memref_slice %arg7[%c0_i32_1, %c0_i32_2] : memref<8x4x!tpu.dma_semaphore, #tpu.memory_space<semaphore_mem>> -> memref<1x1x!tpu.dma_semaphore, #tpu.memory_space<semaphore_mem>>
    %10 = tpu.memref_squeeze %9 : memref<1x1x!tpu.dma_semaphore, #tpu.memory_space<semaphore_mem>> -> memref<!tpu.dma_semaphore, #tpu.memory_space<semaphore_mem>>
    tpu.enqueue_dma source(%6 : memref<128xf32, #tpu.memory_space<any>>) target(%8 : memref<128xf32, #tpu.memory_space<vmem>>) target_semaphore(%10 : memref<!tpu.dma_semaphore, #tpu.memory_space<semaphore_mem>>)
    %c0_i32_5 = arith.constant 0 : i32
    %c0_i32_6 = arith.constant 0 : i32
    %c1_i32 = arith.constant 1 : i32
    %c0_i32_7 = arith.constant 0 : i32
    %11 = tpu.memref_slice %arg3[%4, %c0_i32_7] : memref<32x128xf32, #tpu.memory_space<any>> -> memref<1x128xf32, #tpu.memory_space<any>>
    %12 = tpu.memref_squeeze %11 : memref<1x128xf32, #tpu.memory_space<any>> -> memref<128xf32, #tpu.memory_space<any>>
    %c128_i32 = arith.constant 128 : i32
    %13 = tpu.memref_slice %arg6[%c0_i32_5, %c128_i32] : memref<256x512xf32, #tpu.memory_space<vmem>> -> memref<1x128xf32, #tpu.memory_space<vmem>>
    %14 = tpu.memref_squeeze %13 : memref<1x128xf32, #tpu.memory_space<vmem>> -> memref<128xf32, #tpu.memory_space<vmem>>
    %15 = tpu.memref_slice %arg7[%c0_i32_6, %c1_i32] : memref<8x4x!tpu.dma_semaphore, #tpu.memory_space<semaphore_mem>> -> memref<1x1x!tpu.dma_semaphore, #tpu.memory_space<semaphore_mem>>
    %16 = tpu.memref_squeeze %15 : memref<1x1x!tpu.dma_semaphore, #tpu.memory_space<semaphore_mem>> -> memref<!tpu.dma_semaphore, #tpu.memory_space<semaphore_mem>>
    tpu.enqueue_dma source(%12 : memref<128xf32, #tpu.memory_space<any>>) target(%14 : memref<128xf32, #tpu.memory_space<vmem>>) target_semaphore(%16 : memref<!tpu.dma_semaphore, #tpu.memory_space<semaphore_mem>>)
    %c0_i32_8 = arith.constant 0 : i32
    %c0_i32_9 = arith.constant 0 : i32
    %c2_i32 = arith.constant 2 : i32
    %c0_i32_10 = arith.constant 0 : i32
    %17 = tpu.memref_slice %arg4[%4, %c0_i32_10] : memref<32x128xf32, #tpu.memory_space<any>> -> memref<1x128xf32, #tpu.memory_space<any>>
    %18 = tpu.memref_squeeze %17 : memref<1x128xf32, #tpu.memory_space<any>> -> memref<128xf32, #tpu.memory_space<any>>
    %c256_i32_11 = arith.constant 256 : i32
    %19 = tpu.memref_slice %arg6[%c0_i32_8, %c256_i32_11] : memref<256x512xf32, #tpu.memory_space<vmem>> -> memref<1x128xf32, #tpu.memory_space<vmem>>
    %20 = tpu.memref_squeeze %19 : memref<1x128xf32, #tpu.memory_space<vmem>> -> memref<128xf32, #tpu.memory_space<vmem>>
    %21 = tpu.memref_slice %arg7[%c0_i32_9, %c2_i32] : memref<8x4x!tpu.dma_semaphore, #tpu.memory_space<semaphore_mem>> -> memref<1x1x!tpu.dma_semaphore, #tpu.memory_space<semaphore_mem>>
    %22 = tpu.memref_squeeze %21 : memref<1x1x!tpu.dma_semaphore, #tpu.memory_space<semaphore_mem>> -> memref<!tpu.dma_semaphore, #tpu.memory_space<semaphore_mem>>
    tpu.enqueue_dma source(%18 : memref<128xf32, #tpu.memory_space<any>>) target(%20 : memref<128xf32, #tpu.memory_space<vmem>>) target_semaphore(%22 : memref<!tpu.dma_semaphore, #tpu.memory_space<semaphore_mem>>)
    %c0_i32_12 = arith.constant 0 : i32
    %c0_i32_13 = arith.constant 0 : i32
    %c3_i32 = arith.constant 3 : i32
    %c0_i32_14 = arith.constant 0 : i32
    %23 = tpu.memref_slice %arg5[%4, %c0_i32_14] : memref<32x128xf32, #tpu.memory_space<any>> -> memref<1x128xf32, #tpu.memory_space<any>>
    %24 = tpu.memref_squeeze %23 : memref<1x128xf32, #tpu.memory_space<any>> -> memref<128xf32, #tpu.memory_space<any>>
    %c384_i32 = arith.constant 384 : i32
    %25 = tpu.memref_slice %arg6[%c0_i32_12, %c384_i32] : memref<256x512xf32, #tpu.memory_space<vmem>> -> memref<1x128xf32, #tpu.memory_space<vmem>>
    %26 = tpu.memref_squeeze %25 : memref<1x128xf32, #tpu.memory_space<vmem>> -> memref<128xf32, #tpu.memory_space<vmem>>
    %27 = tpu.memref_slice %arg7[%c0_i32_13, %c3_i32] : memref<8x4x!tpu.dma_semaphore, #tpu.memory_space<semaphore_mem>> -> memref<1x1x!tpu.dma_semaphore, #tpu.memory_space<semaphore_mem>>
    %28 = tpu.memref_squeeze %27 : memref<1x1x!tpu.dma_semaphore, #tpu.memory_space<semaphore_mem>> -> memref<!tpu.dma_semaphore, #tpu.memory_space<semaphore_mem>>
    tpu.enqueue_dma source(%24 : memref<128xf32, #tpu.memory_space<any>>) target(%26 : memref<128xf32, #tpu.memory_space<vmem>>) target_semaphore(%28 : memref<!tpu.dma_semaphore, #tpu.memory_space<semaphore_mem>>)
    %c1_i32_15 = arith.constant 1 : i32
    %29 = arith.addi %1, %c1_i32_15 : i32
    %30 = arith.index_cast %29 : i32 to index
    %31 = memref.load %arg1[%30] : memref<256xi32, #tpu.memory_space<smem>>
    %c1_i32_16 = arith.constant 1 : i32
    %c1_i32_17 = arith.constant 1 : i32
    %c0_i32_18 = arith.constant 0 : i32
    %c0_i32_19 = arith.constant 0 : i32
    %32 = tpu.memref_slice %arg2[%31, %c0_i32_19] : memref<32x128xf32, #tpu.memory_space<any>> -> memref<1x128xf32, #tpu.memory_space<any>>
    %33 = tpu.memref_squeeze %32 : memref<1x128xf32, #tpu.memory_space<any>> -> memref<128xf32, #tpu.memory_space<any>>
    %c0_i32_20 = arith.constant 0 : i32
    %34 = tpu.memref_slice %arg6[%c1_i32_16, %c0_i32_20] : memref<256x512xf32, #tpu.memory_space<vmem>> -> memref<1x128xf32, #tpu.memory_space<vmem>>
    %35 = tpu.memref_squeeze %34 : memref<1x128xf32, #tpu.memory_space<vmem>> -> memref<128xf32, #tpu.memory_space<vmem>>
    %36 = tpu.memref_slice %arg7[%c1_i32_17, %c0_i32_18] : memref<8x4x!tpu.dma_semaphore, #tpu.memory_space<semaphore_mem>> -> memref<1x1x!tpu.dma_semaphore, #tpu.memory_space<semaphore_mem>>
    %37 = tpu.memref_squeeze %36 : memref<1x1x!tpu.dma_semaphore, #tpu.memory_space<semaphore_mem>> -> memref<!tpu.dma_semaphore, #tpu.memory_space<semaphore_mem>>
    tpu.enqueue_dma source(%33 : memref<128xf32, #tpu.memory_space<any>>) target(%35 : memref<128xf32, #tpu.memory_space<vmem>>) target_semaphore(%37 : memref<!tpu.dma_semaphore, #tpu.memory_space<semaphore_mem>>)
    %c1_i32_21 = arith.constant 1 : i32
    %c1_i32_22 = arith.constant 1 : i32
    %c1_i32_23 = arith.constant 1 : i32
    %c0_i32_24 = arith.constant 0 : i32
    %38 = tpu.memref_slice %arg3[%31, %c0_i32_24] : memref<32x128xf32, #tpu.memory_space<any>> -> memref<1x128xf32, #tpu.memory_space<any>>
    %39 = tpu.memref_squeeze %38 : memref<1x128xf32, #tpu.memory_space<any>> -> memref<128xf32, #tpu.memory_space<any>>
    %c128_i32_25 = arith.constant 128 : i32
    %40 = tpu.memref_slice %arg6[%c1_i32_21, %c128_i32_25] : memref<256x512xf32, #tpu.memory_space<vmem>> -> memref<1x128xf32, #tpu.memory_space<vmem>>
    %41 = tpu.memref_squeeze %40 : memref<1x128xf32, #tpu.memory_space<vmem>> -> memref<128xf32, #tpu.memory_space<vmem>>
    %42 = tpu.memref_slice %arg7[%c1_i32_22, %c1_i32_23] : memref<8x4x!tpu.dma_semaphore, #tpu.memory_space<semaphore_mem>> -> memref<1x1x!tpu.dma_semaphore, #tpu.memory_space<semaphore_mem>>
    %43 = tpu.memref_squeeze %42 : memref<1x1x!tpu.dma_semaphore, #tpu.memory_space<semaphore_mem>> -> memref<!tpu.dma_semaphore, #tpu.memory_space<semaphore_mem>>
    tpu.enqueue_dma source(%39 : memref<128xf32, #tpu.memory_space<any>>) target(%41 : memref<128xf32, #tpu.memory_space<vmem>>) target_semaphore(%43 : memref<!tpu.dma_semaphore, #tpu.memory_space<semaphore_mem>>)
    %c1_i32_26 = arith.constant 1 : i32
    %c1_i32_27 = arith.constant 1 : i32
    %c2_i32_28 = arith.constant 2 : i32
    %c0_i32_29 = arith.constant 0 : i32
    %44 = tpu.memref_slice %arg4[%31, %c0_i32_29] : memref<32x128xf32, #tpu.memory_space<any>> -> memref<1x128xf32, #tpu.memory_space<any>>
    %45 = tpu.memref_squeeze %44 : memref<1x128xf32, #tpu.memory_space<any>> -> memref<128xf32, #tpu.memory_space<any>>
    %c256_i32_30 = arith.constant 256 : i32
    %46 = tpu.memref_slice %arg6[%c1_i32_26, %c256_i32_30] : memref<256x512xf32, #tpu.memory_space<vmem>> -> memref<1x128xf32, #tpu.memory_space<vmem>>
    %47 = tpu.memref_squeeze %46 : memref<1x128xf32, #tpu.memory_space<vmem>> -> memref<128xf32, #tpu.memory_space<vmem>>
    %48 = tpu.memref_slice %arg7[%c1_i32_27, %c2_i32_28] : memref<8x4x!tpu.dma_semaphore, #tpu.memory_space<semaphore_mem>> -> memref<1x1x!tpu.dma_semaphore, #tpu.memory_space<semaphore_mem>>
    %49 = tpu.memref_squeeze %48 : memref<1x1x!tpu.dma_semaphore, #tpu.memory_space<semaphore_mem>> -> memref<!tpu.dma_semaphore, #tpu.memory_space<semaphore_mem>>
    tpu.enqueue_dma source(%45 : memref<128xf32, #tpu.memory_space<any>>) target(%47 : memref<128xf32, #tpu.memory_space<vmem>>) target_semaphore(%49 : memref<!tpu.dma_semaphore, #tpu.memory_space<semaphore_mem>>)
    %c1_i32_31 = arith.constant 1 : i32
    %c1_i32_32 = arith.constant 1 : i32
    %c3_i32_33 = arith.constant 3 : i32
    %c0_i32_34 = arith.constant 0 : i32
    %50 = tpu.memref_slice %arg5[%31, %c0_i32_34] : memref<32x128xf32, #tpu.memory_space<any>> -> memref<1x128xf32, #tpu.memory_space<any>>
    %51 = tpu.memref_squeeze %50 : memref<1x128xf32, #tpu.memory_space<any>> -> memref<128xf32, #tpu.memory_space<any>>
    %c384_i32_35 = arith.constant 384 : i32
    %52 = tpu.memref_slice %arg6[%c1_i32_31, %c384_i32_35] : memref<256x512xf32, #tpu.memory_space<vmem>> -> memref<1x128xf32, #tpu.memory_space<vmem>>
    %53 = tpu.memref_squeeze %52 : memref<1x128xf32, #tpu.memory_space<vmem>> -> memref<128xf32, #tpu.memory_space<vmem>>
    %54 = tpu.memref_slice %arg7[%c1_i32_32, %c3_i32_33] : memref<8x4x!tpu.dma_semaphore, #tpu.memory_space<semaphore_mem>> -> memref<1x1x!tpu.dma_semaphore, #tpu.memory_space<semaphore_mem>>
    %55 = tpu.memref_squeeze %54 : memref<1x1x!tpu.dma_semaphore, #tpu.memory_space<semaphore_mem>> -> memref<!tpu.dma_semaphore, #tpu.memory_space<semaphore_mem>>
    tpu.enqueue_dma source(%51 : memref<128xf32, #tpu.memory_space<any>>) target(%53 : memref<128xf32, #tpu.memory_space<vmem>>) target_semaphore(%55 : memref<!tpu.dma_semaphore, #tpu.memory_space<semaphore_mem>>)
    %c2_i32_36 = arith.constant 2 : i32
    %56 = arith.addi %1, %c2_i32_36 : i32
    %57 = arith.index_cast %56 : i32 to index
    %58 = memref.load %arg1[%57] : memref<256xi32, #tpu.memory_space<smem>>
    %c2_i32_37 = arith.constant 2 : i32
    %c2_i32_38 = arith.constant 2 : i32
    %c0_i32_39 = arith.constant 0 : i32
    %c0_i32_40 = arith.constant 0 : i32
    %59 = tpu.memref_slice %arg2[%58, %c0_i32_40] : memref<32x128xf32, #tpu.memory_space<any>> -> memref<1x128xf32, #tpu.memory_space<any>>
    %60 = tpu.memref_squeeze %59 : memref<1x128xf32, #tpu.memory_space<any>> -> memref<128xf32, #tpu.memory_space<any>>
    %c0_i32_41 = arith.constant 0 : i32
    %61 = tpu.memref_slice %arg6[%c2_i32_37, %c0_i32_41] : memref<256x512xf32, #tpu.memory_space<vmem>> -> memref<1x128xf32, #tpu.memory_space<vmem>>
    %62 = tpu.memref_squeeze %61 : memref<1x128xf32, #tpu.memory_space<vmem>> -> memref<128xf32, #tpu.memory_space<vmem>>
    %63 = tpu.memref_slice %arg7[%c2_i32_38, %c0_i32_39] : memref<8x4x!tpu.dma_semaphore, #tpu.memory_space<semaphore_mem>> -> memref<1x1x!tpu.dma_semaphore, #tpu.memory_space<semaphore_mem>>
    %64 = tpu.memref_squeeze %63 : memref<1x1x!tpu.dma_semaphore, #tpu.memory_space<semaphore_mem>> -> memref<!tpu.dma_semaphore, #tpu.memory_space<semaphore_mem>>
    tpu.enqueue_dma source(%60 : memref<128xf32, #tpu.memory_space<any>>) target(%62 : memref<128xf32, #tpu.memory_space<vmem>>) target_semaphore(%64 : memref<!tpu.dma_semaphore, #tpu.memory_space<semaphore_mem>>)
    %c2_i32_42 = arith.constant 2 : i32
    %c2_i32_43 = arith.constant 2 : i32
    %c1_i32_44 = arith.constant 1 : i32
    %c0_i32_45 = arith.constant 0 : i32
    %65 = tpu.memref_slice %arg3[%58, %c0_i32_45] : memref<32x128xf32, #tpu.memory_space<any>> -> memref<1x128xf32, #tpu.memory_space<any>>
    %66 = tpu.memref_squeeze %65 : memref<1x128xf32, #tpu.memory_space<any>> -> memref<128xf32, #tpu.memory_space<any>>
    %c128_i32_46 = arith.constant 128 : i32
    %67 = tpu.memref_slice %arg6[%c2_i32_42, %c128_i32_46] : memref<256x512xf32, #tpu.memory_space<vmem>> -> memref<1x128xf32, #tpu.memory_space<vmem>>
    %68 = tpu.memref_squeeze %67 : memref<1x128xf32, #tpu.memory_space<vmem>> -> memref<128xf32, #tpu.memory_space<vmem>>
    %69 = tpu.memref_slice %arg7[%c2_i32_43, %c1_i32_44] : memref<8x4x!tpu.dma_semaphore, #tpu.memory_space<semaphore_mem>> -> memref<1x1x!tpu.dma_semaphore, #tpu.memory_space<semaphore_mem>>
    %70 = tpu.memref_squeeze %69 : memref<1x1x!tpu.dma_semaphore, #tpu.memory_space<semaphore_mem>> -> memref<!tpu.dma_semaphore, #tpu.memory_space<semaphore_mem>>
    tpu.enqueue_dma source(%66 : memref<128xf32, #tpu.memory_space<any>>) target(%68 : memref<128xf32, #tpu.memory_space<vmem>>) target_semaphore(%70 : memref<!tpu.dma_semaphore, #tpu.memory_space<semaphore_mem>>)
    %c2_i32_47 = arith.constant 2 : i32
    %c2_i32_48 = arith.constant 2 : i32
    %c2_i32_49 = arith.constant 2 : i32
    %c0_i32_50 = arith.constant 0 : i32
    %71 = tpu.memref_slice %arg4[%58, %c0_i32_50] : memref<32x128xf32, #tpu.memory_space<any>> -> memref<1x128xf32, #tpu.memory_space<any>>
    %72 = tpu.memref_squeeze %71 : memref<1x128xf32, #tpu.memory_space<any>> -> memref<128xf32, #tpu.memory_space<any>>
    %c256_i32_51 = arith.constant 256 : i32
    %73 = tpu.memref_slice %arg6[%c2_i32_47, %c256_i32_51] : memref<256x512xf32, #tpu.memory_space<vmem>> -> memref<1x128xf32, #tpu.memory_space<vmem>>
    %74 = tpu.memref_squeeze %73 : memref<1x128xf32, #tpu.memory_space<vmem>> -> memref<128xf32, #tpu.memory_space<vmem>>
    %75 = tpu.memref_slice %arg7[%c2_i32_48, %c2_i32_49] : memref<8x4x!tpu.dma_semaphore, #tpu.memory_space<semaphore_mem>> -> memref<1x1x!tpu.dma_semaphore, #tpu.memory_space<semaphore_mem>>
    %76 = tpu.memref_squeeze %75 : memref<1x1x!tpu.dma_semaphore, #tpu.memory_space<semaphore_mem>> -> memref<!tpu.dma_semaphore, #tpu.memory_space<semaphore_mem>>
    tpu.enqueue_dma source(%72 : memref<128xf32, #tpu.memory_space<any>>) target(%74 : memref<128xf32, #tpu.memory_space<vmem>>) target_semaphore(%76 : memref<!tpu.dma_semaphore, #tpu.memory_space<semaphore_mem>>)
    %c2_i32_52 = arith.constant 2 : i32
    %c2_i32_53 = arith.constant 2 : i32
    %c3_i32_54 = arith.constant 3 : i32
    %c0_i32_55 = arith.constant 0 : i32
    %77 = tpu.memref_slice %arg5[%58, %c0_i32_55] : memref<32x128xf32, #tpu.memory_space<any>> -> memref<1x128xf32, #tpu.memory_space<any>>
    %78 = tpu.memref_squeeze %77 : memref<1x128xf32, #tpu.memory_space<any>> -> memref<128xf32, #tpu.memory_space<any>>
    %c384_i32_56 = arith.constant 384 : i32
    %79 = tpu.memref_slice %arg6[%c2_i32_52, %c384_i32_56] : memref<256x512xf32, #tpu.memory_space<vmem>> -> memref<1x128xf32, #tpu.memory_space<vmem>>
    %80 = tpu.memref_squeeze %79 : memref<1x128xf32, #tpu.memory_space<vmem>> -> memref<128xf32, #tpu.memory_space<vmem>>
    %81 = tpu.memref_slice %arg7[%c2_i32_53, %c3_i32_54] : memref<8x4x!tpu.dma_semaphore, #tpu.memory_space<semaphore_mem>> -> memref<1x1x!tpu.dma_semaphore, #tpu.memory_space<semaphore_mem>>
    %82 = tpu.memref_squeeze %81 : memref<1x1x!tpu.dma_semaphore, #tpu.memory_space<semaphore_mem>> -> memref<!tpu.dma_semaphore, #tpu.memory_space<semaphore_mem>>
    tpu.enqueue_dma source(%78 : memref<128xf32, #tpu.memory_space<any>>) target(%80 : memref<128xf32, #tpu.memory_space<vmem>>) target_semaphore(%82 : memref<!tpu.dma_semaphore, #tpu.memory_space<semaphore_mem>>)
    %c3_i32_57 = arith.constant 3 : i32
    %83 = arith.addi %1, %c3_i32_57 : i32
    %84 = arith.index_cast %83 : i32 to index
    %85 = memref.load %arg1[%84] : memref<256xi32, #tpu.memory_space<smem>>
    %c3_i32_58 = arith.constant 3 : i32
    %c3_i32_59 = arith.constant 3 : i32
    %c0_i32_60 = arith.constant 0 : i32
    %c0_i32_61 = arith.constant 0 : i32
    %86 = tpu.memref_slice %arg2[%85, %c0_i32_61] : memref<32x128xf32, #tpu.memory_space<any>> -> memref<1x128xf32, #tpu.memory_space<any>>
    %87 = tpu.memref_squeeze %86 : memref<1x128xf32, #tpu.memory_space<any>> -> memref<128xf32, #tpu.memory_space<any>>
    %c0_i32_62 = arith.constant 0 : i32
    %88 = tpu.memref_slice %arg6[%c3_i32_58, %c0_i32_62] : memref<256x512xf32, #tpu.memory_space<vmem>> -> memref<1x128xf32, #tpu.memory_space<vmem>>
    %89 = tpu.memref_squeeze %88 : memref<1x128xf32, #tpu.memory_space<vmem>> -> memref<128xf32, #tpu.memory_space<vmem>>
    %90 = tpu.memref_slice %arg7[%c3_i32_59, %c0_i32_60] : memref<8x4x!tpu.dma_semaphore, #tpu.memory_space<semaphore_mem>> -> memref<1x1x!tpu.dma_semaphore, #tpu.memory_space<semaphore_mem>>
    %91 = tpu.memref_squeeze %90 : memref<1x1x!tpu.dma_semaphore, #tpu.memory_space<semaphore_mem>> -> memref<!tpu.dma_semaphore, #tpu.memory_space<semaphore_mem>>
    tpu.enqueue_dma source(%87 : memref<128xf32, #tpu.memory_space<any>>) target(%89 : memref<128xf32, #tpu.memory_space<vmem>>) target_semaphore(%91 : memref<!tpu.dma_semaphore, #tpu.memory_space<semaphore_mem>>)
    %c3_i32_63 = arith.constant 3 : i32
    %c3_i32_64 = arith.constant 3 : i32
    %c1_i32_65 = arith.constant 1 : i32
    %c0_i32_66 = arith.constant 0 : i32
    %92 = tpu.memref_slice %arg3[%85, %c0_i32_66] : memref<32x128xf32, #tpu.memory_space<any>> -> memref<1x128xf32, #tpu.memory_space<any>>
    %93 = tpu.memref_squeeze %92 : memref<1x128xf32, #tpu.memory_space<any>> -> memref<128xf32, #tpu.memory_space<any>>
    %c128_i32_67 = arith.constant 128 : i32
    %94 = tpu.memref_slice %arg6[%c3_i32_63, %c128_i32_67] : memref<256x512xf32, #tpu.memory_space<vmem>> -> memref<1x128xf32, #tpu.memory_space<vmem>>
    %95 = tpu.memref_squeeze %94 : memref<1x128xf32, #tpu.memory_space<vmem>> -> memref<128xf32, #tpu.memory_space<vmem>>
    %96 = tpu.memref_slice %arg7[%c3_i32_64, %c1_i32_65] : memref<8x4x!tpu.dma_semaphore, #tpu.memory_space<semaphore_mem>> -> memref<1x1x!tpu.dma_semaphore, #tpu.memory_space<semaphore_mem>>
    %97 = tpu.memref_squeeze %96 : memref<1x1x!tpu.dma_semaphore, #tpu.memory_space<semaphore_mem>> -> memref<!tpu.dma_semaphore, #tpu.memory_space<semaphore_mem>>
    tpu.enqueue_dma source(%93 : memref<128xf32, #tpu.memory_space<any>>) target(%95 : memref<128xf32, #tpu.memory_space<vmem>>) target_semaphore(%97 : memref<!tpu.dma_semaphore, #tpu.memory_space<semaphore_mem>>)
    %c3_i32_68 = arith.constant 3 : i32
    %c3_i32_69 = arith.constant 3 : i32
    %c2_i32_70 = arith.constant 2 : i32
    %c0_i32_71 = arith.constant 0 : i32
    %98 = tpu.memref_slice %arg4[%85, %c0_i32_71] : memref<32x128xf32, #tpu.memory_space<any>> -> memref<1x128xf32, #tpu.memory_space<any>>
    %99 = tpu.memref_squeeze %98 : memref<1x128xf32, #tpu.memory_space<any>> -> memref<128xf32, #tpu.memory_space<any>>
    %c256_i32_72 = arith.constant 256 : i32
    %100 = tpu.memref_slice %arg6[%c3_i32_68, %c256_i32_72] : memref<256x512xf32, #tpu.memory_space<vmem>> -> memref<1x128xf32, #tpu.memory_space<vmem>>
    %101 = tpu.memref_squeeze %100 : memref<1x128xf32, #tpu.memory_space<vmem>> -> memref<128xf32, #tpu.memory_space<vmem>>
    %102 = tpu.memref_slice %arg7[%c3_i32_69, %c2_i32_70] : memref<8x4x!tpu.dma_semaphore, #tpu.memory_space<semaphore_mem>> -> memref<1x1x!tpu.dma_semaphore, #tpu.memory_space<semaphore_mem>>
    %103 = tpu.memref_squeeze %102 : memref<1x1x!tpu.dma_semaphore, #tpu.memory_space<semaphore_mem>> -> memref<!tpu.dma_semaphore, #tpu.memory_space<semaphore_mem>>
    tpu.enqueue_dma source(%99 : memref<128xf32, #tpu.memory_space<any>>) target(%101 : memref<128xf32, #tpu.memory_space<vmem>>) target_semaphore(%103 : memref<!tpu.dma_semaphore, #tpu.memory_space<semaphore_mem>>)
    %c3_i32_73 = arith.constant 3 : i32
    %c3_i32_74 = arith.constant 3 : i32
    %c3_i32_75 = arith.constant 3 : i32
    %c0_i32_76 = arith.constant 0 : i32
    %104 = tpu.memref_slice %arg5[%85, %c0_i32_76] : memref<32x128xf32, #tpu.memory_space<any>> -> memref<1x128xf32, #tpu.memory_space<any>>
    %105 = tpu.memref_squeeze %104 : memref<1x128xf32, #tpu.memory_space<any>> -> memref<128xf32, #tpu.memory_space<any>>
    %c384_i32_77 = arith.constant 384 : i32
    %106 = tpu.memref_slice %arg6[%c3_i32_73, %c384_i32_77] : memref<256x512xf32, #tpu.memory_space<vmem>> -> memref<1x128xf32, #tpu.memory_space<vmem>>
    %107 = tpu.memref_squeeze %106 : memref<1x128xf32, #tpu.memory_space<vmem>> -> memref<128xf32, #tpu.memory_space<vmem>>
    %108 = tpu.memref_slice %arg7[%c3_i32_74, %c3_i32_75] : memref<8x4x!tpu.dma_semaphore, #tpu.memory_space<semaphore_mem>> -> memref<1x1x!tpu.dma_semaphore, #tpu.memory_space<semaphore_mem>>
    %109 = tpu.memref_squeeze %108 : memref<1x1x!tpu.dma_semaphore, #tpu.memory_space<semaphore_mem>> -> memref<!tpu.dma_semaphore, #tpu.memory_space<semaphore_mem>>
    tpu.enqueue_dma source(%105 : memref<128xf32, #tpu.memory_space<any>>) target(%107 : memref<128xf32, #tpu.memory_space<vmem>>) target_semaphore(%109 : memref<!tpu.dma_semaphore, #tpu.memory_space<semaphore_mem>>)
    %c4_i32 = arith.constant 4 : i32
    %110 = arith.addi %1, %c4_i32 : i32
    %111 = arith.index_cast %110 : i32 to index
    %112 = memref.load %arg1[%111] : memref<256xi32, #tpu.memory_space<smem>>
    %c4_i32_78 = arith.constant 4 : i32
    %c4_i32_79 = arith.constant 4 : i32
    %c0_i32_80 = arith.constant 0 : i32
    %c0_i32_81 = arith.constant 0 : i32
    %113 = tpu.memref_slice %arg2[%112, %c0_i32_81] : memref<32x128xf32, #tpu.memory_space<any>> -> memref<1x128xf32, #tpu.memory_space<any>>
    %114 = tpu.memref_squeeze %113 : memref<1x128xf32, #tpu.memory_space<any>> -> memref<128xf32, #tpu.memory_space<any>>
    %c0_i32_82 = arith.constant 0 : i32
    %115 = tpu.memref_slice %arg6[%c4_i32_78, %c0_i32_82] : memref<256x512xf32, #tpu.memory_space<vmem>> -> memref<1x128xf32, #tpu.memory_space<vmem>>
    %116 = tpu.memref_squeeze %115 : memref<1x128xf32, #tpu.memory_space<vmem>> -> memref<128xf32, #tpu.memory_space<vmem>>
    %117 = tpu.memref_slice %arg7[%c4_i32_79, %c0_i32_80] : memref<8x4x!tpu.dma_semaphore, #tpu.memory_space<semaphore_mem>> -> memref<1x1x!tpu.dma_semaphore, #tpu.memory_space<semaphore_mem>>
    %118 = tpu.memref_squeeze %117 : memref<1x1x!tpu.dma_semaphore, #tpu.memory_space<semaphore_mem>> -> memref<!tpu.dma_semaphore, #tpu.memory_space<semaphore_mem>>
    tpu.enqueue_dma source(%114 : memref<128xf32, #tpu.memory_space<any>>) target(%116 : memref<128xf32, #tpu.memory_space<vmem>>) target_semaphore(%118 : memref<!tpu.dma_semaphore, #tpu.memory_space<semaphore_mem>>)
    %c4_i32_83 = arith.constant 4 : i32
    %c4_i32_84 = arith.constant 4 : i32
    %c1_i32_85 = arith.constant 1 : i32
    %c0_i32_86 = arith.constant 0 : i32
    %119 = tpu.memref_slice %arg3[%112, %c0_i32_86] : memref<32x128xf32, #tpu.memory_space<any>> -> memref<1x128xf32, #tpu.memory_space<any>>
    %120 = tpu.memref_squeeze %119 : memref<1x128xf32, #tpu.memory_space<any>> -> memref<128xf32, #tpu.memory_space<any>>
    %c128_i32_87 = arith.constant 128 : i32
    %121 = tpu.memref_slice %arg6[%c4_i32_83, %c128_i32_87] : memref<256x512xf32, #tpu.memory_space<vmem>> -> memref<1x128xf32, #tpu.memory_space<vmem>>
    %122 = tpu.memref_squeeze %121 : memref<1x128xf32, #tpu.memory_space<vmem>> -> memref<128xf32, #tpu.memory_space<vmem>>
    %123 = tpu.memref_slice %arg7[%c4_i32_84, %c1_i32_85] : memref<8x4x!tpu.dma_semaphore, #tpu.memory_space<semaphore_mem>> -> memref<1x1x!tpu.dma_semaphore, #tpu.memory_space<semaphore_mem>>
    %124 = tpu.memref_squeeze %123 : memref<1x1x!tpu.dma_semaphore, #tpu.memory_space<semaphore_mem>> -> memref<!tpu.dma_semaphore, #tpu.memory_space<semaphore_mem>>
    tpu.enqueue_dma source(%120 : memref<128xf32, #tpu.memory_space<any>>) target(%122 : memref<128xf32, #tpu.memory_space<vmem>>) target_semaphore(%124 : memref<!tpu.dma_semaphore, #tpu.memory_space<semaphore_mem>>)
    %c4_i32_88 = arith.constant 4 : i32
    %c4_i32_89 = arith.constant 4 : i32
    %c2_i32_90 = arith.constant 2 : i32
    %c0_i32_91 = arith.constant 0 : i32
    %125 = tpu.memref_slice %arg4[%112, %c0_i32_91] : memref<32x128xf32, #tpu.memory_space<any>> -> memref<1x128xf32, #tpu.memory_space<any>>
    %126 = tpu.memref_squeeze %125 : memref<1x128xf32, #tpu.memory_space<any>> -> memref<128xf32, #tpu.memory_space<any>>
    %c256_i32_92 = arith.constant 256 : i32
    %127 = tpu.memref_slice %arg6[%c4_i32_88, %c256_i32_92] : memref<256x512xf32, #tpu.memory_space<vmem>> -> memref<1x128xf32, #tpu.memory_space<vmem>>
    %128 = tpu.memref_squeeze %127 : memref<1x128xf32, #tpu.memory_space<vmem>> -> memref<128xf32, #tpu.memory_space<vmem>>
    %129 = tpu.memref_slice %arg7[%c4_i32_89, %c2_i32_90] : memref<8x4x!tpu.dma_semaphore, #tpu.memory_space<semaphore_mem>> -> memref<1x1x!tpu.dma_semaphore, #tpu.memory_space<semaphore_mem>>
    %130 = tpu.memref_squeeze %129 : memref<1x1x!tpu.dma_semaphore, #tpu.memory_space<semaphore_mem>> -> memref<!tpu.dma_semaphore, #tpu.memory_space<semaphore_mem>>
    tpu.enqueue_dma source(%126 : memref<128xf32, #tpu.memory_space<any>>) target(%128 : memref<128xf32, #tpu.memory_space<vmem>>) target_semaphore(%130 : memref<!tpu.dma_semaphore, #tpu.memory_space<semaphore_mem>>)
    %c4_i32_93 = arith.constant 4 : i32
    %c4_i32_94 = arith.constant 4 : i32
    %c3_i32_95 = arith.constant 3 : i32
    %c0_i32_96 = arith.constant 0 : i32
    %131 = tpu.memref_slice %arg5[%112, %c0_i32_96] : memref<32x128xf32, #tpu.memory_space<any>> -> memref<1x128xf32, #tpu.memory_space<any>>
    %132 = tpu.memref_squeeze %131 : memref<1x128xf32, #tpu.memory_space<any>> -> memref<128xf32, #tpu.memory_space<any>>
    %c384_i32_97 = arith.constant 384 : i32
    %133 = tpu.memref_slice %arg6[%c4_i32_93, %c384_i32_97] : memref<256x512xf32, #tpu.memory_space<vmem>> -> memref<1x128xf32, #tpu.memory_space<vmem>>
    %134 = tpu.memref_squeeze %133 : memref<1x128xf32, #tpu.memory_space<vmem>> -> memref<128xf32, #tpu.memory_space<vmem>>
    %135 = tpu.memref_slice %arg7[%c4_i32_94, %c3_i32_95] : memref<8x4x!tpu.dma_semaphore, #tpu.memory_space<semaphore_mem>> -> memref<1x1x!tpu.dma_semaphore, #tpu.memory_space<semaphore_mem>>
    %136 = tpu.memref_squeeze %135 : memref<1x1x!tpu.dma_semaphore, #tpu.memory_space<semaphore_mem>> -> memref<!tpu.dma_semaphore, #tpu.memory_space<semaphore_mem>>
    tpu.enqueue_dma source(%132 : memref<128xf32, #tpu.memory_space<any>>) target(%134 : memref<128xf32, #tpu.memory_space<vmem>>) target_semaphore(%136 : memref<!tpu.dma_semaphore, #tpu.memory_space<semaphore_mem>>)
    %c5_i32 = arith.constant 5 : i32
    %137 = arith.addi %1, %c5_i32 : i32
    %138 = arith.index_cast %137 : i32 to index
    %139 = memref.load %arg1[%138] : memref<256xi32, #tpu.memory_space<smem>>
    %c5_i32_98 = arith.constant 5 : i32
    %c5_i32_99 = arith.constant 5 : i32
    %c0_i32_100 = arith.constant 0 : i32
    %c0_i32_101 = arith.constant 0 : i32
    %140 = tpu.memref_slice %arg2[%139, %c0_i32_101] : memref<32x128xf32, #tpu.memory_space<any>> -> memref<1x128xf32, #tpu.memory_space<any>>
    %141 = tpu.memref_squeeze %140 : memref<1x128xf32, #tpu.memory_space<any>> -> memref<128xf32, #tpu.memory_space<any>>
    %c0_i32_102 = arith.constant 0 : i32
    %142 = tpu.memref_slice %arg6[%c5_i32_98, %c0_i32_102] : memref<256x512xf32, #tpu.memory_space<vmem>> -> memref<1x128xf32, #tpu.memory_space<vmem>>
    %143 = tpu.memref_squeeze %142 : memref<1x128xf32, #tpu.memory_space<vmem>> -> memref<128xf32, #tpu.memory_space<vmem>>
    %144 = tpu.memref_slice %arg7[%c5_i32_99, %c0_i32_100] : memref<8x4x!tpu.dma_semaphore, #tpu.memory_space<semaphore_mem>> -> memref<1x1x!tpu.dma_semaphore, #tpu.memory_space<semaphore_mem>>
    %145 = tpu.memref_squeeze %144 : memref<1x1x!tpu.dma_semaphore, #tpu.memory_space<semaphore_mem>> -> memref<!tpu.dma_semaphore, #tpu.memory_space<semaphore_mem>>
    tpu.enqueue_dma source(%141 : memref<128xf32, #tpu.memory_space<any>>) target(%143 : memref<128xf32, #tpu.memory_space<vmem>>) target_semaphore(%145 : memref<!tpu.dma_semaphore, #tpu.memory_space<semaphore_mem>>)
    %c5_i32_103 = arith.constant 5 : i32
    %c5_i32_104 = arith.constant 5 : i32
    %c1_i32_105 = arith.constant 1 : i32
    %c0_i32_106 = arith.constant 0 : i32
    %146 = tpu.memref_slice %arg3[%139, %c0_i32_106] : memref<32x128xf32, #tpu.memory_space<any>> -> memref<1x128xf32, #tpu.memory_space<any>>
    %147 = tpu.memref_squeeze %146 : memref<1x128xf32, #tpu.memory_space<any>> -> memref<128xf32, #tpu.memory_space<any>>
    %c128_i32_107 = arith.constant 128 : i32
    %148 = tpu.memref_slice %arg6[%c5_i32_103, %c128_i32_107] : memref<256x512xf32, #tpu.memory_space<vmem>> -> memref<1x128xf32, #tpu.memory_space<vmem>>
    %149 = tpu.memref_squeeze %148 : memref<1x128xf32, #tpu.memory_space<vmem>> -> memref<128xf32, #tpu.memory_space<vmem>>
    %150 = tpu.memref_slice %arg7[%c5_i32_104, %c1_i32_105] : memref<8x4x!tpu.dma_semaphore, #tpu.memory_space<semaphore_mem>> -> memref<1x1x!tpu.dma_semaphore, #tpu.memory_space<semaphore_mem>>
    %151 = tpu.memref_squeeze %150 : memref<1x1x!tpu.dma_semaphore, #tpu.memory_space<semaphore_mem>> -> memref<!tpu.dma_semaphore, #tpu.memory_space<semaphore_mem>>
    tpu.enqueue_dma source(%147 : memref<128xf32, #tpu.memory_space<any>>) target(%149 : memref<128xf32, #tpu.memory_space<vmem>>) target_semaphore(%151 : memref<!tpu.dma_semaphore, #tpu.memory_space<semaphore_mem>>)
    %c5_i32_108 = arith.constant 5 : i32
    %c5_i32_109 = arith.constant 5 : i32
    %c2_i32_110 = arith.constant 2 : i32
    %c0_i32_111 = arith.constant 0 : i32
    %152 = tpu.memref_slice %arg4[%139, %c0_i32_111] : memref<32x128xf32, #tpu.memory_space<any>> -> memref<1x128xf32, #tpu.memory_space<any>>
    %153 = tpu.memref_squeeze %152 : memref<1x128xf32, #tpu.memory_space<any>> -> memref<128xf32, #tpu.memory_space<any>>
    %c256_i32_112 = arith.constant 256 : i32
    %154 = tpu.memref_slice %arg6[%c5_i32_108, %c256_i32_112] : memref<256x512xf32, #tpu.memory_space<vmem>> -> memref<1x128xf32, #tpu.memory_space<vmem>>
    %155 = tpu.memref_squeeze %154 : memref<1x128xf32, #tpu.memory_space<vmem>> -> memref<128xf32, #tpu.memory_space<vmem>>
    %156 = tpu.memref_slice %arg7[%c5_i32_109, %c2_i32_110] : memref<8x4x!tpu.dma_semaphore, #tpu.memory_space<semaphore_mem>> -> memref<1x1x!tpu.dma_semaphore, #tpu.memory_space<semaphore_mem>>
    %157 = tpu.memref_squeeze %156 : memref<1x1x!tpu.dma_semaphore, #tpu.memory_space<semaphore_mem>> -> memref<!tpu.dma_semaphore, #tpu.memory_space<semaphore_mem>>
    tpu.enqueue_dma source(%153 : memref<128xf32, #tpu.memory_space<any>>) target(%155 : memref<128xf32, #tpu.memory_space<vmem>>) target_semaphore(%157 : memref<!tpu.dma_semaphore, #tpu.memory_space<semaphore_mem>>)
    %c5_i32_113 = arith.constant 5 : i32
    %c5_i32_114 = arith.constant 5 : i32
    %c3_i32_115 = arith.constant 3 : i32
    %c0_i32_116 = arith.constant 0 : i32
    %158 = tpu.memref_slice %arg5[%139, %c0_i32_116] : memref<32x128xf32, #tpu.memory_space<any>> -> memref<1x128xf32, #tpu.memory_space<any>>
    %159 = tpu.memref_squeeze %158 : memref<1x128xf32, #tpu.memory_space<any>> -> memref<128xf32, #tpu.memory_space<any>>
    %c384_i32_117 = arith.constant 384 : i32
    %160 = tpu.memref_slice %arg6[%c5_i32_113, %c384_i32_117] : memref<256x512xf32, #tpu.memory_space<vmem>> -> memref<1x128xf32, #tpu.memory_space<vmem>>
    %161 = tpu.memref_squeeze %160 : memref<1x128xf32, #tpu.memory_space<vmem>> -> memref<128xf32, #tpu.memory_space<vmem>>
    %162 = tpu.memref_slice %arg7[%c5_i32_114, %c3_i32_115] : memref<8x4x!tpu.dma_semaphore, #tpu.memory_space<semaphore_mem>> -> memref<1x1x!tpu.dma_semaphore, #tpu.memory_space<semaphore_mem>>
    %163 = tpu.memref_squeeze %162 : memref<1x1x!tpu.dma_semaphore, #tpu.memory_space<semaphore_mem>> -> memref<!tpu.dma_semaphore, #tpu.memory_space<semaphore_mem>>
    tpu.enqueue_dma source(%159 : memref<128xf32, #tpu.memory_space<any>>) target(%161 : memref<128xf32, #tpu.memory_space<vmem>>) target_semaphore(%163 : memref<!tpu.dma_semaphore, #tpu.memory_space<semaphore_mem>>)
    %c6_i32 = arith.constant 6 : i32
    %164 = arith.addi %1, %c6_i32 : i32
    %165 = arith.index_cast %164 : i32 to index
    %166 = memref.load %arg1[%165] : memref<256xi32, #tpu.memory_space<smem>>
    %c6_i32_118 = arith.constant 6 : i32
    %c6_i32_119 = arith.constant 6 : i32
    %c0_i32_120 = arith.constant 0 : i32
    %c0_i32_121 = arith.constant 0 : i32
    %167 = tpu.memref_slice %arg2[%166, %c0_i32_121] : memref<32x128xf32, #tpu.memory_space<any>> -> memref<1x128xf32, #tpu.memory_space<any>>
    %168 = tpu.memref_squeeze %167 : memref<1x128xf32, #tpu.memory_space<any>> -> memref<128xf32, #tpu.memory_space<any>>
    %c0_i32_122 = arith.constant 0 : i32
    %169 = tpu.memref_slice %arg6[%c6_i32_118, %c0_i32_122] : memref<256x512xf32, #tpu.memory_space<vmem>> -> memref<1x128xf32, #tpu.memory_space<vmem>>
    %170 = tpu.memref_squeeze %169 : memref<1x128xf32, #tpu.memory_space<vmem>> -> memref<128xf32, #tpu.memory_space<vmem>>
    %171 = tpu.memref_slice %arg7[%c6_i32_119, %c0_i32_120] : memref<8x4x!tpu.dma_semaphore, #tpu.memory_space<semaphore_mem>> -> memref<1x1x!tpu.dma_semaphore, #tpu.memory_space<semaphore_mem>>
    %172 = tpu.memref_squeeze %171 : memref<1x1x!tpu.dma_semaphore, #tpu.memory_space<semaphore_mem>> -> memref<!tpu.dma_semaphore, #tpu.memory_space<semaphore_mem>>
    tpu.enqueue_dma source(%168 : memref<128xf32, #tpu.memory_space<any>>) target(%170 : memref<128xf32, #tpu.memory_space<vmem>>) target_semaphore(%172 : memref<!tpu.dma_semaphore, #tpu.memory_space<semaphore_mem>>)
    %c6_i32_123 = arith.constant 6 : i32
    %c6_i32_124 = arith.constant 6 : i32
    %c1_i32_125 = arith.constant 1 : i32
    %c0_i32_126 = arith.constant 0 : i32
    %173 = tpu.memref_slice %arg3[%166, %c0_i32_126] : memref<32x128xf32, #tpu.memory_space<any>> -> memref<1x128xf32, #tpu.memory_space<any>>
    %174 = tpu.memref_squeeze %173 : memref<1x128xf32, #tpu.memory_space<any>> -> memref<128xf32, #tpu.memory_space<any>>
    %c128_i32_127 = arith.constant 128 : i32
    %175 = tpu.memref_slice %arg6[%c6_i32_123, %c128_i32_127] : memref<256x512xf32, #tpu.memory_space<vmem>> -> memref<1x128xf32, #tpu.memory_space<vmem>>
    %176 = tpu.memref_squeeze %175 : memref<1x128xf32, #tpu.memory_space<vmem>> -> memref<128xf32, #tpu.memory_space<vmem>>
    %177 = tpu.memref_slice %arg7[%c6_i32_124, %c1_i32_125] : memref<8x4x!tpu.dma_semaphore, #tpu.memory_space<semaphore_mem>> -> memref<1x1x!tpu.dma_semaphore, #tpu.memory_space<semaphore_mem>>
    %178 = tpu.memref_squeeze %177 : memref<1x1x!tpu.dma_semaphore, #tpu.memory_space<semaphore_mem>> -> memref<!tpu.dma_semaphore, #tpu.memory_space<semaphore_mem>>
    tpu.enqueue_dma source(%174 : memref<128xf32, #tpu.memory_space<any>>) target(%176 : memref<128xf32, #tpu.memory_space<vmem>>) target_semaphore(%178 : memref<!tpu.dma_semaphore, #tpu.memory_space<semaphore_mem>>)
    %c6_i32_128 = arith.constant 6 : i32
    %c6_i32_129 = arith.constant 6 : i32
    %c2_i32_130 = arith.constant 2 : i32
    %c0_i32_131 = arith.constant 0 : i32
    %179 = tpu.memref_slice %arg4[%166, %c0_i32_131] : memref<32x128xf32, #tpu.memory_space<any>> -> memref<1x128xf32, #tpu.memory_space<any>>
    %180 = tpu.memref_squeeze %179 : memref<1x128xf32, #tpu.memory_space<any>> -> memref<128xf32, #tpu.memory_space<any>>
    %c256_i32_132 = arith.constant 256 : i32
    %181 = tpu.memref_slice %arg6[%c6_i32_128, %c256_i32_132] : memref<256x512xf32, #tpu.memory_space<vmem>> -> memref<1x128xf32, #tpu.memory_space<vmem>>
    %182 = tpu.memref_squeeze %181 : memref<1x128xf32, #tpu.memory_space<vmem>> -> memref<128xf32, #tpu.memory_space<vmem>>
    %183 = tpu.memref_slice %arg7[%c6_i32_129, %c2_i32_130] : memref<8x4x!tpu.dma_semaphore, #tpu.memory_space<semaphore_mem>> -> memref<1x1x!tpu.dma_semaphore, #tpu.memory_space<semaphore_mem>>
    %184 = tpu.memref_squeeze %183 : memref<1x1x!tpu.dma_semaphore, #tpu.memory_space<semaphore_mem>> -> memref<!tpu.dma_semaphore, #tpu.memory_space<semaphore_mem>>
    tpu.enqueue_dma source(%180 : memref<128xf32, #tpu.memory_space<any>>) target(%182 : memref<128xf32, #tpu.memory_space<vmem>>) target_semaphore(%184 : memref<!tpu.dma_semaphore, #tpu.memory_space<semaphore_mem>>)
    %c6_i32_133 = arith.constant 6 : i32
    %c6_i32_134 = arith.constant 6 : i32
    %c3_i32_135 = arith.constant 3 : i32
    %c0_i32_136 = arith.constant 0 : i32
    %185 = tpu.memref_slice %arg5[%166, %c0_i32_136] : memref<32x128xf32, #tpu.memory_space<any>> -> memref<1x128xf32, #tpu.memory_space<any>>
    %186 = tpu.memref_squeeze %185 : memref<1x128xf32, #tpu.memory_space<any>> -> memref<128xf32, #tpu.memory_space<any>>
    %c384_i32_137 = arith.constant 384 : i32
    %187 = tpu.memref_slice %arg6[%c6_i32_133, %c384_i32_137] : memref<256x512xf32, #tpu.memory_space<vmem>> -> memref<1x128xf32, #tpu.memory_space<vmem>>
    %188 = tpu.memref_squeeze %187 : memref<1x128xf32, #tpu.memory_space<vmem>> -> memref<128xf32, #tpu.memory_space<vmem>>
    %189 = tpu.memref_slice %arg7[%c6_i32_134, %c3_i32_135] : memref<8x4x!tpu.dma_semaphore, #tpu.memory_space<semaphore_mem>> -> memref<1x1x!tpu.dma_semaphore, #tpu.memory_space<semaphore_mem>>
    %190 = tpu.memref_squeeze %189 : memref<1x1x!tpu.dma_semaphore, #tpu.memory_space<semaphore_mem>> -> memref<!tpu.dma_semaphore, #tpu.memory_space<semaphore_mem>>
    tpu.enqueue_dma source(%186 : memref<128xf32, #tpu.memory_space<any>>) target(%188 : memref<128xf32, #tpu.memory_space<vmem>>) target_semaphore(%190 : memref<!tpu.dma_semaphore, #tpu.memory_space<semaphore_mem>>)
    %c7_i32 = arith.constant 7 : i32
    %191 = arith.addi %1, %c7_i32 : i32
    %192 = arith.index_cast %191 : i32 to index
    %193 = memref.load %arg1[%192] : memref<256xi32, #tpu.memory_space<smem>>
    %c7_i32_138 = arith.constant 7 : i32
    %c7_i32_139 = arith.constant 7 : i32
    %c0_i32_140 = arith.constant 0 : i32
    %c0_i32_141 = arith.constant 0 : i32
    %194 = tpu.memref_slice %arg2[%193, %c0_i32_141] : memref<32x128xf32, #tpu.memory_space<any>> -> memref<1x128xf32, #tpu.memory_space<any>>
    %195 = tpu.memref_squeeze %194 : memref<1x128xf32, #tpu.memory_space<any>> -> memref<128xf32, #tpu.memory_space<any>>
    %c0_i32_142 = arith.constant 0 : i32
    %196 = tpu.memref_slice %arg6[%c7_i32_138, %c0_i32_142] : memref<256x512xf32, #tpu.memory_space<vmem>> -> memref<1x128xf32, #tpu.memory_space<vmem>>
    %197 = tpu.memref_squeeze %196 : memref<1x128xf32, #tpu.memory_space<vmem>> -> memref<128xf32, #tpu.memory_space<vmem>>
    %198 = tpu.memref_slice %arg7[%c7_i32_139, %c0_i32_140] : memref<8x4x!tpu.dma_semaphore, #tpu.memory_space<semaphore_mem>> -> memref<1x1x!tpu.dma_semaphore, #tpu.memory_space<semaphore_mem>>
    %199 = tpu.memref_squeeze %198 : memref<1x1x!tpu.dma_semaphore, #tpu.memory_space<semaphore_mem>> -> memref<!tpu.dma_semaphore, #tpu.memory_space<semaphore_mem>>
    tpu.enqueue_dma source(%195 : memref<128xf32, #tpu.memory_space<any>>) target(%197 : memref<128xf32, #tpu.memory_space<vmem>>) target_semaphore(%199 : memref<!tpu.dma_semaphore, #tpu.memory_space<semaphore_mem>>)
    %c7_i32_143 = arith.constant 7 : i32
    %c7_i32_144 = arith.constant 7 : i32
    %c1_i32_145 = arith.constant 1 : i32
    %c0_i32_146 = arith.constant 0 : i32
    %200 = tpu.memref_slice %arg3[%193, %c0_i32_146] : memref<32x128xf32, #tpu.memory_space<any>> -> memref<1x128xf32, #tpu.memory_space<any>>
    %201 = tpu.memref_squeeze %200 : memref<1x128xf32, #tpu.memory_space<any>> -> memref<128xf32, #tpu.memory_space<any>>
    %c128_i32_147 = arith.constant 128 : i32
    %202 = tpu.memref_slice %arg6[%c7_i32_143, %c128_i32_147] : memref<256x512xf32, #tpu.memory_space<vmem>> -> memref<1x128xf32, #tpu.memory_space<vmem>>
    %203 = tpu.memref_squeeze %202 : memref<1x128xf32, #tpu.memory_space<vmem>> -> memref<128xf32, #tpu.memory_space<vmem>>
    %204 = tpu.memref_slice %arg7[%c7_i32_144, %c1_i32_145] : memref<8x4x!tpu.dma_semaphore, #tpu.memory_space<semaphore_mem>> -> memref<1x1x!tpu.dma_semaphore, #tpu.memory_space<semaphore_mem>>
    %205 = tpu.memref_squeeze %204 : memref<1x1x!tpu.dma_semaphore, #tpu.memory_space<semaphore_mem>> -> memref<!tpu.dma_semaphore, #tpu.memory_space<semaphore_mem>>
    tpu.enqueue_dma source(%201 : memref<128xf32, #tpu.memory_space<any>>) target(%203 : memref<128xf32, #tpu.memory_space<vmem>>) target_semaphore(%205 : memref<!tpu.dma_semaphore, #tpu.memory_space<semaphore_mem>>)
    %c7_i32_148 = arith.constant 7 : i32
    %c7_i32_149 = arith.constant 7 : i32
    %c2_i32_150 = arith.constant 2 : i32
    %c0_i32_151 = arith.constant 0 : i32
    %206 = tpu.memref_slice %arg4[%193, %c0_i32_151] : memref<32x128xf32, #tpu.memory_space<any>> -> memref<1x128xf32, #tpu.memory_space<any>>
    %207 = tpu.memref_squeeze %206 : memref<1x128xf32, #tpu.memory_space<any>> -> memref<128xf32, #tpu.memory_space<any>>
    %c256_i32_152 = arith.constant 256 : i32
    %208 = tpu.memref_slice %arg6[%c7_i32_148, %c256_i32_152] : memref<256x512xf32, #tpu.memory_space<vmem>> -> memref<1x128xf32, #tpu.memory_space<vmem>>
    %209 = tpu.memref_squeeze %208 : memref<1x128xf32, #tpu.memory_space<vmem>> -> memref<128xf32, #tpu.memory_space<vmem>>
    %210 = tpu.memref_slice %arg7[%c7_i32_149, %c2_i32_150] : memref<8x4x!tpu.dma_semaphore, #tpu.memory_space<semaphore_mem>> -> memref<1x1x!tpu.dma_semaphore, #tpu.memory_space<semaphore_mem>>
    %211 = tpu.memref_squeeze %210 : memref<1x1x!tpu.dma_semaphore, #tpu.memory_space<semaphore_mem>> -> memref<!tpu.dma_semaphore, #tpu.memory_space<semaphore_mem>>
    tpu.enqueue_dma source(%207 : memref<128xf32, #tpu.memory_space<any>>) target(%209 : memref<128xf32, #tpu.memory_space<vmem>>) target_semaphore(%211 : memref<!tpu.dma_semaphore, #tpu.memory_space<semaphore_mem>>)
    %c7_i32_153 = arith.constant 7 : i32
    %c7_i32_154 = arith.constant 7 : i32
    %c3_i32_155 = arith.constant 3 : i32
    %c0_i32_156 = arith.constant 0 : i32
    %212 = tpu.memref_slice %arg5[%193, %c0_i32_156] : memref<32x128xf32, #tpu.memory_space<any>> -> memref<1x128xf32, #tpu.memory_space<any>>
    %213 = tpu.memref_squeeze %212 : memref<1x128xf32, #tpu.memory_space<any>> -> memref<128xf32, #tpu.memory_space<any>>
    %c384_i32_157 = arith.constant 384 : i32
    %214 = tpu.memref_slice %arg6[%c7_i32_153, %c384_i32_157] : memref<256x512xf32, #tpu.memory_space<vmem>> -> memref<1x128xf32, #tpu.memory_space<vmem>>
    %215 = tpu.memref_squeeze %214 : memref<1x128xf32, #tpu.memory_space<vmem>> -> memref<128xf32, #tpu.memory_space<vmem>>
    %216 = tpu.memref_slice %arg7[%c7_i32_154, %c3_i32_155] : memref<8x4x!tpu.dma_semaphore, #tpu.memory_space<semaphore_mem>> -> memref<1x1x!tpu.dma_semaphore, #tpu.memory_space<semaphore_mem>>
    %217 = tpu.memref_squeeze %216 : memref<1x1x!tpu.dma_semaphore, #tpu.memory_space<semaphore_mem>> -> memref<!tpu.dma_semaphore, #tpu.memory_space<semaphore_mem>>
    tpu.enqueue_dma source(%213 : memref<128xf32, #tpu.memory_space<any>>) target(%215 : memref<128xf32, #tpu.memory_space<vmem>>) target_semaphore(%217 : memref<!tpu.dma_semaphore, #tpu.memory_space<semaphore_mem>>)
    %c0_i32_158 = arith.constant 0 : i32
    %c248_i32 = arith.constant 248 : i32
    %218 = arith.addi %c0_i32_158, %c248_i32 : i32
    %c1_i32_159 = arith.constant 1 : i32
    scf.for %arg8 = %c0_i32_158 to %218 step %c1_i32_159  : i32 {
      %c8_i32 = arith.constant 8 : i32
      %c0_i32_346 = arith.constant 0 : i32
      %411 = arith.cmpi eq, %c8_i32, %c0_i32_346 : i32
      %c1_i32_347 = arith.constant 1 : i32
      %412 = arith.select %411, %c1_i32_347, %c8_i32 : i32
      %413 = arith.remsi %arg8, %412 : i32
      %c0_i32_348 = arith.constant 0 : i32
      %414 = arith.cmpi ne, %413, %c0_i32_348 : i32
      %c0_i32_349 = arith.constant 0 : i32
      %415 = arith.cmpi slt, %413, %c0_i32_349 : i32
      %c0_i32_350 = arith.constant 0 : i32
      %416 = arith.cmpi slt, %412, %c0_i32_350 : i32
      %417 = arith.xori %415, %416 : i1
      %418 = arith.andi %417, %414 : i1
      %419 = arith.addi %413, %412 : i32
      %420 = arith.select %418, %419, %413 : i32
      %c0_i32_351 = arith.constant 0 : i32
      %c0_i32_352 = arith.constant 0 : i32
      %c0_i32_353 = arith.constant 0 : i32
      %421 = tpu.memref_slice %arg2[%c0_i32_351, %c0_i32_353] : memref<32x128xf32, #tpu.memory_space<any>> -> memref<1x128xf32, #tpu.memory_space<any>>
      %422 = tpu.memref_squeeze %421 : memref<1x128xf32, #tpu.memory_space<any>> -> memref<128xf32, #tpu.memory_space<any>>
      %c0_i32_354 = arith.constant 0 : i32
      %423 = tpu.memref_slice %arg6[%arg8, %c0_i32_354] : memref<256x512xf32, #tpu.memory_space<vmem>> -> memref<1x128xf32, #tpu.memory_space<vmem>>
      %424 = tpu.memref_squeeze %423 : memref<1x128xf32, #tpu.memory_space<vmem>> -> memref<128xf32, #tpu.memory_space<vmem>>
      %425 = tpu.memref_slice %arg7[%420, %c0_i32_352] : memref<8x4x!tpu.dma_semaphore, #tpu.memory_space<semaphore_mem>> -> memref<1x1x!tpu.dma_semaphore, #tpu.memory_space<semaphore_mem>>
      %426 = tpu.memref_squeeze %425 : memref<1x1x!tpu.dma_semaphore, #tpu.memory_space<semaphore_mem>> -> memref<!tpu.dma_semaphore, #tpu.memory_space<semaphore_mem>>
      tpu.wait_dma2 semaphore(%426 : memref<!tpu.dma_semaphore, #tpu.memory_space<semaphore_mem>>) src(%422 : memref<128xf32, #tpu.memory_space<any>>) dst(%424 : memref<128xf32, #tpu.memory_space<vmem>>)
      %c0_i32_355 = arith.constant 0 : i32
      %c1_i32_356 = arith.constant 1 : i32
      %c0_i32_357 = arith.constant 0 : i32
      %427 = tpu.memref_slice %arg3[%c0_i32_355, %c0_i32_357] : memref<32x128xf32, #tpu.memory_space<any>> -> memref<1x128xf32, #tpu.memory_space<any>>
      %428 = tpu.memref_squeeze %427 : memref<1x128xf32, #tpu.memory_space<any>> -> memref<128xf32, #tpu.memory_space<any>>
      %c128_i32_358 = arith.constant 128 : i32
      %429 = tpu.memref_slice %arg6[%arg8, %c128_i32_358] : memref<256x512xf32, #tpu.memory_space<vmem>> -> memref<1x128xf32, #tpu.memory_space<vmem>>
      %430 = tpu.memref_squeeze %429 : memref<1x128xf32, #tpu.memory_space<vmem>> -> memref<128xf32, #tpu.memory_space<vmem>>
      %431 = tpu.memref_slice %arg7[%420, %c1_i32_356] : memref<8x4x!tpu.dma_semaphore, #tpu.memory_space<semaphore_mem>> -> memref<1x1x!tpu.dma_semaphore, #tpu.memory_space<semaphore_mem>>
      %432 = tpu.memref_squeeze %431 : memref<1x1x!tpu.dma_semaphore, #tpu.memory_space<semaphore_mem>> -> memref<!tpu.dma_semaphore, #tpu.memory_space<semaphore_mem>>
      tpu.wait_dma2 semaphore(%432 : memref<!tpu.dma_semaphore, #tpu.memory_space<semaphore_mem>>) src(%428 : memref<128xf32, #tpu.memory_space<any>>) dst(%430 : memref<128xf32, #tpu.memory_space<vmem>>)
      %c0_i32_359 = arith.constant 0 : i32
      %c2_i32_360 = arith.constant 2 : i32
      %c0_i32_361 = arith.constant 0 : i32
      %433 = tpu.memref_slice %arg4[%c0_i32_359, %c0_i32_361] : memref<32x128xf32, #tpu.memory_space<any>> -> memref<1x128xf32, #tpu.memory_space<any>>
      %434 = tpu.memref_squeeze %433 : memref<1x128xf32, #tpu.memory_space<any>> -> memref<128xf32, #tpu.memory_space<any>>
      %c256_i32_362 = arith.constant 256 : i32
      %435 = tpu.memref_slice %arg6[%arg8, %c256_i32_362] : memref<256x512xf32, #tpu.memory_space<vmem>> -> memref<1x128xf32, #tpu.memory_space<vmem>>
      %436 = tpu.memref_squeeze %435 : memref<1x128xf32, #tpu.memory_space<vmem>> -> memref<128xf32, #tpu.memory_space<vmem>>
      %437 = tpu.memref_slice %arg7[%420, %c2_i32_360] : memref<8x4x!tpu.dma_semaphore, #tpu.memory_space<semaphore_mem>> -> memref<1x1x!tpu.dma_semaphore, #tpu.memory_space<semaphore_mem>>
      %438 = tpu.memref_squeeze %437 : memref<1x1x!tpu.dma_semaphore, #tpu.memory_space<semaphore_mem>> -> memref<!tpu.dma_semaphore, #tpu.memory_space<semaphore_mem>>
      tpu.wait_dma2 semaphore(%438 : memref<!tpu.dma_semaphore, #tpu.memory_space<semaphore_mem>>) src(%434 : memref<128xf32, #tpu.memory_space<any>>) dst(%436 : memref<128xf32, #tpu.memory_space<vmem>>)
      %c0_i32_363 = arith.constant 0 : i32
      %c3_i32_364 = arith.constant 3 : i32
      %c0_i32_365 = arith.constant 0 : i32
      %439 = tpu.memref_slice %arg5[%c0_i32_363, %c0_i32_365] : memref<32x128xf32, #tpu.memory_space<any>> -> memref<1x128xf32, #tpu.memory_space<any>>
      %440 = tpu.memref_squeeze %439 : memref<1x128xf32, #tpu.memory_space<any>> -> memref<128xf32, #tpu.memory_space<any>>
      %c384_i32_366 = arith.constant 384 : i32
      %441 = tpu.memref_slice %arg6[%arg8, %c384_i32_366] : memref<256x512xf32, #tpu.memory_space<vmem>> -> memref<1x128xf32, #tpu.memory_space<vmem>>
      %442 = tpu.memref_squeeze %441 : memref<1x128xf32, #tpu.memory_space<vmem>> -> memref<128xf32, #tpu.memory_space<vmem>>
      %443 = tpu.memref_slice %arg7[%420, %c3_i32_364] : memref<8x4x!tpu.dma_semaphore, #tpu.memory_space<semaphore_mem>> -> memref<1x1x!tpu.dma_semaphore, #tpu.memory_space<semaphore_mem>>
      %444 = tpu.memref_squeeze %443 : memref<1x1x!tpu.dma_semaphore, #tpu.memory_space<semaphore_mem>> -> memref<!tpu.dma_semaphore, #tpu.memory_space<semaphore_mem>>
      tpu.wait_dma2 semaphore(%444 : memref<!tpu.dma_semaphore, #tpu.memory_space<semaphore_mem>>) src(%440 : memref<128xf32, #tpu.memory_space<any>>) dst(%442 : memref<128xf32, #tpu.memory_space<vmem>>)
      %c8_i32_367 = arith.constant 8 : i32
      %445 = arith.addi %arg8, %c8_i32_367 : i32
      %c8_i32_368 = arith.constant 8 : i32
      %c0_i32_369 = arith.constant 0 : i32
      %446 = arith.cmpi eq, %c8_i32_368, %c0_i32_369 : i32
      %c1_i32_370 = arith.constant 1 : i32
      %447 = arith.select %446, %c1_i32_370, %c8_i32_368 : i32
      %448 = arith.remsi %445, %447 : i32
      %c0_i32_371 = arith.constant 0 : i32
      %449 = arith.cmpi ne, %448, %c0_i32_371 : i32
      %c0_i32_372 = arith.constant 0 : i32
      %450 = arith.cmpi slt, %448, %c0_i32_372 : i32
      %c0_i32_373 = arith.constant 0 : i32
      %451 = arith.cmpi slt, %447, %c0_i32_373 : i32
      %452 = arith.xori %450, %451 : i1
      %453 = arith.andi %452, %449 : i1
      %454 = arith.addi %448, %447 : i32
      %455 = arith.select %453, %454, %448 : i32
      %456 = arith.addi %1, %445 : i32
      %457 = arith.index_cast %456 : i32 to index
      %458 = memref.load %arg1[%457] : memref<256xi32, #tpu.memory_space<smem>>
      %c0_i32_374 = arith.constant 0 : i32
      %c0_i32_375 = arith.constant 0 : i32
      %459 = tpu.memref_slice %arg2[%458, %c0_i32_375] : memref<32x128xf32, #tpu.memory_space<any>> -> memref<1x128xf32, #tpu.memory_space<any>>
      %460 = tpu.memref_squeeze %459 : memref<1x128xf32, #tpu.memory_space<any>> -> memref<128xf32, #tpu.memory_space<any>>
      %c0_i32_376 = arith.constant 0 : i32
      %461 = tpu.memref_slice %arg6[%445, %c0_i32_376] : memref<256x512xf32, #tpu.memory_space<vmem>> -> memref<1x128xf32, #tpu.memory_space<vmem>>
      %462 = tpu.memref_squeeze %461 : memref<1x128xf32, #tpu.memory_space<vmem>> -> memref<128xf32, #tpu.memory_space<vmem>>
      %463 = tpu.memref_slice %arg7[%455, %c0_i32_374] : memref<8x4x!tpu.dma_semaphore, #tpu.memory_space<semaphore_mem>> -> memref<1x1x!tpu.dma_semaphore, #tpu.memory_space<semaphore_mem>>
      %464 = tpu.memref_squeeze %463 : memref<1x1x!tpu.dma_semaphore, #tpu.memory_space<semaphore_mem>> -> memref<!tpu.dma_semaphore, #tpu.memory_space<semaphore_mem>>
      tpu.enqueue_dma source(%460 : memref<128xf32, #tpu.memory_space<any>>) target(%462 : memref<128xf32, #tpu.memory_space<vmem>>) target_semaphore(%464 : memref<!tpu.dma_semaphore, #tpu.memory_space<semaphore_mem>>)
      %c1_i32_377 = arith.constant 1 : i32
      %c0_i32_378 = arith.constant 0 : i32
      %465 = tpu.memref_slice %arg3[%458, %c0_i32_378] : memref<32x128xf32, #tpu.memory_space<any>> -> memref<1x128xf32, #tpu.memory_space<any>>
      %466 = tpu.memref_squeeze %465 : memref<1x128xf32, #tpu.memory_space<any>> -> memref<128xf32, #tpu.memory_space<any>>
      %c128_i32_379 = arith.constant 128 : i32
      %467 = tpu.memref_slice %arg6[%445, %c128_i32_379] : memref<256x512xf32, #tpu.memory_space<vmem>> -> memref<1x128xf32, #tpu.memory_space<vmem>>
      %468 = tpu.memref_squeeze %467 : memref<1x128xf32, #tpu.memory_space<vmem>> -> memref<128xf32, #tpu.memory_space<vmem>>
      %469 = tpu.memref_slice %arg7[%455, %c1_i32_377] : memref<8x4x!tpu.dma_semaphore, #tpu.memory_space<semaphore_mem>> -> memref<1x1x!tpu.dma_semaphore, #tpu.memory_space<semaphore_mem>>
      %470 = tpu.memref_squeeze %469 : memref<1x1x!tpu.dma_semaphore, #tpu.memory_space<semaphore_mem>> -> memref<!tpu.dma_semaphore, #tpu.memory_space<semaphore_mem>>
      tpu.enqueue_dma source(%466 : memref<128xf32, #tpu.memory_space<any>>) target(%468 : memref<128xf32, #tpu.memory_space<vmem>>) target_semaphore(%470 : memref<!tpu.dma_semaphore, #tpu.memory_space<semaphore_mem>>)
      %c2_i32_380 = arith.constant 2 : i32
      %c0_i32_381 = arith.constant 0 : i32
      %471 = tpu.memref_slice %arg4[%458, %c0_i32_381] : memref<32x128xf32, #tpu.memory_space<any>> -> memref<1x128xf32, #tpu.memory_space<any>>
      %472 = tpu.memref_squeeze %471 : memref<1x128xf32, #tpu.memory_space<any>> -> memref<128xf32, #tpu.memory_space<any>>
      %c256_i32_382 = arith.constant 256 : i32
      %473 = tpu.memref_slice %arg6[%445, %c256_i32_382] : memref<256x512xf32, #tpu.memory_space<vmem>> -> memref<1x128xf32, #tpu.memory_space<vmem>>
      %474 = tpu.memref_squeeze %473 : memref<1x128xf32, #tpu.memory_space<vmem>> -> memref<128xf32, #tpu.memory_space<vmem>>
      %475 = tpu.memref_slice %arg7[%455, %c2_i32_380] : memref<8x4x!tpu.dma_semaphore, #tpu.memory_space<semaphore_mem>> -> memref<1x1x!tpu.dma_semaphore, #tpu.memory_space<semaphore_mem>>
      %476 = tpu.memref_squeeze %475 : memref<1x1x!tpu.dma_semaphore, #tpu.memory_space<semaphore_mem>> -> memref<!tpu.dma_semaphore, #tpu.memory_space<semaphore_mem>>
      tpu.enqueue_dma source(%472 : memref<128xf32, #tpu.memory_space<any>>) target(%474 : memref<128xf32, #tpu.memory_space<vmem>>) target_semaphore(%476 : memref<!tpu.dma_semaphore, #tpu.memory_space<semaphore_mem>>)
      %c3_i32_383 = arith.constant 3 : i32
      %c0_i32_384 = arith.constant 0 : i32
      %477 = tpu.memref_slice %arg5[%458, %c0_i32_384] : memref<32x128xf32, #tpu.memory_space<any>> -> memref<1x128xf32, #tpu.memory_space<any>>
      %478 = tpu.memref_squeeze %477 : memref<1x128xf32, #tpu.memory_space<any>> -> memref<128xf32, #tpu.memory_space<any>>
      %c384_i32_385 = arith.constant 384 : i32
      %479 = tpu.memref_slice %arg6[%445, %c384_i32_385] : memref<256x512xf32, #tpu.memory_space<vmem>> -> memref<1x128xf32, #tpu.memory_space<vmem>>
      %480 = tpu.memref_squeeze %479 : memref<1x128xf32, #tpu.memory_space<vmem>> -> memref<128xf32, #tpu.memory_space<vmem>>
      %481 = tpu.memref_slice %arg7[%455, %c3_i32_383] : memref<8x4x!tpu.dma_semaphore, #tpu.memory_space<semaphore_mem>> -> memref<1x1x!tpu.dma_semaphore, #tpu.memory_space<semaphore_mem>>
      %482 = tpu.memref_squeeze %481 : memref<1x1x!tpu.dma_semaphore, #tpu.memory_space<semaphore_mem>> -> memref<!tpu.dma_semaphore, #tpu.memory_space<semaphore_mem>>
      tpu.enqueue_dma source(%478 : memref<128xf32, #tpu.memory_space<any>>) target(%480 : memref<128xf32, #tpu.memory_space<vmem>>) target_semaphore(%482 : memref<!tpu.dma_semaphore, #tpu.memory_space<semaphore_mem>>)
    }
    %c248_i32_160 = arith.constant 248 : i32
    %c0_i32_161 = arith.constant 0 : i32
    %c248_i32_162 = arith.constant 248 : i32
    %c0_i32_163 = arith.constant 0 : i32
    %c0_i32_164 = arith.constant 0 : i32
    %c0_i32_165 = arith.constant 0 : i32
    %219 = tpu.memref_slice %arg2[%c0_i32_161, %c0_i32_165] : memref<32x128xf32, #tpu.memory_space<any>> -> memref<1x128xf32, #tpu.memory_space<any>>
    %220 = tpu.memref_squeeze %219 : memref<1x128xf32, #tpu.memory_space<any>> -> memref<128xf32, #tpu.memory_space<any>>
    %c0_i32_166 = arith.constant 0 : i32
    %221 = tpu.memref_slice %arg6[%c248_i32_162, %c0_i32_166] : memref<256x512xf32, #tpu.memory_space<vmem>> -> memref<1x128xf32, #tpu.memory_space<vmem>>
    %222 = tpu.memref_squeeze %221 : memref<1x128xf32, #tpu.memory_space<vmem>> -> memref<128xf32, #tpu.memory_space<vmem>>
    %223 = tpu.memref_slice %arg7[%c0_i32_163, %c0_i32_164] : memref<8x4x!tpu.dma_semaphore, #tpu.memory_space<semaphore_mem>> -> memref<1x1x!tpu.dma_semaphore, #tpu.memory_space<semaphore_mem>>
    %224 = tpu.memref_squeeze %223 : memref<1x1x!tpu.dma_semaphore, #tpu.memory_space<semaphore_mem>> -> memref<!tpu.dma_semaphore, #tpu.memory_space<semaphore_mem>>
    tpu.wait_dma2 semaphore(%224 : memref<!tpu.dma_semaphore, #tpu.memory_space<semaphore_mem>>) src(%220 : memref<128xf32, #tpu.memory_space<any>>) dst(%222 : memref<128xf32, #tpu.memory_space<vmem>>)
    %c0_i32_167 = arith.constant 0 : i32
    %c248_i32_168 = arith.constant 248 : i32
    %c0_i32_169 = arith.constant 0 : i32
    %c1_i32_170 = arith.constant 1 : i32
    %c0_i32_171 = arith.constant 0 : i32
    %225 = tpu.memref_slice %arg3[%c0_i32_167, %c0_i32_171] : memref<32x128xf32, #tpu.memory_space<any>> -> memref<1x128xf32, #tpu.memory_space<any>>
    %226 = tpu.memref_squeeze %225 : memref<1x128xf32, #tpu.memory_space<any>> -> memref<128xf32, #tpu.memory_space<any>>
    %c128_i32_172 = arith.constant 128 : i32
    %227 = tpu.memref_slice %arg6[%c248_i32_168, %c128_i32_172] : memref<256x512xf32, #tpu.memory_space<vmem>> -> memref<1x128xf32, #tpu.memory_space<vmem>>
    %228 = tpu.memref_squeeze %227 : memref<1x128xf32, #tpu.memory_space<vmem>> -> memref<128xf32, #tpu.memory_space<vmem>>
    %229 = tpu.memref_slice %arg7[%c0_i32_169, %c1_i32_170] : memref<8x4x!tpu.dma_semaphore, #tpu.memory_space<semaphore_mem>> -> memref<1x1x!tpu.dma_semaphore, #tpu.memory_space<semaphore_mem>>
    %230 = tpu.memref_squeeze %229 : memref<1x1x!tpu.dma_semaphore, #tpu.memory_space<semaphore_mem>> -> memref<!tpu.dma_semaphore, #tpu.memory_space<semaphore_mem>>
    tpu.wait_dma2 semaphore(%230 : memref<!tpu.dma_semaphore, #tpu.memory_space<semaphore_mem>>) src(%226 : memref<128xf32, #tpu.memory_space<any>>) dst(%228 : memref<128xf32, #tpu.memory_space<vmem>>)
    %c0_i32_173 = arith.constant 0 : i32
    %c248_i32_174 = arith.constant 248 : i32
    %c0_i32_175 = arith.constant 0 : i32
    %c2_i32_176 = arith.constant 2 : i32
    %c0_i32_177 = arith.constant 0 : i32
    %231 = tpu.memref_slice %arg4[%c0_i32_173, %c0_i32_177] : memref<32x128xf32, #tpu.memory_space<any>> -> memref<1x128xf32, #tpu.memory_space<any>>
    %232 = tpu.memref_squeeze %231 : memref<1x128xf32, #tpu.memory_space<any>> -> memref<128xf32, #tpu.memory_space<any>>
    %c256_i32_178 = arith.constant 256 : i32
    %233 = tpu.memref_slice %arg6[%c248_i32_174, %c256_i32_178] : memref<256x512xf32, #tpu.memory_space<vmem>> -> memref<1x128xf32, #tpu.memory_space<vmem>>
    %234 = tpu.memref_squeeze %233 : memref<1x128xf32, #tpu.memory_space<vmem>> -> memref<128xf32, #tpu.memory_space<vmem>>
    %235 = tpu.memref_slice %arg7[%c0_i32_175, %c2_i32_176] : memref<8x4x!tpu.dma_semaphore, #tpu.memory_space<semaphore_mem>> -> memref<1x1x!tpu.dma_semaphore, #tpu.memory_space<semaphore_mem>>
    %236 = tpu.memref_squeeze %235 : memref<1x1x!tpu.dma_semaphore, #tpu.memory_space<semaphore_mem>> -> memref<!tpu.dma_semaphore, #tpu.memory_space<semaphore_mem>>
    tpu.wait_dma2 semaphore(%236 : memref<!tpu.dma_semaphore, #tpu.memory_space<semaphore_mem>>) src(%232 : memref<128xf32, #tpu.memory_space<any>>) dst(%234 : memref<128xf32, #tpu.memory_space<vmem>>)
    %c0_i32_179 = arith.constant 0 : i32
    %c248_i32_180 = arith.constant 248 : i32
    %c0_i32_181 = arith.constant 0 : i32
    %c3_i32_182 = arith.constant 3 : i32
    %c0_i32_183 = arith.constant 0 : i32
    %237 = tpu.memref_slice %arg5[%c0_i32_179, %c0_i32_183] : memref<32x128xf32, #tpu.memory_space<any>> -> memref<1x128xf32, #tpu.memory_space<any>>
    %238 = tpu.memref_squeeze %237 : memref<1x128xf32, #tpu.memory_space<any>> -> memref<128xf32, #tpu.memory_space<any>>
    %c384_i32_184 = arith.constant 384 : i32
    %239 = tpu.memref_slice %arg6[%c248_i32_180, %c384_i32_184] : memref<256x512xf32, #tpu.memory_space<vmem>> -> memref<1x128xf32, #tpu.memory_space<vmem>>
    %240 = tpu.memref_squeeze %239 : memref<1x128xf32, #tpu.memory_space<vmem>> -> memref<128xf32, #tpu.memory_space<vmem>>
    %241 = tpu.memref_slice %arg7[%c0_i32_181, %c3_i32_182] : memref<8x4x!tpu.dma_semaphore, #tpu.memory_space<semaphore_mem>> -> memref<1x1x!tpu.dma_semaphore, #tpu.memory_space<semaphore_mem>>
    %242 = tpu.memref_squeeze %241 : memref<1x1x!tpu.dma_semaphore, #tpu.memory_space<semaphore_mem>> -> memref<!tpu.dma_semaphore, #tpu.memory_space<semaphore_mem>>
    tpu.wait_dma2 semaphore(%242 : memref<!tpu.dma_semaphore, #tpu.memory_space<semaphore_mem>>) src(%238 : memref<128xf32, #tpu.memory_space<any>>) dst(%240 : memref<128xf32, #tpu.memory_space<vmem>>)
    %c0_i32_185 = arith.constant 0 : i32
    %c249_i32 = arith.constant 249 : i32
    %c1_i32_186 = arith.constant 1 : i32
    %c0_i32_187 = arith.constant 0 : i32
    %c0_i32_188 = arith.constant 0 : i32
    %243 = tpu.memref_slice %arg2[%c0_i32_185, %c0_i32_188] : memref<32x128xf32, #tpu.memory_space<any>> -> memref<1x128xf32, #tpu.memory_space<any>>
    %244 = tpu.memref_squeeze %243 : memref<1x128xf32, #tpu.memory_space<any>> -> memref<128xf32, #tpu.memory_space<any>>
    %c0_i32_189 = arith.constant 0 : i32
    %245 = tpu.memref_slice %arg6[%c249_i32, %c0_i32_189] : memref<256x512xf32, #tpu.memory_space<vmem>> -> memref<1x128xf32, #tpu.memory_space<vmem>>
    %246 = tpu.memref_squeeze %245 : memref<1x128xf32, #tpu.memory_space<vmem>> -> memref<128xf32, #tpu.memory_space<vmem>>
    %247 = tpu.memref_slice %arg7[%c1_i32_186, %c0_i32_187] : memref<8x4x!tpu.dma_semaphore, #tpu.memory_space<semaphore_mem>> -> memref<1x1x!tpu.dma_semaphore, #tpu.memory_space<semaphore_mem>>
    %248 = tpu.memref_squeeze %247 : memref<1x1x!tpu.dma_semaphore, #tpu.memory_space<semaphore_mem>> -> memref<!tpu.dma_semaphore, #tpu.memory_space<semaphore_mem>>
    tpu.wait_dma2 semaphore(%248 : memref<!tpu.dma_semaphore, #tpu.memory_space<semaphore_mem>>) src(%244 : memref<128xf32, #tpu.memory_space<any>>) dst(%246 : memref<128xf32, #tpu.memory_space<vmem>>)
    %c0_i32_190 = arith.constant 0 : i32
    %c249_i32_191 = arith.constant 249 : i32
    %c1_i32_192 = arith.constant 1 : i32
    %c1_i32_193 = arith.constant 1 : i32
    %c0_i32_194 = arith.constant 0 : i32
    %249 = tpu.memref_slice %arg3[%c0_i32_190, %c0_i32_194] : memref<32x128xf32, #tpu.memory_space<any>> -> memref<1x128xf32, #tpu.memory_space<any>>
    %250 = tpu.memref_squeeze %249 : memref<1x128xf32, #tpu.memory_space<any>> -> memref<128xf32, #tpu.memory_space<any>>
    %c128_i32_195 = arith.constant 128 : i32
    %251 = tpu.memref_slice %arg6[%c249_i32_191, %c128_i32_195] : memref<256x512xf32, #tpu.memory_space<vmem>> -> memref<1x128xf32, #tpu.memory_space<vmem>>
    %252 = tpu.memref_squeeze %251 : memref<1x128xf32, #tpu.memory_space<vmem>> -> memref<128xf32, #tpu.memory_space<vmem>>
    %253 = tpu.memref_slice %arg7[%c1_i32_192, %c1_i32_193] : memref<8x4x!tpu.dma_semaphore, #tpu.memory_space<semaphore_mem>> -> memref<1x1x!tpu.dma_semaphore, #tpu.memory_space<semaphore_mem>>
    %254 = tpu.memref_squeeze %253 : memref<1x1x!tpu.dma_semaphore, #tpu.memory_space<semaphore_mem>> -> memref<!tpu.dma_semaphore, #tpu.memory_space<semaphore_mem>>
    tpu.wait_dma2 semaphore(%254 : memref<!tpu.dma_semaphore, #tpu.memory_space<semaphore_mem>>) src(%250 : memref<128xf32, #tpu.memory_space<any>>) dst(%252 : memref<128xf32, #tpu.memory_space<vmem>>)
    %c0_i32_196 = arith.constant 0 : i32
    %c249_i32_197 = arith.constant 249 : i32
    %c1_i32_198 = arith.constant 1 : i32
    %c2_i32_199 = arith.constant 2 : i32
    %c0_i32_200 = arith.constant 0 : i32
    %255 = tpu.memref_slice %arg4[%c0_i32_196, %c0_i32_200] : memref<32x128xf32, #tpu.memory_space<any>> -> memref<1x128xf32, #tpu.memory_space<any>>
    %256 = tpu.memref_squeeze %255 : memref<1x128xf32, #tpu.memory_space<any>> -> memref<128xf32, #tpu.memory_space<any>>
    %c256_i32_201 = arith.constant 256 : i32
    %257 = tpu.memref_slice %arg6[%c249_i32_197, %c256_i32_201] : memref<256x512xf32, #tpu.memory_space<vmem>> -> memref<1x128xf32, #tpu.memory_space<vmem>>
    %258 = tpu.memref_squeeze %257 : memref<1x128xf32, #tpu.memory_space<vmem>> -> memref<128xf32, #tpu.memory_space<vmem>>
    %259 = tpu.memref_slice %arg7[%c1_i32_198, %c2_i32_199] : memref<8x4x!tpu.dma_semaphore, #tpu.memory_space<semaphore_mem>> -> memref<1x1x!tpu.dma_semaphore, #tpu.memory_space<semaphore_mem>>
    %260 = tpu.memref_squeeze %259 : memref<1x1x!tpu.dma_semaphore, #tpu.memory_space<semaphore_mem>> -> memref<!tpu.dma_semaphore, #tpu.memory_space<semaphore_mem>>
    tpu.wait_dma2 semaphore(%260 : memref<!tpu.dma_semaphore, #tpu.memory_space<semaphore_mem>>) src(%256 : memref<128xf32, #tpu.memory_space<any>>) dst(%258 : memref<128xf32, #tpu.memory_space<vmem>>)
    %c0_i32_202 = arith.constant 0 : i32
    %c249_i32_203 = arith.constant 249 : i32
    %c1_i32_204 = arith.constant 1 : i32
    %c3_i32_205 = arith.constant 3 : i32
    %c0_i32_206 = arith.constant 0 : i32
    %261 = tpu.memref_slice %arg5[%c0_i32_202, %c0_i32_206] : memref<32x128xf32, #tpu.memory_space<any>> -> memref<1x128xf32, #tpu.memory_space<any>>
    %262 = tpu.memref_squeeze %261 : memref<1x128xf32, #tpu.memory_space<any>> -> memref<128xf32, #tpu.memory_space<any>>
    %c384_i32_207 = arith.constant 384 : i32
    %263 = tpu.memref_slice %arg6[%c249_i32_203, %c384_i32_207] : memref<256x512xf32, #tpu.memory_space<vmem>> -> memref<1x128xf32, #tpu.memory_space<vmem>>
    %264 = tpu.memref_squeeze %263 : memref<1x128xf32, #tpu.memory_space<vmem>> -> memref<128xf32, #tpu.memory_space<vmem>>
    %265 = tpu.memref_slice %arg7[%c1_i32_204, %c3_i32_205] : memref<8x4x!tpu.dma_semaphore, #tpu.memory_space<semaphore_mem>> -> memref<1x1x!tpu.dma_semaphore, #tpu.memory_space<semaphore_mem>>
    %266 = tpu.memref_squeeze %265 : memref<1x1x!tpu.dma_semaphore, #tpu.memory_space<semaphore_mem>> -> memref<!tpu.dma_semaphore, #tpu.memory_space<semaphore_mem>>
    tpu.wait_dma2 semaphore(%266 : memref<!tpu.dma_semaphore, #tpu.memory_space<semaphore_mem>>) src(%262 : memref<128xf32, #tpu.memory_space<any>>) dst(%264 : memref<128xf32, #tpu.memory_space<vmem>>)
    %c0_i32_208 = arith.constant 0 : i32
    %c250_i32 = arith.constant 250 : i32
    %c2_i32_209 = arith.constant 2 : i32
    %c0_i32_210 = arith.constant 0 : i32
    %c0_i32_211 = arith.constant 0 : i32
    %267 = tpu.memref_slice %arg2[%c0_i32_208, %c0_i32_211] : memref<32x128xf32, #tpu.memory_space<any>> -> memref<1x128xf32, #tpu.memory_space<any>>
    %268 = tpu.memref_squeeze %267 : memref<1x128xf32, #tpu.memory_space<any>> -> memref<128xf32, #tpu.memory_space<any>>
    %c0_i32_212 = arith.constant 0 : i32
    %269 = tpu.memref_slice %arg6[%c250_i32, %c0_i32_212] : memref<256x512xf32, #tpu.memory_space<vmem>> -> memref<1x128xf32, #tpu.memory_space<vmem>>
    %270 = tpu.memref_squeeze %269 : memref<1x128xf32, #tpu.memory_space<vmem>> -> memref<128xf32, #tpu.memory_space<vmem>>
    %271 = tpu.memref_slice %arg7[%c2_i32_209, %c0_i32_210] : memref<8x4x!tpu.dma_semaphore, #tpu.memory_space<semaphore_mem>> -> memref<1x1x!tpu.dma_semaphore, #tpu.memory_space<semaphore_mem>>
    %272 = tpu.memref_squeeze %271 : memref<1x1x!tpu.dma_semaphore, #tpu.memory_space<semaphore_mem>> -> memref<!tpu.dma_semaphore, #tpu.memory_space<semaphore_mem>>
    tpu.wait_dma2 semaphore(%272 : memref<!tpu.dma_semaphore, #tpu.memory_space<semaphore_mem>>) src(%268 : memref<128xf32, #tpu.memory_space<any>>) dst(%270 : memref<128xf32, #tpu.memory_space<vmem>>)
    %c0_i32_213 = arith.constant 0 : i32
    %c250_i32_214 = arith.constant 250 : i32
    %c2_i32_215 = arith.constant 2 : i32
    %c1_i32_216 = arith.constant 1 : i32
    %c0_i32_217 = arith.constant 0 : i32
    %273 = tpu.memref_slice %arg3[%c0_i32_213, %c0_i32_217] : memref<32x128xf32, #tpu.memory_space<any>> -> memref<1x128xf32, #tpu.memory_space<any>>
    %274 = tpu.memref_squeeze %273 : memref<1x128xf32, #tpu.memory_space<any>> -> memref<128xf32, #tpu.memory_space<any>>
    %c128_i32_218 = arith.constant 128 : i32
    %275 = tpu.memref_slice %arg6[%c250_i32_214, %c128_i32_218] : memref<256x512xf32, #tpu.memory_space<vmem>> -> memref<1x128xf32, #tpu.memory_space<vmem>>
    %276 = tpu.memref_squeeze %275 : memref<1x128xf32, #tpu.memory_space<vmem>> -> memref<128xf32, #tpu.memory_space<vmem>>
    %277 = tpu.memref_slice %arg7[%c2_i32_215, %c1_i32_216] : memref<8x4x!tpu.dma_semaphore, #tpu.memory_space<semaphore_mem>> -> memref<1x1x!tpu.dma_semaphore, #tpu.memory_space<semaphore_mem>>
    %278 = tpu.memref_squeeze %277 : memref<1x1x!tpu.dma_semaphore, #tpu.memory_space<semaphore_mem>> -> memref<!tpu.dma_semaphore, #tpu.memory_space<semaphore_mem>>
    tpu.wait_dma2 semaphore(%278 : memref<!tpu.dma_semaphore, #tpu.memory_space<semaphore_mem>>) src(%274 : memref<128xf32, #tpu.memory_space<any>>) dst(%276 : memref<128xf32, #tpu.memory_space<vmem>>)
    %c0_i32_219 = arith.constant 0 : i32
    %c250_i32_220 = arith.constant 250 : i32
    %c2_i32_221 = arith.constant 2 : i32
    %c2_i32_222 = arith.constant 2 : i32
    %c0_i32_223 = arith.constant 0 : i32
    %279 = tpu.memref_slice %arg4[%c0_i32_219, %c0_i32_223] : memref<32x128xf32, #tpu.memory_space<any>> -> memref<1x128xf32, #tpu.memory_space<any>>
    %280 = tpu.memref_squeeze %279 : memref<1x128xf32, #tpu.memory_space<any>> -> memref<128xf32, #tpu.memory_space<any>>
    %c256_i32_224 = arith.constant 256 : i32
    %281 = tpu.memref_slice %arg6[%c250_i32_220, %c256_i32_224] : memref<256x512xf32, #tpu.memory_space<vmem>> -> memref<1x128xf32, #tpu.memory_space<vmem>>
    %282 = tpu.memref_squeeze %281 : memref<1x128xf32, #tpu.memory_space<vmem>> -> memref<128xf32, #tpu.memory_space<vmem>>
    %283 = tpu.memref_slice %arg7[%c2_i32_221, %c2_i32_222] : memref<8x4x!tpu.dma_semaphore, #tpu.memory_space<semaphore_mem>> -> memref<1x1x!tpu.dma_semaphore, #tpu.memory_space<semaphore_mem>>
    %284 = tpu.memref_squeeze %283 : memref<1x1x!tpu.dma_semaphore, #tpu.memory_space<semaphore_mem>> -> memref<!tpu.dma_semaphore, #tpu.memory_space<semaphore_mem>>
    tpu.wait_dma2 semaphore(%284 : memref<!tpu.dma_semaphore, #tpu.memory_space<semaphore_mem>>) src(%280 : memref<128xf32, #tpu.memory_space<any>>) dst(%282 : memref<128xf32, #tpu.memory_space<vmem>>)
    %c0_i32_225 = arith.constant 0 : i32
    %c250_i32_226 = arith.constant 250 : i32
    %c2_i32_227 = arith.constant 2 : i32
    %c3_i32_228 = arith.constant 3 : i32
    %c0_i32_229 = arith.constant 0 : i32
    %285 = tpu.memref_slice %arg5[%c0_i32_225, %c0_i32_229] : memref<32x128xf32, #tpu.memory_space<any>> -> memref<1x128xf32, #tpu.memory_space<any>>
    %286 = tpu.memref_squeeze %285 : memref<1x128xf32, #tpu.memory_space<any>> -> memref<128xf32, #tpu.memory_space<any>>
    %c384_i32_230 = arith.constant 384 : i32
    %287 = tpu.memref_slice %arg6[%c250_i32_226, %c384_i32_230] : memref<256x512xf32, #tpu.memory_space<vmem>> -> memref<1x128xf32, #tpu.memory_space<vmem>>
    %288 = tpu.memref_squeeze %287 : memref<1x128xf32, #tpu.memory_space<vmem>> -> memref<128xf32, #tpu.memory_space<vmem>>
    %289 = tpu.memref_slice %arg7[%c2_i32_227, %c3_i32_228] : memref<8x4x!tpu.dma_semaphore, #tpu.memory_space<semaphore_mem>> -> memref<1x1x!tpu.dma_semaphore, #tpu.memory_space<semaphore_mem>>
    %290 = tpu.memref_squeeze %289 : memref<1x1x!tpu.dma_semaphore, #tpu.memory_space<semaphore_mem>> -> memref<!tpu.dma_semaphore, #tpu.memory_space<semaphore_mem>>
    tpu.wait_dma2 semaphore(%290 : memref<!tpu.dma_semaphore, #tpu.memory_space<semaphore_mem>>) src(%286 : memref<128xf32, #tpu.memory_space<any>>) dst(%288 : memref<128xf32, #tpu.memory_space<vmem>>)
    %c0_i32_231 = arith.constant 0 : i32
    %c251_i32 = arith.constant 251 : i32
    %c3_i32_232 = arith.constant 3 : i32
    %c0_i32_233 = arith.constant 0 : i32
    %c0_i32_234 = arith.constant 0 : i32
    %291 = tpu.memref_slice %arg2[%c0_i32_231, %c0_i32_234] : memref<32x128xf32, #tpu.memory_space<any>> -> memref<1x128xf32, #tpu.memory_space<any>>
    %292 = tpu.memref_squeeze %291 : memref<1x128xf32, #tpu.memory_space<any>> -> memref<128xf32, #tpu.memory_space<any>>
    %c0_i32_235 = arith.constant 0 : i32
    %293 = tpu.memref_slice %arg6[%c251_i32, %c0_i32_235] : memref<256x512xf32, #tpu.memory_space<vmem>> -> memref<1x128xf32, #tpu.memory_space<vmem>>
    %294 = tpu.memref_squeeze %293 : memref<1x128xf32, #tpu.memory_space<vmem>> -> memref<128xf32, #tpu.memory_space<vmem>>
    %295 = tpu.memref_slice %arg7[%c3_i32_232, %c0_i32_233] : memref<8x4x!tpu.dma_semaphore, #tpu.memory_space<semaphore_mem>> -> memref<1x1x!tpu.dma_semaphore, #tpu.memory_space<semaphore_mem>>
    %296 = tpu.memref_squeeze %295 : memref<1x1x!tpu.dma_semaphore, #tpu.memory_space<semaphore_mem>> -> memref<!tpu.dma_semaphore, #tpu.memory_space<semaphore_mem>>
    tpu.wait_dma2 semaphore(%296 : memref<!tpu.dma_semaphore, #tpu.memory_space<semaphore_mem>>) src(%292 : memref<128xf32, #tpu.memory_space<any>>) dst(%294 : memref<128xf32, #tpu.memory_space<vmem>>)
    %c0_i32_236 = arith.constant 0 : i32
    %c251_i32_237 = arith.constant 251 : i32
    %c3_i32_238 = arith.constant 3 : i32
    %c1_i32_239 = arith.constant 1 : i32
    %c0_i32_240 = arith.constant 0 : i32
    %297 = tpu.memref_slice %arg3[%c0_i32_236, %c0_i32_240] : memref<32x128xf32, #tpu.memory_space<any>> -> memref<1x128xf32, #tpu.memory_space<any>>
    %298 = tpu.memref_squeeze %297 : memref<1x128xf32, #tpu.memory_space<any>> -> memref<128xf32, #tpu.memory_space<any>>
    %c128_i32_241 = arith.constant 128 : i32
    %299 = tpu.memref_slice %arg6[%c251_i32_237, %c128_i32_241] : memref<256x512xf32, #tpu.memory_space<vmem>> -> memref<1x128xf32, #tpu.memory_space<vmem>>
    %300 = tpu.memref_squeeze %299 : memref<1x128xf32, #tpu.memory_space<vmem>> -> memref<128xf32, #tpu.memory_space<vmem>>
    %301 = tpu.memref_slice %arg7[%c3_i32_238, %c1_i32_239] : memref<8x4x!tpu.dma_semaphore, #tpu.memory_space<semaphore_mem>> -> memref<1x1x!tpu.dma_semaphore, #tpu.memory_space<semaphore_mem>>
    %302 = tpu.memref_squeeze %301 : memref<1x1x!tpu.dma_semaphore, #tpu.memory_space<semaphore_mem>> -> memref<!tpu.dma_semaphore, #tpu.memory_space<semaphore_mem>>
    tpu.wait_dma2 semaphore(%302 : memref<!tpu.dma_semaphore, #tpu.memory_space<semaphore_mem>>) src(%298 : memref<128xf32, #tpu.memory_space<any>>) dst(%300 : memref<128xf32, #tpu.memory_space<vmem>>)
    %c0_i32_242 = arith.constant 0 : i32
    %c251_i32_243 = arith.constant 251 : i32
    %c3_i32_244 = arith.constant 3 : i32
    %c2_i32_245 = arith.constant 2 : i32
    %c0_i32_246 = arith.constant 0 : i32
    %303 = tpu.memref_slice %arg4[%c0_i32_242, %c0_i32_246] : memref<32x128xf32, #tpu.memory_space<any>> -> memref<1x128xf32, #tpu.memory_space<any>>
    %304 = tpu.memref_squeeze %303 : memref<1x128xf32, #tpu.memory_space<any>> -> memref<128xf32, #tpu.memory_space<any>>
    %c256_i32_247 = arith.constant 256 : i32
    %305 = tpu.memref_slice %arg6[%c251_i32_243, %c256_i32_247] : memref<256x512xf32, #tpu.memory_space<vmem>> -> memref<1x128xf32, #tpu.memory_space<vmem>>
    %306 = tpu.memref_squeeze %305 : memref<1x128xf32, #tpu.memory_space<vmem>> -> memref<128xf32, #tpu.memory_space<vmem>>
    %307 = tpu.memref_slice %arg7[%c3_i32_244, %c2_i32_245] : memref<8x4x!tpu.dma_semaphore, #tpu.memory_space<semaphore_mem>> -> memref<1x1x!tpu.dma_semaphore, #tpu.memory_space<semaphore_mem>>
    %308 = tpu.memref_squeeze %307 : memref<1x1x!tpu.dma_semaphore, #tpu.memory_space<semaphore_mem>> -> memref<!tpu.dma_semaphore, #tpu.memory_space<semaphore_mem>>
    tpu.wait_dma2 semaphore(%308 : memref<!tpu.dma_semaphore, #tpu.memory_space<semaphore_mem>>) src(%304 : memref<128xf32, #tpu.memory_space<any>>) dst(%306 : memref<128xf32, #tpu.memory_space<vmem>>)
    %c0_i32_248 = arith.constant 0 : i32
    %c251_i32_249 = arith.constant 251 : i32
    %c3_i32_250 = arith.constant 3 : i32
    %c3_i32_251 = arith.constant 3 : i32
    %c0_i32_252 = arith.constant 0 : i32
    %309 = tpu.memref_slice %arg5[%c0_i32_248, %c0_i32_252] : memref<32x128xf32, #tpu.memory_space<any>> -> memref<1x128xf32, #tpu.memory_space<any>>
    %310 = tpu.memref_squeeze %309 : memref<1x128xf32, #tpu.memory_space<any>> -> memref<128xf32, #tpu.memory_space<any>>
    %c384_i32_253 = arith.constant 384 : i32
    %311 = tpu.memref_slice %arg6[%c251_i32_249, %c384_i32_253] : memref<256x512xf32, #tpu.memory_space<vmem>> -> memref<1x128xf32, #tpu.memory_space<vmem>>
    %312 = tpu.memref_squeeze %311 : memref<1x128xf32, #tpu.memory_space<vmem>> -> memref<128xf32, #tpu.memory_space<vmem>>
    %313 = tpu.memref_slice %arg7[%c3_i32_250, %c3_i32_251] : memref<8x4x!tpu.dma_semaphore, #tpu.memory_space<semaphore_mem>> -> memref<1x1x!tpu.dma_semaphore, #tpu.memory_space<semaphore_mem>>
    %314 = tpu.memref_squeeze %313 : memref<1x1x!tpu.dma_semaphore, #tpu.memory_space<semaphore_mem>> -> memref<!tpu.dma_semaphore, #tpu.memory_space<semaphore_mem>>
    tpu.wait_dma2 semaphore(%314 : memref<!tpu.dma_semaphore, #tpu.memory_space<semaphore_mem>>) src(%310 : memref<128xf32, #tpu.memory_space<any>>) dst(%312 : memref<128xf32, #tpu.memory_space<vmem>>)
    %c0_i32_254 = arith.constant 0 : i32
    %c252_i32 = arith.constant 252 : i32
    %c4_i32_255 = arith.constant 4 : i32
    %c0_i32_256 = arith.constant 0 : i32
    %c0_i32_257 = arith.constant 0 : i32
    %315 = tpu.memref_slice %arg2[%c0_i32_254, %c0_i32_257] : memref<32x128xf32, #tpu.memory_space<any>> -> memref<1x128xf32, #tpu.memory_space<any>>
    %316 = tpu.memref_squeeze %315 : memref<1x128xf32, #tpu.memory_space<any>> -> memref<128xf32, #tpu.memory_space<any>>
    %c0_i32_258 = arith.constant 0 : i32
    %317 = tpu.memref_slice %arg6[%c252_i32, %c0_i32_258] : memref<256x512xf32, #tpu.memory_space<vmem>> -> memref<1x128xf32, #tpu.memory_space<vmem>>
    %318 = tpu.memref_squeeze %317 : memref<1x128xf32, #tpu.memory_space<vmem>> -> memref<128xf32, #tpu.memory_space<vmem>>
    %319 = tpu.memref_slice %arg7[%c4_i32_255, %c0_i32_256] : memref<8x4x!tpu.dma_semaphore, #tpu.memory_space<semaphore_mem>> -> memref<1x1x!tpu.dma_semaphore, #tpu.memory_space<semaphore_mem>>
    %320 = tpu.memref_squeeze %319 : memref<1x1x!tpu.dma_semaphore, #tpu.memory_space<semaphore_mem>> -> memref<!tpu.dma_semaphore, #tpu.memory_space<semaphore_mem>>
    tpu.wait_dma2 semaphore(%320 : memref<!tpu.dma_semaphore, #tpu.memory_space<semaphore_mem>>) src(%316 : memref<128xf32, #tpu.memory_space<any>>) dst(%318 : memref<128xf32, #tpu.memory_space<vmem>>)
    %c0_i32_259 = arith.constant 0 : i32
    %c252_i32_260 = arith.constant 252 : i32
    %c4_i32_261 = arith.constant 4 : i32
    %c1_i32_262 = arith.constant 1 : i32
    %c0_i32_263 = arith.constant 0 : i32
    %321 = tpu.memref_slice %arg3[%c0_i32_259, %c0_i32_263] : memref<32x128xf32, #tpu.memory_space<any>> -> memref<1x128xf32, #tpu.memory_space<any>>
    %322 = tpu.memref_squeeze %321 : memref<1x128xf32, #tpu.memory_space<any>> -> memref<128xf32, #tpu.memory_space<any>>
    %c128_i32_264 = arith.constant 128 : i32
    %323 = tpu.memref_slice %arg6[%c252_i32_260, %c128_i32_264] : memref<256x512xf32, #tpu.memory_space<vmem>> -> memref<1x128xf32, #tpu.memory_space<vmem>>
    %324 = tpu.memref_squeeze %323 : memref<1x128xf32, #tpu.memory_space<vmem>> -> memref<128xf32, #tpu.memory_space<vmem>>
    %325 = tpu.memref_slice %arg7[%c4_i32_261, %c1_i32_262] : memref<8x4x!tpu.dma_semaphore, #tpu.memory_space<semaphore_mem>> -> memref<1x1x!tpu.dma_semaphore, #tpu.memory_space<semaphore_mem>>
    %326 = tpu.memref_squeeze %325 : memref<1x1x!tpu.dma_semaphore, #tpu.memory_space<semaphore_mem>> -> memref<!tpu.dma_semaphore, #tpu.memory_space<semaphore_mem>>
    tpu.wait_dma2 semaphore(%326 : memref<!tpu.dma_semaphore, #tpu.memory_space<semaphore_mem>>) src(%322 : memref<128xf32, #tpu.memory_space<any>>) dst(%324 : memref<128xf32, #tpu.memory_space<vmem>>)
    %c0_i32_265 = arith.constant 0 : i32
    %c252_i32_266 = arith.constant 252 : i32
    %c4_i32_267 = arith.constant 4 : i32
    %c2_i32_268 = arith.constant 2 : i32
    %c0_i32_269 = arith.constant 0 : i32
    %327 = tpu.memref_slice %arg4[%c0_i32_265, %c0_i32_269] : memref<32x128xf32, #tpu.memory_space<any>> -> memref<1x128xf32, #tpu.memory_space<any>>
    %328 = tpu.memref_squeeze %327 : memref<1x128xf32, #tpu.memory_space<any>> -> memref<128xf32, #tpu.memory_space<any>>
    %c256_i32_270 = arith.constant 256 : i32
    %329 = tpu.memref_slice %arg6[%c252_i32_266, %c256_i32_270] : memref<256x512xf32, #tpu.memory_space<vmem>> -> memref<1x128xf32, #tpu.memory_space<vmem>>
    %330 = tpu.memref_squeeze %329 : memref<1x128xf32, #tpu.memory_space<vmem>> -> memref<128xf32, #tpu.memory_space<vmem>>
    %331 = tpu.memref_slice %arg7[%c4_i32_267, %c2_i32_268] : memref<8x4x!tpu.dma_semaphore, #tpu.memory_space<semaphore_mem>> -> memref<1x1x!tpu.dma_semaphore, #tpu.memory_space<semaphore_mem>>
    %332 = tpu.memref_squeeze %331 : memref<1x1x!tpu.dma_semaphore, #tpu.memory_space<semaphore_mem>> -> memref<!tpu.dma_semaphore, #tpu.memory_space<semaphore_mem>>
    tpu.wait_dma2 semaphore(%332 : memref<!tpu.dma_semaphore, #tpu.memory_space<semaphore_mem>>) src(%328 : memref<128xf32, #tpu.memory_space<any>>) dst(%330 : memref<128xf32, #tpu.memory_space<vmem>>)
    %c0_i32_271 = arith.constant 0 : i32
    %c252_i32_272 = arith.constant 252 : i32
    %c4_i32_273 = arith.constant 4 : i32
    %c3_i32_274 = arith.constant 3 : i32
    %c0_i32_275 = arith.constant 0 : i32
    %333 = tpu.memref_slice %arg5[%c0_i32_271, %c0_i32_275] : memref<32x128xf32, #tpu.memory_space<any>> -> memref<1x128xf32, #tpu.memory_space<any>>
    %334 = tpu.memref_squeeze %333 : memref<1x128xf32, #tpu.memory_space<any>> -> memref<128xf32, #tpu.memory_space<any>>
    %c384_i32_276 = arith.constant 384 : i32
    %335 = tpu.memref_slice %arg6[%c252_i32_272, %c384_i32_276] : memref<256x512xf32, #tpu.memory_space<vmem>> -> memref<1x128xf32, #tpu.memory_space<vmem>>
    %336 = tpu.memref_squeeze %335 : memref<1x128xf32, #tpu.memory_space<vmem>> -> memref<128xf32, #tpu.memory_space<vmem>>
    %337 = tpu.memref_slice %arg7[%c4_i32_273, %c3_i32_274] : memref<8x4x!tpu.dma_semaphore, #tpu.memory_space<semaphore_mem>> -> memref<1x1x!tpu.dma_semaphore, #tpu.memory_space<semaphore_mem>>
    %338 = tpu.memref_squeeze %337 : memref<1x1x!tpu.dma_semaphore, #tpu.memory_space<semaphore_mem>> -> memref<!tpu.dma_semaphore, #tpu.memory_space<semaphore_mem>>
    tpu.wait_dma2 semaphore(%338 : memref<!tpu.dma_semaphore, #tpu.memory_space<semaphore_mem>>) src(%334 : memref<128xf32, #tpu.memory_space<any>>) dst(%336 : memref<128xf32, #tpu.memory_space<vmem>>)
    %c0_i32_277 = arith.constant 0 : i32
    %c253_i32 = arith.constant 253 : i32
    %c5_i32_278 = arith.constant 5 : i32
    %c0_i32_279 = arith.constant 0 : i32
    %c0_i32_280 = arith.constant 0 : i32
    %339 = tpu.memref_slice %arg2[%c0_i32_277, %c0_i32_280] : memref<32x128xf32, #tpu.memory_space<any>> -> memref<1x128xf32, #tpu.memory_space<any>>
    %340 = tpu.memref_squeeze %339 : memref<1x128xf32, #tpu.memory_space<any>> -> memref<128xf32, #tpu.memory_space<any>>
    %c0_i32_281 = arith.constant 0 : i32
    %341 = tpu.memref_slice %arg6[%c253_i32, %c0_i32_281] : memref<256x512xf32, #tpu.memory_space<vmem>> -> memref<1x128xf32, #tpu.memory_space<vmem>>
    %342 = tpu.memref_squeeze %341 : memref<1x128xf32, #tpu.memory_space<vmem>> -> memref<128xf32, #tpu.memory_space<vmem>>
    %343 = tpu.memref_slice %arg7[%c5_i32_278, %c0_i32_279] : memref<8x4x!tpu.dma_semaphore, #tpu.memory_space<semaphore_mem>> -> memref<1x1x!tpu.dma_semaphore, #tpu.memory_space<semaphore_mem>>
    %344 = tpu.memref_squeeze %343 : memref<1x1x!tpu.dma_semaphore, #tpu.memory_space<semaphore_mem>> -> memref<!tpu.dma_semaphore, #tpu.memory_space<semaphore_mem>>
    tpu.wait_dma2 semaphore(%344 : memref<!tpu.dma_semaphore, #tpu.memory_space<semaphore_mem>>) src(%340 : memref<128xf32, #tpu.memory_space<any>>) dst(%342 : memref<128xf32, #tpu.memory_space<vmem>>)
    %c0_i32_282 = arith.constant 0 : i32
    %c253_i32_283 = arith.constant 253 : i32
    %c5_i32_284 = arith.constant 5 : i32
    %c1_i32_285 = arith.constant 1 : i32
    %c0_i32_286 = arith.constant 0 : i32
    %345 = tpu.memref_slice %arg3[%c0_i32_282, %c0_i32_286] : memref<32x128xf32, #tpu.memory_space<any>> -> memref<1x128xf32, #tpu.memory_space<any>>
    %346 = tpu.memref_squeeze %345 : memref<1x128xf32, #tpu.memory_space<any>> -> memref<128xf32, #tpu.memory_space<any>>
    %c128_i32_287 = arith.constant 128 : i32
    %347 = tpu.memref_slice %arg6[%c253_i32_283, %c128_i32_287] : memref<256x512xf32, #tpu.memory_space<vmem>> -> memref<1x128xf32, #tpu.memory_space<vmem>>
    %348 = tpu.memref_squeeze %347 : memref<1x128xf32, #tpu.memory_space<vmem>> -> memref<128xf32, #tpu.memory_space<vmem>>
    %349 = tpu.memref_slice %arg7[%c5_i32_284, %c1_i32_285] : memref<8x4x!tpu.dma_semaphore, #tpu.memory_space<semaphore_mem>> -> memref<1x1x!tpu.dma_semaphore, #tpu.memory_space<semaphore_mem>>
    %350 = tpu.memref_squeeze %349 : memref<1x1x!tpu.dma_semaphore, #tpu.memory_space<semaphore_mem>> -> memref<!tpu.dma_semaphore, #tpu.memory_space<semaphore_mem>>
    tpu.wait_dma2 semaphore(%350 : memref<!tpu.dma_semaphore, #tpu.memory_space<semaphore_mem>>) src(%346 : memref<128xf32, #tpu.memory_space<any>>) dst(%348 : memref<128xf32, #tpu.memory_space<vmem>>)
    %c0_i32_288 = arith.constant 0 : i32
    %c253_i32_289 = arith.constant 253 : i32
    %c5_i32_290 = arith.constant 5 : i32
    %c2_i32_291 = arith.constant 2 : i32
    %c0_i32_292 = arith.constant 0 : i32
    %351 = tpu.memref_slice %arg4[%c0_i32_288, %c0_i32_292] : memref<32x128xf32, #tpu.memory_space<any>> -> memref<1x128xf32, #tpu.memory_space<any>>
    %352 = tpu.memref_squeeze %351 : memref<1x128xf32, #tpu.memory_space<any>> -> memref<128xf32, #tpu.memory_space<any>>
    %c256_i32_293 = arith.constant 256 : i32
    %353 = tpu.memref_slice %arg6[%c253_i32_289, %c256_i32_293] : memref<256x512xf32, #tpu.memory_space<vmem>> -> memref<1x128xf32, #tpu.memory_space<vmem>>
    %354 = tpu.memref_squeeze %353 : memref<1x128xf32, #tpu.memory_space<vmem>> -> memref<128xf32, #tpu.memory_space<vmem>>
    %355 = tpu.memref_slice %arg7[%c5_i32_290, %c2_i32_291] : memref<8x4x!tpu.dma_semaphore, #tpu.memory_space<semaphore_mem>> -> memref<1x1x!tpu.dma_semaphore, #tpu.memory_space<semaphore_mem>>
    %356 = tpu.memref_squeeze %355 : memref<1x1x!tpu.dma_semaphore, #tpu.memory_space<semaphore_mem>> -> memref<!tpu.dma_semaphore, #tpu.memory_space<semaphore_mem>>
    tpu.wait_dma2 semaphore(%356 : memref<!tpu.dma_semaphore, #tpu.memory_space<semaphore_mem>>) src(%352 : memref<128xf32, #tpu.memory_space<any>>) dst(%354 : memref<128xf32, #tpu.memory_space<vmem>>)
    %c0_i32_294 = arith.constant 0 : i32
    %c253_i32_295 = arith.constant 253 : i32
    %c5_i32_296 = arith.constant 5 : i32
    %c3_i32_297 = arith.constant 3 : i32
    %c0_i32_298 = arith.constant 0 : i32
    %357 = tpu.memref_slice %arg5[%c0_i32_294, %c0_i32_298] : memref<32x128xf32, #tpu.memory_space<any>> -> memref<1x128xf32, #tpu.memory_space<any>>
    %358 = tpu.memref_squeeze %357 : memref<1x128xf32, #tpu.memory_space<any>> -> memref<128xf32, #tpu.memory_space<any>>
    %c384_i32_299 = arith.constant 384 : i32
    %359 = tpu.memref_slice %arg6[%c253_i32_295, %c384_i32_299] : memref<256x512xf32, #tpu.memory_space<vmem>> -> memref<1x128xf32, #tpu.memory_space<vmem>>
    %360 = tpu.memref_squeeze %359 : memref<1x128xf32, #tpu.memory_space<vmem>> -> memref<128xf32, #tpu.memory_space<vmem>>
    %361 = tpu.memref_slice %arg7[%c5_i32_296, %c3_i32_297] : memref<8x4x!tpu.dma_semaphore, #tpu.memory_space<semaphore_mem>> -> memref<1x1x!tpu.dma_semaphore, #tpu.memory_space<semaphore_mem>>
    %362 = tpu.memref_squeeze %361 : memref<1x1x!tpu.dma_semaphore, #tpu.memory_space<semaphore_mem>> -> memref<!tpu.dma_semaphore, #tpu.memory_space<semaphore_mem>>
    tpu.wait_dma2 semaphore(%362 : memref<!tpu.dma_semaphore, #tpu.memory_space<semaphore_mem>>) src(%358 : memref<128xf32, #tpu.memory_space<any>>) dst(%360 : memref<128xf32, #tpu.memory_space<vmem>>)
    %c0_i32_300 = arith.constant 0 : i32
    %c254_i32 = arith.constant 254 : i32
    %c6_i32_301 = arith.constant 6 : i32
    %c0_i32_302 = arith.constant 0 : i32
    %c0_i32_303 = arith.constant 0 : i32
    %363 = tpu.memref_slice %arg2[%c0_i32_300, %c0_i32_303] : memref<32x128xf32, #tpu.memory_space<any>> -> memref<1x128xf32, #tpu.memory_space<any>>
    %364 = tpu.memref_squeeze %363 : memref<1x128xf32, #tpu.memory_space<any>> -> memref<128xf32, #tpu.memory_space<any>>
    %c0_i32_304 = arith.constant 0 : i32
    %365 = tpu.memref_slice %arg6[%c254_i32, %c0_i32_304] : memref<256x512xf32, #tpu.memory_space<vmem>> -> memref<1x128xf32, #tpu.memory_space<vmem>>
    %366 = tpu.memref_squeeze %365 : memref<1x128xf32, #tpu.memory_space<vmem>> -> memref<128xf32, #tpu.memory_space<vmem>>
    %367 = tpu.memref_slice %arg7[%c6_i32_301, %c0_i32_302] : memref<8x4x!tpu.dma_semaphore, #tpu.memory_space<semaphore_mem>> -> memref<1x1x!tpu.dma_semaphore, #tpu.memory_space<semaphore_mem>>
    %368 = tpu.memref_squeeze %367 : memref<1x1x!tpu.dma_semaphore, #tpu.memory_space<semaphore_mem>> -> memref<!tpu.dma_semaphore, #tpu.memory_space<semaphore_mem>>
    tpu.wait_dma2 semaphore(%368 : memref<!tpu.dma_semaphore, #tpu.memory_space<semaphore_mem>>) src(%364 : memref<128xf32, #tpu.memory_space<any>>) dst(%366 : memref<128xf32, #tpu.memory_space<vmem>>)
    %c0_i32_305 = arith.constant 0 : i32
    %c254_i32_306 = arith.constant 254 : i32
    %c6_i32_307 = arith.constant 6 : i32
    %c1_i32_308 = arith.constant 1 : i32
    %c0_i32_309 = arith.constant 0 : i32
    %369 = tpu.memref_slice %arg3[%c0_i32_305, %c0_i32_309] : memref<32x128xf32, #tpu.memory_space<any>> -> memref<1x128xf32, #tpu.memory_space<any>>
    %370 = tpu.memref_squeeze %369 : memref<1x128xf32, #tpu.memory_space<any>> -> memref<128xf32, #tpu.memory_space<any>>
    %c128_i32_310 = arith.constant 128 : i32
    %371 = tpu.memref_slice %arg6[%c254_i32_306, %c128_i32_310] : memref<256x512xf32, #tpu.memory_space<vmem>> -> memref<1x128xf32, #tpu.memory_space<vmem>>
    %372 = tpu.memref_squeeze %371 : memref<1x128xf32, #tpu.memory_space<vmem>> -> memref<128xf32, #tpu.memory_space<vmem>>
    %373 = tpu.memref_slice %arg7[%c6_i32_307, %c1_i32_308] : memref<8x4x!tpu.dma_semaphore, #tpu.memory_space<semaphore_mem>> -> memref<1x1x!tpu.dma_semaphore, #tpu.memory_space<semaphore_mem>>
    %374 = tpu.memref_squeeze %373 : memref<1x1x!tpu.dma_semaphore, #tpu.memory_space<semaphore_mem>> -> memref<!tpu.dma_semaphore, #tpu.memory_space<semaphore_mem>>
    tpu.wait_dma2 semaphore(%374 : memref<!tpu.dma_semaphore, #tpu.memory_space<semaphore_mem>>) src(%370 : memref<128xf32, #tpu.memory_space<any>>) dst(%372 : memref<128xf32, #tpu.memory_space<vmem>>)
    %c0_i32_311 = arith.constant 0 : i32
    %c254_i32_312 = arith.constant 254 : i32
    %c6_i32_313 = arith.constant 6 : i32
    %c2_i32_314 = arith.constant 2 : i32
    %c0_i32_315 = arith.constant 0 : i32
    %375 = tpu.memref_slice %arg4[%c0_i32_311, %c0_i32_315] : memref<32x128xf32, #tpu.memory_space<any>> -> memref<1x128xf32, #tpu.memory_space<any>>
    %376 = tpu.memref_squeeze %375 : memref<1x128xf32, #tpu.memory_space<any>> -> memref<128xf32, #tpu.memory_space<any>>
    %c256_i32_316 = arith.constant 256 : i32
    %377 = tpu.memref_slice %arg6[%c254_i32_312, %c256_i32_316] : memref<256x512xf32, #tpu.memory_space<vmem>> -> memref<1x128xf32, #tpu.memory_space<vmem>>
    %378 = tpu.memref_squeeze %377 : memref<1x128xf32, #tpu.memory_space<vmem>> -> memref<128xf32, #tpu.memory_space<vmem>>
    %379 = tpu.memref_slice %arg7[%c6_i32_313, %c2_i32_314] : memref<8x4x!tpu.dma_semaphore, #tpu.memory_space<semaphore_mem>> -> memref<1x1x!tpu.dma_semaphore, #tpu.memory_space<semaphore_mem>>
    %380 = tpu.memref_squeeze %379 : memref<1x1x!tpu.dma_semaphore, #tpu.memory_space<semaphore_mem>> -> memref<!tpu.dma_semaphore, #tpu.memory_space<semaphore_mem>>
    tpu.wait_dma2 semaphore(%380 : memref<!tpu.dma_semaphore, #tpu.memory_space<semaphore_mem>>) src(%376 : memref<128xf32, #tpu.memory_space<any>>) dst(%378 : memref<128xf32, #tpu.memory_space<vmem>>)
    %c0_i32_317 = arith.constant 0 : i32
    %c254_i32_318 = arith.constant 254 : i32
    %c6_i32_319 = arith.constant 6 : i32
    %c3_i32_320 = arith.constant 3 : i32
    %c0_i32_321 = arith.constant 0 : i32
    %381 = tpu.memref_slice %arg5[%c0_i32_317, %c0_i32_321] : memref<32x128xf32, #tpu.memory_space<any>> -> memref<1x128xf32, #tpu.memory_space<any>>
    %382 = tpu.memref_squeeze %381 : memref<1x128xf32, #tpu.memory_space<any>> -> memref<128xf32, #tpu.memory_space<any>>
    %c384_i32_322 = arith.constant 384 : i32
    %383 = tpu.memref_slice %arg6[%c254_i32_318, %c384_i32_322] : memref<256x512xf32, #tpu.memory_space<vmem>> -> memref<1x128xf32, #tpu.memory_space<vmem>>
    %384 = tpu.memref_squeeze %383 : memref<1x128xf32, #tpu.memory_space<vmem>> -> memref<128xf32, #tpu.memory_space<vmem>>
    %385 = tpu.memref_slice %arg7[%c6_i32_319, %c3_i32_320] : memref<8x4x!tpu.dma_semaphore, #tpu.memory_space<semaphore_mem>> -> memref<1x1x!tpu.dma_semaphore, #tpu.memory_space<semaphore_mem>>
    %386 = tpu.memref_squeeze %385 : memref<1x1x!tpu.dma_semaphore, #tpu.memory_space<semaphore_mem>> -> memref<!tpu.dma_semaphore, #tpu.memory_space<semaphore_mem>>
    tpu.wait_dma2 semaphore(%386 : memref<!tpu.dma_semaphore, #tpu.memory_space<semaphore_mem>>) src(%382 : memref<128xf32, #tpu.memory_space<any>>) dst(%384 : memref<128xf32, #tpu.memory_space<vmem>>)
    %c0_i32_323 = arith.constant 0 : i32
    %c255_i32 = arith.constant 255 : i32
    %c7_i32_324 = arith.constant 7 : i32
    %c0_i32_325 = arith.constant 0 : i32
    %c0_i32_326 = arith.constant 0 : i32
    %387 = tpu.memref_slice %arg2[%c0_i32_323, %c0_i32_326] : memref<32x128xf32, #tpu.memory_space<any>> -> memref<1x128xf32, #tpu.memory_space<any>>
    %388 = tpu.memref_squeeze %387 : memref<1x128xf32, #tpu.memory_space<any>> -> memref<128xf32, #tpu.memory_space<any>>
    %c0_i32_327 = arith.constant 0 : i32
    %389 = tpu.memref_slice %arg6[%c255_i32, %c0_i32_327] : memref<256x512xf32, #tpu.memory_space<vmem>> -> memref<1x128xf32, #tpu.memory_space<vmem>>
    %390 = tpu.memref_squeeze %389 : memref<1x128xf32, #tpu.memory_space<vmem>> -> memref<128xf32, #tpu.memory_space<vmem>>
    %391 = tpu.memref_slice %arg7[%c7_i32_324, %c0_i32_325] : memref<8x4x!tpu.dma_semaphore, #tpu.memory_space<semaphore_mem>> -> memref<1x1x!tpu.dma_semaphore, #tpu.memory_space<semaphore_mem>>
    %392 = tpu.memref_squeeze %391 : memref<1x1x!tpu.dma_semaphore, #tpu.memory_space<semaphore_mem>> -> memref<!tpu.dma_semaphore, #tpu.memory_space<semaphore_mem>>
    tpu.wait_dma2 semaphore(%392 : memref<!tpu.dma_semaphore, #tpu.memory_space<semaphore_mem>>) src(%388 : memref<128xf32, #tpu.memory_space<any>>) dst(%390 : memref<128xf32, #tpu.memory_space<vmem>>)
    %c0_i32_328 = arith.constant 0 : i32
    %c255_i32_329 = arith.constant 255 : i32
    %c7_i32_330 = arith.constant 7 : i32
    %c1_i32_331 = arith.constant 1 : i32
    %c0_i32_332 = arith.constant 0 : i32
    %393 = tpu.memref_slice %arg3[%c0_i32_328, %c0_i32_332] : memref<32x128xf32, #tpu.memory_space<any>> -> memref<1x128xf32, #tpu.memory_space<any>>
    %394 = tpu.memref_squeeze %393 : memref<1x128xf32, #tpu.memory_space<any>> -> memref<128xf32, #tpu.memory_space<any>>
    %c128_i32_333 = arith.constant 128 : i32
    %395 = tpu.memref_slice %arg6[%c255_i32_329, %c128_i32_333] : memref<256x512xf32, #tpu.memory_space<vmem>> -> memref<1x128xf32, #tpu.memory_space<vmem>>
    %396 = tpu.memref_squeeze %395 : memref<1x128xf32, #tpu.memory_space<vmem>> -> memref<128xf32, #tpu.memory_space<vmem>>
    %397 = tpu.memref_slice %arg7[%c7_i32_330, %c1_i32_331] : memref<8x4x!tpu.dma_semaphore, #tpu.memory_space<semaphore_mem>> -> memref<1x1x!tpu.dma_semaphore, #tpu.memory_space<semaphore_mem>>
    %398 = tpu.memref_squeeze %397 : memref<1x1x!tpu.dma_semaphore, #tpu.memory_space<semaphore_mem>> -> memref<!tpu.dma_semaphore, #tpu.memory_space<semaphore_mem>>
    tpu.wait_dma2 semaphore(%398 : memref<!tpu.dma_semaphore, #tpu.memory_space<semaphore_mem>>) src(%394 : memref<128xf32, #tpu.memory_space<any>>) dst(%396 : memref<128xf32, #tpu.memory_space<vmem>>)
    %c0_i32_334 = arith.constant 0 : i32
    %c255_i32_335 = arith.constant 255 : i32
    %c7_i32_336 = arith.constant 7 : i32
    %c2_i32_337 = arith.constant 2 : i32
    %c0_i32_338 = arith.constant 0 : i32
    %399 = tpu.memref_slice %arg4[%c0_i32_334, %c0_i32_338] : memref<32x128xf32, #tpu.memory_space<any>> -> memref<1x128xf32, #tpu.memory_space<any>>
    %400 = tpu.memref_squeeze %399 : memref<1x128xf32, #tpu.memory_space<any>> -> memref<128xf32, #tpu.memory_space<any>>
    %c256_i32_339 = arith.constant 256 : i32
    %401 = tpu.memref_slice %arg6[%c255_i32_335, %c256_i32_339] : memref<256x512xf32, #tpu.memory_space<vmem>> -> memref<1x128xf32, #tpu.memory_space<vmem>>
    %402 = tpu.memref_squeeze %401 : memref<1x128xf32, #tpu.memory_space<vmem>> -> memref<128xf32, #tpu.memory_space<vmem>>
    %403 = tpu.memref_slice %arg7[%c7_i32_336, %c2_i32_337] : memref<8x4x!tpu.dma_semaphore, #tpu.memory_space<semaphore_mem>> -> memref<1x1x!tpu.dma_semaphore, #tpu.memory_space<semaphore_mem>>
    %404 = tpu.memref_squeeze %403 : memref<1x1x!tpu.dma_semaphore, #tpu.memory_space<semaphore_mem>> -> memref<!tpu.dma_semaphore, #tpu.memory_space<semaphore_mem>>
    tpu.wait_dma2 semaphore(%404 : memref<!tpu.dma_semaphore, #tpu.memory_space<semaphore_mem>>) src(%400 : memref<128xf32, #tpu.memory_space<any>>) dst(%402 : memref<128xf32, #tpu.memory_space<vmem>>)
    %c0_i32_340 = arith.constant 0 : i32
    %c255_i32_341 = arith.constant 255 : i32
    %c7_i32_342 = arith.constant 7 : i32
    %c3_i32_343 = arith.constant 3 : i32
    %c0_i32_344 = arith.constant 0 : i32
    %405 = tpu.memref_slice %arg5[%c0_i32_340, %c0_i32_344] : memref<32x128xf32, #tpu.memory_space<any>> -> memref<1x128xf32, #tpu.memory_space<any>>
    %406 = tpu.memref_squeeze %405 : memref<1x128xf32, #tpu.memory_space<any>> -> memref<128xf32, #tpu.memory_space<any>>
    %c384_i32_345 = arith.constant 384 : i32
    %407 = tpu.memref_slice %arg6[%c255_i32_341, %c384_i32_345] : memref<256x512xf32, #tpu.memory_space<vmem>> -> memref<1x128xf32, #tpu.memory_space<vmem>>
    %408 = tpu.memref_squeeze %407 : memref<1x128xf32, #tpu.memory_space<vmem>> -> memref<128xf32, #tpu.memory_space<vmem>>
    %409 = tpu.memref_slice %arg7[%c7_i32_342, %c3_i32_343] : memref<8x4x!tpu.dma_semaphore, #tpu.memory_space<semaphore_mem>> -> memref<1x1x!tpu.dma_semaphore, #tpu.memory_space<semaphore_mem>>
    %410 = tpu.memref_squeeze %409 : memref<1x1x!tpu.dma_semaphore, #tpu.memory_space<semaphore_mem>> -> memref<!tpu.dma_semaphore, #tpu.memory_space<semaphore_mem>>
    tpu.wait_dma2 semaphore(%410 : memref<!tpu.dma_semaphore, #tpu.memory_space<semaphore_mem>>) src(%406 : memref<128xf32, #tpu.memory_space<any>>) dst(%408 : memref<128xf32, #tpu.memory_space<vmem>>)
    return
  }
  func.func @transform_4(%arg0: i32, %arg1: memref<256xi32, #tpu.memory_space<smem>>) -> (i32, i32) {
    %c0_i32 = arith.constant 0 : i32
    %c0_i32_0 = arith.constant 0 : i32
    return %arg0, %c0_i32 : i32, i32
  }
}

</mosaic_0001>

<bundles_post_ra>
// kernel: tpu_custom_call.1
= control target key start
LH: loop header
LB: loop body
LE: loop exit
PB: predicated region body
PF: predicated region fallthrough
CT: control target
= control target key end

     0   :  { %s2136_s21 = smov [#allocation4]   ;;  %s2638_s0 = inlined_call_operand.hbm [shape: s32[256], index: 0, kind: input, shape index: {}]   ;;  %s2639_s1 = inlined_call_operand.hbm [shape: f32[32,128], index: 1, kind: input, shape index: {}]   ;;  %s2640_s2 = inlined_call_operand.hbm [shape: f32[32,128], index: 2, kind: input, shape index: {}]   ;;  %s2641_s3 = inlined_call_operand.hbm [shape: f32[32,128], index: 3, kind: input, shape index: {}]   ;;  %s2642_s4 = inlined_call_operand.hbm [shape: f32[32,128], index: 4, kind: input, shape index: {}]   ;;  %s2643_s5 = inlined_call_operand.hbm [shape: f32[256,512], index: 5, kind: output, shape index: {}]  }
   0x1   :  { %s11_s20 = sshll.u32 %s2638_s0, 4  ;;  %s12_s20 = int_to_ptr.hbm [resolvable:$true] %s11_s20 }
   0x2   :  { %14 = dma.hbm_to_smem %s12_s20, 32, %s2136_s21, [#allocation3] }
   0x3   :  { %2056 = dma.done.wait [#allocation3], 32 }
   0x4   :  { %2057 = vsyncadd [#allocation3], 4294967264 }
   0x5   :  { %17 = sfence }
   0x6   :  { %18 = vsyncpa [#allocation6], 0  ;;  %s2205_s22 = sld [smem:[#allocation4]]  ;;  %s2137_s23 = smov [#allocation5]  }
   0x7   :  { %s2207_s24 = sshll.u32 %s2137_s23, 4  ;;  %s2138_s25 = smov [#allocation5 + $0x8]   ;;  %s32_s24 = int_to_ptr.vmem [resolvable:$true] %s2207_s24 }
   0x8   :  { %s2210_s26 = sshll.u32 %s2138_s25, 4  ;;  %s2139_s0 = smov [#allocation5 + $0x10]   ;;  %s48_s26 = int_to_ptr.vmem [resolvable:$true] %s2210_s26 }
   0x9   :  { %s2213_s27 = sshll.u32 %s2139_s0, 4  ;;  %s2140_s28 = smov [#allocation5 + $0x18]   ;;  %s64_s27 = int_to_ptr.vmem [resolvable:$true] %s2213_s27 }
   0xa   :  { %s2216_s29 = sshll.u32 %s2140_s28, 4  ;;  %s2229_s17 = scalar_lea.hbm %s2639_s1, 32  ;;  %s80_s29 = int_to_ptr.vmem [resolvable:$true] %s2216_s29 }
   0xc   :  { %s21_s7 = scalar_lea.hbm %s2639_s1, %s2205_s22  ;;  %s35_s10 = scalar_lea.hbm %s2640_s2, %s2205_s22 }
   0xd   :  { %s29_s11 = sshll.u32 %s21_s7, 4  ;;  %s45_s12 = sshll.u32 %s35_s10, 4  ;;  %s30_s11 = int_to_ptr.hbm [resolvable:$true] %s29_s11  ;;  %s46_s12 = int_to_ptr.hbm [resolvable:$true] %s45_s12 }
   0xe   :  { %s1164_s13 = sshra.s32 %s30_s11, 4  ;;  %s1165_s13 = int_to_ptr.hbm [resolvable:$true] %s1164_s13 }
   0xf   :  { %s1166_s14 = scalar_lea.hbm %s1165_s13, 1  ;;  %p1169_p1 = scmp.lt.s32.totalorder %s1165_s13, %s2639_s1 }
  0x10   :  { %p1167_p0 = scmp.ne.s32.totalorder %s1165_s13, %s1166_s14  ;;  %p1170_p2 = scmp.lt.s32.totalorder %s2229_s17, %s1166_s14 }
  0x12   :  { %p1171_p3 = por %p1170_p2, %p1169_p1 }
  0x14   :  { %p1172_p4 = pnand %p1171_p3, %p1167_p0 }
  0x16   :  { %1175 = shalt.err (!%p1172_p4)  }
  0x17   :  { %34 = dma.hbm_to_vmem [thread:$0]  %s30_s11, 16, %s32_s24, [#allocation2] }
  0x18   :  { %s1188_s20 = sshra.s32 %s46_s12, 4  ;;  %s2240_s0 = scalar_lea.hbm %s2640_s2, 32  ;;  %s1189_s20 = int_to_ptr.hbm [resolvable:$true] %s1188_s20 }
  0x19   :  { %s1190_s21 = scalar_lea.hbm %s1189_s20, 1  ;;  %p1193_p6 = scmp.lt.s32.totalorder %s1189_s20, %s2640_s2 }
  0x1a   :  { %p1191_p5 = scmp.ne.s32.totalorder %s1189_s20, %s1190_s21  ;;  %p1194_p7 = scmp.lt.s32.totalorder %s2240_s0, %s1190_s21 }
  0x1c   :  { %p1195_p8 = por %p1194_p7, %p1193_p6 }
  0x1e   :  { %p1196_p9 = pnand %p1195_p8, %p1191_p5 }
  0x20   :  { %1199 = shalt.err (!%p1196_p9)  }
  0x21   :  { %50 = dma.hbm_to_vmem [thread:$0]  %s46_s12, 16, %s48_s26, [#allocation2 + $0x1] }
  0x22   :  { %s51_s8 = scalar_lea.hbm %s2641_s3, %s2205_s22  ;;  %s67_s11 = scalar_lea.hbm %s2642_s4, %s2205_s22 }
  0x23   :  { %s61_s13 = sshll.u32 %s51_s8, 4  ;;  %s77_s14 = sshll.u32 %s67_s11, 4  ;;  %s62_s13 = int_to_ptr.hbm [resolvable:$true] %s61_s13  ;;  %s78_s14 = int_to_ptr.hbm [resolvable:$true] %s77_s14 }
  0x24   :  { %s1212_s15 = sshra.s32 %s62_s13, 4  ;;  %s2259_s26 = scalar_lea.hbm %s2641_s3, 32  ;;  %s1213_s15 = int_to_ptr.hbm [resolvable:$true] %s1212_s15 }
  0x25   :  { %s1214_s16 = scalar_lea.hbm %s1213_s15, 1  ;;  %p1217_p11 = scmp.lt.s32.totalorder %s1213_s15, %s2641_s3 }
  0x26   :  { %p1215_p10 = scmp.ne.s32.totalorder %s1213_s15, %s1214_s16  ;;  %p1218_p12 = scmp.lt.s32.totalorder %s2259_s26, %s1214_s16 }
  0x28   :  { %p1219_p13 = por %p1218_p12, %p1217_p11 }
  0x2a   :  { %p1220_p0 = pnand %p1219_p13, %p1215_p10 }
  0x2c   :  { %1223 = shalt.err (!%p1220_p0)  }
  0x2d   :  { %66 = dma.hbm_to_vmem [thread:$0]  %s62_s13, 16, %s64_s27, [#allocation2 + $0x2] }
  0x2e   :  { %s2268_s22 = sld [smem:[#allocation4 + $0x1]]  ;;  %s1236_s21 = sshra.s32 %s78_s14, 4  ;;  %s1237_s21 = int_to_ptr.hbm [resolvable:$true] %s1236_s21 }
  0x2f   :  { %s1238_s23 = scalar_lea.hbm %s1237_s21, 1  ;;  %s2273_s30 = scalar_lea.hbm %s2642_s4, 32 }
  0x30   :  { %p1239_p1 = scmp.ne.s32.totalorder %s1237_s21, %s1238_s23  ;;  %p1241_p2 = scmp.lt.s32.totalorder %s1237_s21, %s2642_s4 }
  0x31   :  { %p1242_p3 = scmp.lt.s32.totalorder %s2273_s30, %s1238_s23 }
  0x33   :  { %p1243_p4 = por %p1242_p3, %p1241_p2 }
  0x35   :  { %p1244_p5 = pnand %p1243_p4, %p1239_p1 }
  0x37   :  { %1247 = shalt.err (!%p1244_p5)  }
  0x38   :  { %82 = dma.hbm_to_vmem [thread:$0]  %s78_s14, 16, %s80_s29, [#allocation2 + $0x3] }
  0x39   :  { %s2141_s27 = smov [#allocation5 + $0x1]   ;;  %s2142_s9 = smov [#allocation5 + $0x9]  }
  0x3a   :  { %s97_s8 = sshll.u32 %s2141_s27, 4  ;;  %s2279_s10 = sshll.u32 %s2142_s9, 4  ;;  %s98_s8 = int_to_ptr.vmem [resolvable:$true] %s97_s8  ;;  %s114_s10 = int_to_ptr.vmem [resolvable:$true] %s2279_s10 }
  0x3b   :  { %s85_s15 = scalar_lea.hbm %s2639_s1, %s2268_s22  ;;  %s101_s19 = scalar_lea.hbm %s2640_s2, %s2268_s22 }
  0x3c   :  { %s95_s29 = sshll.u32 %s85_s15, 4  ;;  %s111_s14 = sshll.u32 %s101_s19, 4  ;;  %s96_s29 = int_to_ptr.hbm [resolvable:$true] %s95_s29  ;;  %s112_s14 = int_to_ptr.hbm [resolvable:$true] %s111_s14 }
  0x3d   :  { %s1260_s12 = sshra.s32 %s96_s29, 4  ;;  %s1261_s12 = int_to_ptr.hbm [resolvable:$true] %s1260_s12 }
  0x3e   :  { %s1262_s20 = scalar_lea.hbm %s1261_s12, 1  ;;  %p1265_p7 = scmp.lt.s32.totalorder %s1261_s12, %s2639_s1 }
  0x3f   :  { %p1263_p6 = scmp.ne.s32.totalorder %s1261_s12, %s1262_s20  ;;  %p1266_p8 = scmp.lt.s32.totalorder %s2229_s17, %s1262_s20 }
  0x41   :  { %p1267_p9 = por %p1266_p8, %p1265_p7 }
  0x43   :  { %p1268_p10 = pnand %p1267_p9, %p1263_p6 }
  0x45   :  { %1271 = shalt.err (!%p1268_p10)  }
  0x46   :  { %100 = dma.hbm_to_vmem [thread:$0]  %s96_s29, 16, %s98_s8, [#allocation2 + $0x4] }
  0x47   :  { %s1284_s25 = sshra.s32 %s112_s14, 4  ;;  %s1285_s25 = int_to_ptr.hbm [resolvable:$true] %s1284_s25 }
  0x48   :  { %s1286_s28 = scalar_lea.hbm %s1285_s25, 1  ;;  %p1289_p12 = scmp.lt.s32.totalorder %s1285_s25, %s2640_s2 }
  0x49   :  { %p1287_p11 = scmp.ne.s32.totalorder %s1285_s25, %s1286_s28  ;;  %p1290_p13 = scmp.lt.s32.totalorder %s2240_s0, %s1286_s28 }
  0x4b   :  { %p1291_p0 = por %p1290_p13, %p1289_p12 }
  0x4d   :  { %p1292_p1 = pnand %p1291_p0, %p1287_p11 }
  0x4f   :  { %1295 = shalt.err (!%p1292_p1)  }
  0x50   :  { %116 = dma.hbm_to_vmem [thread:$0]  %s112_s14, 16, %s114_s10, [#allocation2 + $0x5] }
  0x51   :  { %s117_s8 = scalar_lea.hbm %s2641_s3, %s2268_s22  ;;  %s2143_s11 = smov [#allocation5 + $0x11]  }
  0x52   :  { %s129_s13 = sshll.u32 %s2143_s11, 4  ;;  %s127_s15 = sshll.u32 %s117_s8, 4  ;;  %s130_s13 = int_to_ptr.vmem [resolvable:$true] %s129_s13  ;;  %s128_s15 = int_to_ptr.hbm [resolvable:$true] %s127_s15 }
  0x53   :  { %s133_s19 = scalar_lea.hbm %s2642_s4, %s2268_s22  ;;  %s1308_s29 = sshra.s32 %s128_s15, 4  ;;  %s1309_s29 = int_to_ptr.hbm [resolvable:$true] %s1308_s29 }
  0x54   :  { %s1310_s12 = scalar_lea.hbm %s1309_s29, 1  ;;  %p1313_p3 = scmp.lt.s32.totalorder %s1309_s29, %s2641_s3 }
  0x55   :  { %p1311_p2 = scmp.ne.s32.totalorder %s1309_s29, %s1310_s12  ;;  %p1314_p4 = scmp.lt.s32.totalorder %s2259_s26, %s1310_s12 }
  0x57   :  { %p1315_p5 = por %p1314_p4, %p1313_p3 }
  0x59   :  { %p1316_p6 = pnand %p1315_p5, %p1311_p2 }
  0x5b   :  { %1319 = shalt.err (!%p1316_p6)  }
  0x5c   :  { %132 = dma.hbm_to_vmem [thread:$0]  %s128_s15, 16, %s130_s13, [#allocation2 + $0x6] }
  0x5d   :  { %s143_s20 = sshll.u32 %s133_s19, 4  ;;  %s2144_s21 = smov [#allocation5 + $0x19]   ;;  %s144_s20 = int_to_ptr.hbm [resolvable:$true] %s143_s20 }
  0x5e   :  { %s145_s23 = sshll.u32 %s2144_s21, 4  ;;  %s1332_s22 = sshra.s32 %s144_s20, 4  ;;  %s146_s23 = int_to_ptr.vmem [resolvable:$true] %s145_s23  ;;  %s1333_s22 = int_to_ptr.hbm [resolvable:$true] %s1332_s22 }
  0x5f   :  { %s1334_s25 = scalar_lea.hbm %s1333_s22, 1  ;;  %p1337_p8 = scmp.lt.s32.totalorder %s1333_s22, %s2642_s4 }
  0x60   :  { %p1335_p7 = scmp.ne.s32.totalorder %s1333_s22, %s1334_s25  ;;  %p1338_p9 = scmp.lt.s32.totalorder %s2273_s30, %s1334_s25 }
  0x62   :  { %p1339_p10 = por %p1338_p9, %p1337_p8 }
  0x64   :  { %p1340_p11 = pnand %p1339_p10, %p1335_p7 }
  0x66   :  { %1343 = shalt.err (!%p1340_p11)  }
  0x67   :  { %148 = dma.hbm_to_vmem [thread:$0]  %s144_s20, 16, %s146_s23, [#allocation2 + $0x7] }
  0x68   :  { %s2314_s7 = sld [smem:[#allocation4 + $0x2]]  ;;  %s2145_s27 = smov [#allocation5 + $0x2]  }
  0x69   :  { %s163_s9 = sshll.u32 %s2145_s27, 4  ;;  %s2146_s8 = smov [#allocation5 + $0xa]   ;;  %s164_s9 = int_to_ptr.vmem [resolvable:$true] %s163_s9 }
  0x6a   :  { %s2316_s11 = sshll.u32 %s2146_s8, 4  ;;  %s2147_s13 = smov [#allocation5 + $0x12]   ;;  %s180_s11 = int_to_ptr.vmem [resolvable:$true] %s2316_s11 }
  0x6b   :  { %s2319_s15 = sshll.u32 %s2147_s13, 4  ;;  %s2148_s16 = smov [#allocation5 + $0x1a]   ;;  %s196_s15 = int_to_ptr.vmem [resolvable:$true] %s2319_s15 }
  0x6c   :  { %s2322_s18 = sshll.u32 %s2148_s16, 4  ;;  %s212_s18 = int_to_ptr.vmem [resolvable:$true] %s2322_s18 }
  0x6e   :  { %s151_s12 = scalar_lea.hbm %s2639_s1, %s2314_s7  ;;  %s167_s20 = scalar_lea.hbm %s2640_s2, %s2314_s7 }
  0x6f   :  { %s161_s21 = sshll.u32 %s151_s12, 4  ;;  %s177_s23 = sshll.u32 %s167_s20, 4  ;;  %s162_s21 = int_to_ptr.hbm [resolvable:$true] %s161_s21  ;;  %s178_s23 = int_to_ptr.hbm [resolvable:$true] %s177_s23 }
  0x70   :  { %s1356_s22 = sshra.s32 %s162_s21, 4  ;;  %s1357_s22 = int_to_ptr.hbm [resolvable:$true] %s1356_s22 }
  0x71   :  { %s1358_s25 = scalar_lea.hbm %s1357_s22, 1  ;;  %p1361_p13 = scmp.lt.s32.totalorder %s1357_s22, %s2639_s1 }
  0x72   :  { %p1359_p12 = scmp.ne.s32.totalorder %s1357_s22, %s1358_s25  ;;  %p1362_p0 = scmp.lt.s32.totalorder %s2229_s17, %s1358_s25 }
  0x74   :  { %p1363_p1 = por %p1362_p0, %p1361_p13 }
  0x76   :  { %p1364_p2 = pnand %p1363_p1, %p1359_p12 }
  0x78   :  { %1367 = shalt.err (!%p1364_p2)  }
  0x79   :  { %166 = dma.hbm_to_vmem [thread:$0]  %s162_s21, 16, %s164_s9, [#allocation2 + $0x8] }
  0x7a   :  { %s1380_s27 = sshra.s32 %s178_s23, 4  ;;  %s1381_s27 = int_to_ptr.hbm [resolvable:$true] %s1380_s27 }
  0x7b   :  { %s1382_s8 = scalar_lea.hbm %s1381_s27, 1  ;;  %p1385_p4 = scmp.lt.s32.totalorder %s1381_s27, %s2640_s2 }
  0x7c   :  { %p1383_p3 = scmp.ne.s32.totalorder %s1381_s27, %s1382_s8  ;;  %p1386_p5 = scmp.lt.s32.totalorder %s2240_s0, %s1382_s8 }
  0x7e   :  { %p1387_p6 = por %p1386_p5, %p1385_p4 }
  0x80   :  { %p1388_p7 = pnand %p1387_p6, %p1383_p3 }
  0x82   :  { %1391 = shalt.err (!%p1388_p7)  }
  0x83   :  { %182 = dma.hbm_to_vmem [thread:$0]  %s178_s23, 16, %s180_s11, [#allocation2 + $0x9] }
  0x84   :  { %s183_s29 = scalar_lea.hbm %s2641_s3, %s2314_s7  ;;  %s199_s14 = scalar_lea.hbm %s2642_s4, %s2314_s7 }
  0x85   :  { %s193_s20 = sshll.u32 %s183_s29, 4  ;;  %s209_s21 = sshll.u32 %s199_s14, 4  ;;  %s194_s20 = int_to_ptr.hbm [resolvable:$true] %s193_s20  ;;  %s210_s21 = int_to_ptr.hbm [resolvable:$true] %s209_s21 }
  0x86   :  { %s1404_s22 = sshra.s32 %s194_s20, 4  ;;  %s1405_s22 = int_to_ptr.hbm [resolvable:$true] %s1404_s22 }
  0x87   :  { %s1406_s25 = scalar_lea.hbm %s1405_s22, 1  ;;  %p1409_p9 = scmp.lt.s32.totalorder %s1405_s22, %s2641_s3 }
  0x88   :  { %p1407_p8 = scmp.ne.s32.totalorder %s1405_s22, %s1406_s25  ;;  %p1410_p10 = scmp.lt.s32.totalorder %s2259_s26, %s1406_s25 }
  0x8a   :  { %p1411_p11 = por %p1410_p10, %p1409_p9 }
  0x8c   :  { %p1412_p12 = pnand %p1411_p11, %p1407_p8 }
  0x8e   :  { %1415 = shalt.err (!%p1412_p12)  }
  0x8f   :  { %198 = dma.hbm_to_vmem [thread:$0]  %s194_s20, 16, %s196_s15, [#allocation2 + $0xa] }
  0x90   :  { %s2357_s7 = sld [smem:[#allocation4 + $0x3]]  ;;  %s1428_s11 = sshra.s32 %s210_s21, 4  ;;  %s1429_s11 = int_to_ptr.hbm [resolvable:$true] %s1428_s11 }
  0x91   :  { %s1430_s23 = scalar_lea.hbm %s1429_s11, 1  ;;  %p1433_p0 = scmp.lt.s32.totalorder %s1429_s11, %s2642_s4 }
  0x92   :  { %p1431_p13 = scmp.ne.s32.totalorder %s1429_s11, %s1430_s23  ;;  %p1434_p1 = scmp.lt.s32.totalorder %s2273_s30, %s1430_s23 }
  0x94   :  { %p1435_p2 = por %p1434_p1, %p1433_p0 }
  0x96   :  { %p1436_p3 = pnand %p1435_p2, %p1431_p13 }
  0x98   :  { %1439 = shalt.err (!%p1436_p3)  }
  0x99   :  { %214 = dma.hbm_to_vmem [thread:$0]  %s210_s21, 16, %s212_s18, [#allocation2 + $0xb] }
  0x9a   :  { %s2149_s13 = smov [#allocation5 + $0x3]   ;;  %s2150_s16 = smov [#allocation5 + $0xb]  }
  0x9b   :  { %s229_s15 = sshll.u32 %s2149_s13, 4  ;;  %s2363_s9 = sshll.u32 %s2150_s16, 4  ;;  %s230_s15 = int_to_ptr.vmem [resolvable:$true] %s229_s15  ;;  %s246_s9 = int_to_ptr.vmem [resolvable:$true] %s2363_s9 }
  0x9c   :  { %s217_s12 = scalar_lea.hbm %s2639_s1, %s2357_s7  ;;  %s233_s20 = scalar_lea.hbm %s2640_s2, %s2357_s7 }
  0x9d   :  { %s227_s18 = sshll.u32 %s217_s12, 4  ;;  %s243_s21 = sshll.u32 %s233_s20, 4  ;;  %s228_s18 = int_to_ptr.hbm [resolvable:$true] %s227_s18  ;;  %s244_s21 = int_to_ptr.hbm [resolvable:$true] %s243_s21 }
  0x9e   :  { %s1452_s22 = sshra.s32 %s228_s18, 4  ;;  %s1453_s22 = int_to_ptr.hbm [resolvable:$true] %s1452_s22 }
  0x9f   :  { %s1454_s25 = scalar_lea.hbm %s1453_s22, 1  ;;  %p1457_p5 = scmp.lt.s32.totalorder %s1453_s22, %s2639_s1 }
  0xa0   :  { %p1455_p4 = scmp.ne.s32.totalorder %s1453_s22, %s1454_s25  ;;  %p1458_p6 = scmp.lt.s32.totalorder %s2229_s17, %s1454_s25 }
  0xa2   :  { %p1459_p7 = por %p1458_p6, %p1457_p5 }
  0xa4   :  { %p1460_p8 = pnand %p1459_p7, %p1455_p4 }
  0xa6   :  { %1463 = shalt.err (!%p1460_p8)  }
  0xa7   :  { %232 = dma.hbm_to_vmem [thread:$0]  %s228_s18, 16, %s230_s15, [#allocation2 + $0xc] }
  0xa8   :  { %s1476_s11 = sshra.s32 %s244_s21, 4  ;;  %s1477_s11 = int_to_ptr.hbm [resolvable:$true] %s1476_s11 }
  0xa9   :  { %s1478_s23 = scalar_lea.hbm %s1477_s11, 1  ;;  %p1481_p10 = scmp.lt.s32.totalorder %s1477_s11, %s2640_s2 }
  0xaa   :  { %p1479_p9 = scmp.ne.s32.totalorder %s1477_s11, %s1478_s23  ;;  %p1482_p11 = scmp.lt.s32.totalorder %s2240_s0, %s1478_s23 }
  0xac   :  { %p1483_p12 = por %p1482_p11, %p1481_p10 }
  0xae   :  { %p1484_p13 = pnand %p1483_p12, %p1479_p9 }
  0xb0   :  { %1487 = shalt.err (!%p1484_p13)  }
  0xb1   :  { %248 = dma.hbm_to_vmem [thread:$0]  %s244_s21, 16, %s246_s9, [#allocation2 + $0xd] }
  0xb2   :  { %s249_s15 = scalar_lea.hbm %s2641_s3, %s2357_s7  ;;  %s2151_s19 = smov [#allocation5 + $0x13]  }
  0xb3   :  { %s261_s29 = sshll.u32 %s2151_s19, 4  ;;  %s259_s12 = sshll.u32 %s249_s15, 4  ;;  %s262_s29 = int_to_ptr.vmem [resolvable:$true] %s261_s29  ;;  %s260_s12 = int_to_ptr.hbm [resolvable:$true] %s259_s12 }
  0xb4   :  { %s265_s20 = scalar_lea.hbm %s2642_s4, %s2357_s7  ;;  %s1500_s18 = sshra.s32 %s260_s12, 4  ;;  %s1501_s18 = int_to_ptr.hbm [resolvable:$true] %s1500_s18 }
  0xb5   :  { %s1502_s22 = scalar_lea.hbm %s1501_s18, 1  ;;  %p1505_p1 = scmp.lt.s32.totalorder %s1501_s18, %s2641_s3 }
  0xb6   :  { %p1503_p0 = scmp.ne.s32.totalorder %s1501_s18, %s1502_s22  ;;  %p1506_p2 = scmp.lt.s32.totalorder %s2259_s26, %s1502_s22 }
  0xb8   :  { %p1507_p3 = por %p1506_p2, %p1505_p1 }
  0xba   :  { %p1508_p4 = pnand %p1507_p3, %p1503_p0 }
  0xbc   :  { %1511 = shalt.err (!%p1508_p4)  }
  0xbd   :  { %264 = dma.hbm_to_vmem [thread:$0]  %s260_s12, 16, %s262_s29, [#allocation2 + $0xe] }
  0xbe   :  { %s275_s25 = sshll.u32 %s265_s20, 4  ;;  %s2152_s28 = smov [#allocation5 + $0x1b]   ;;  %s276_s25 = int_to_ptr.hbm [resolvable:$true] %s275_s25 }
  0xbf   :  { %s277_s6 = sshll.u32 %s2152_s28, 4  ;;  %s1524_s7 = sshra.s32 %s276_s25, 4  ;;  %s278_s6 = int_to_ptr.vmem [resolvable:$true] %s277_s6  ;;  %s1525_s7 = int_to_ptr.hbm [resolvable:$true] %s1524_s7 }
  0xc0   :  { %s1526_s11 = scalar_lea.hbm %s1525_s7, 1  ;;  %p1529_p6 = scmp.lt.s32.totalorder %s1525_s7, %s2642_s4 }
  0xc1   :  { %p1527_p5 = scmp.ne.s32.totalorder %s1525_s7, %s1526_s11  ;;  %p1530_p7 = scmp.lt.s32.totalorder %s2273_s30, %s1526_s11 }
  0xc3   :  { %p1531_p8 = por %p1530_p7, %p1529_p6 }
  0xc5   :  { %p1532_p9 = pnand %p1531_p8, %p1527_p5 }
  0xc7   :  { %1535 = shalt.err (!%p1532_p9)  }
  0xc8   :  { %280 = dma.hbm_to_vmem [thread:$0]  %s276_s25, 16, %s278_s6, [#allocation2 + $0xf] }
  0xc9   :  { %s2398_s8 = sld [smem:[#allocation4 + $0x4]]  ;;  %s2153_s13 = smov [#allocation5 + $0x4]  }
  0xca   :  { %s295_s16 = sshll.u32 %s2153_s13, 4  ;;  %s2154_s15 = smov [#allocation5 + $0xc]   ;;  %s296_s16 = int_to_ptr.vmem [resolvable:$true] %s295_s16 }
  0xcb   :  { %s2400_s19 = sshll.u32 %s2154_s15, 4  ;;  %s2155_s29 = smov [#allocation5 + $0x14]   ;;  %s312_s19 = int_to_ptr.vmem [resolvable:$true] %s2400_s19 }
  0xcc   :  { %s2403_s12 = sshll.u32 %s2155_s29, 4  ;;  %s2156_s10 = smov [#allocation5 + $0x1c]   ;;  %s328_s12 = int_to_ptr.vmem [resolvable:$true] %s2403_s12 }
  0xcd   :  { %s2406_s14 = sshll.u32 %s2156_s10, 4  ;;  %s344_s14 = int_to_ptr.vmem [resolvable:$true] %s2406_s14 }
  0xcf   :  { %s283_s22 = scalar_lea.hbm %s2639_s1, %s2398_s8  ;;  %s299_s25 = scalar_lea.hbm %s2640_s2, %s2398_s8 }
  0xd0   :  { %s293_s28 = sshll.u32 %s283_s22, 4  ;;  %s309_s6 = sshll.u32 %s299_s25, 4  ;;  %s294_s28 = int_to_ptr.hbm [resolvable:$true] %s293_s28  ;;  %s310_s6 = int_to_ptr.hbm [resolvable:$true] %s309_s6 }
  0xd1   :  { %s1548_s7 = sshra.s32 %s294_s28, 4  ;;  %s1549_s7 = int_to_ptr.hbm [resolvable:$true] %s1548_s7 }
  0xd2   :  { %s1550_s11 = scalar_lea.hbm %s1549_s7, 1  ;;  %p1553_p11 = scmp.lt.s32.totalorder %s1549_s7, %s2639_s1 }
  0xd3   :  { %p1551_p10 = scmp.ne.s32.totalorder %s1549_s7, %s1550_s11  ;;  %p1554_p12 = scmp.lt.s32.totalorder %s2229_s17, %s1550_s11 }
  0xd5   :  { %p1555_p13 = por %p1554_p12, %p1553_p11 }
  0xd7   :  { %p1556_p0 = pnand %p1555_p13, %p1551_p10 }
  0xd9   :  { %1559 = shalt.err (!%p1556_p0)  }
  0xda   :  { %298 = dma.hbm_to_vmem [thread:$0]  %s294_s28, 16, %s296_s16, [#allocation2 + $0x10] }
  0xdb   :  { %s1572_s13 = sshra.s32 %s310_s6, 4  ;;  %s1573_s13 = int_to_ptr.hbm [resolvable:$true] %s1572_s13 }
  0xdc   :  { %s1574_s15 = scalar_lea.hbm %s1573_s13, 1  ;;  %p1577_p2 = scmp.lt.s32.totalorder %s1573_s13, %s2640_s2 }
  0xdd   :  { %p1575_p1 = scmp.ne.s32.totalorder %s1573_s13, %s1574_s15  ;;  %p1578_p3 = scmp.lt.s32.totalorder %s2240_s0, %s1574_s15 }
  0xdf   :  { %p1579_p4 = por %p1578_p3, %p1577_p2 }
  0xe1   :  { %p1580_p5 = pnand %p1579_p4, %p1575_p1 }
  0xe3   :  { %1583 = shalt.err (!%p1580_p5)  }
  0xe4   :  { %314 = dma.hbm_to_vmem [thread:$0]  %s310_s6, 16, %s312_s19, [#allocation2 + $0x11] }
  0xe5   :  { %s315_s18 = scalar_lea.hbm %s2641_s3, %s2398_s8  ;;  %s331_s21 = scalar_lea.hbm %s2642_s4, %s2398_s8 }
  0xe6   :  { %s325_s25 = sshll.u32 %s315_s18, 4  ;;  %s341_s28 = sshll.u32 %s331_s21, 4  ;;  %s326_s25 = int_to_ptr.hbm [resolvable:$true] %s325_s25  ;;  %s342_s28 = int_to_ptr.hbm [resolvable:$true] %s341_s28 }
  0xe7   :  { %s1596_s7 = sshra.s32 %s326_s25, 4  ;;  %s1597_s7 = int_to_ptr.hbm [resolvable:$true] %s1596_s7 }
  0xe8   :  { %s1598_s11 = scalar_lea.hbm %s1597_s7, 1  ;;  %p1601_p7 = scmp.lt.s32.totalorder %s1597_s7, %s2641_s3 }
  0xe9   :  { %p1599_p6 = scmp.ne.s32.totalorder %s1597_s7, %s1598_s11  ;;  %p1602_p8 = scmp.lt.s32.totalorder %s2259_s26, %s1598_s11 }
  0xeb   :  { %p1603_p9 = por %p1602_p8, %p1601_p7 }
  0xed   :  { %p1604_p10 = pnand %p1603_p9, %p1599_p6 }
  0xef   :  { %1607 = shalt.err (!%p1604_p10)  }
  0xf0   :  { %330 = dma.hbm_to_vmem [thread:$0]  %s326_s25, 16, %s328_s12, [#allocation2 + $0x12] }
  0xf1   :  { %s2441_s8 = sld [smem:[#allocation4 + $0x5]]  ;;  %s1620_s19 = sshra.s32 %s342_s28, 4  ;;  %s1621_s19 = int_to_ptr.hbm [resolvable:$true] %s1620_s19 }
  0xf2   :  { %s1622_s6 = scalar_lea.hbm %s1621_s19, 1  ;;  %p1625_p12 = scmp.lt.s32.totalorder %s1621_s19, %s2642_s4 }
  0xf3   :  { %p1623_p11 = scmp.ne.s32.totalorder %s1621_s19, %s1622_s6  ;;  %p1626_p13 = scmp.lt.s32.totalorder %s2273_s30, %s1622_s6 }
  0xf5   :  { %p1627_p0 = por %p1626_p13, %p1625_p12 }
  0xf7   :  { %p1628_p1 = pnand %p1627_p0, %p1623_p11 }
  0xf9   :  { %1631 = shalt.err (!%p1628_p1)  }
  0xfa   :  { %346 = dma.hbm_to_vmem [thread:$0]  %s342_s28, 16, %s344_s14, [#allocation2 + $0x13] }
  0xfb   :  { %s2157_s29 = smov [#allocation5 + $0x5]   ;;  %s2158_s10 = smov [#allocation5 + $0xd]  }
  0xfc   :  { %s361_s12 = sshll.u32 %s2157_s29, 4  ;;  %s2447_s16 = sshll.u32 %s2158_s10, 4  ;;  %s362_s12 = int_to_ptr.vmem [resolvable:$true] %s361_s12  ;;  %s378_s16 = int_to_ptr.vmem [resolvable:$true] %s2447_s16 }
  0xfd   :  { %s349_s22 = scalar_lea.hbm %s2639_s1, %s2441_s8  ;;  %s365_s25 = scalar_lea.hbm %s2640_s2, %s2441_s8 }
  0xfe   :  { %s359_s14 = sshll.u32 %s349_s22, 4  ;;  %s375_s28 = sshll.u32 %s365_s25, 4  ;;  %s360_s14 = int_to_ptr.hbm [resolvable:$true] %s359_s14  ;;  %s376_s28 = int_to_ptr.hbm [resolvable:$true] %s375_s28 }
  0xff   :  { %s1644_s7 = sshra.s32 %s360_s14, 4  ;;  %s1645_s7 = int_to_ptr.hbm [resolvable:$true] %s1644_s7 }
 0x100   :  { %s1646_s11 = scalar_lea.hbm %s1645_s7, 1  ;;  %p1649_p3 = scmp.lt.s32.totalorder %s1645_s7, %s2639_s1 }
 0x101   :  { %p1647_p2 = scmp.ne.s32.totalorder %s1645_s7, %s1646_s11  ;;  %p1650_p4 = scmp.lt.s32.totalorder %s2229_s17, %s1646_s11 }
 0x103   :  { %p1651_p5 = por %p1650_p4, %p1649_p3 }
 0x105   :  { %p1652_p6 = pnand %p1651_p5, %p1647_p2 }
 0x107   :  { %1655 = shalt.err (!%p1652_p6)  }
 0x108   :  { %364 = dma.hbm_to_vmem [thread:$0]  %s360_s14, 16, %s362_s12, [#allocation2 + $0x14] }
 0x109   :  { %s1668_s19 = sshra.s32 %s376_s28, 4  ;;  %s1669_s19 = int_to_ptr.hbm [resolvable:$true] %s1668_s19 }
 0x10a   :  { %s1670_s6 = scalar_lea.hbm %s1669_s19, 1  ;;  %p1673_p8 = scmp.lt.s32.totalorder %s1669_s19, %s2640_s2 }
 0x10b   :  { %p1671_p7 = scmp.ne.s32.totalorder %s1669_s19, %s1670_s6  ;;  %p1674_p9 = scmp.lt.s32.totalorder %s2240_s0, %s1670_s6 }
 0x10d   :  { %p1675_p10 = por %p1674_p9, %p1673_p8 }
 0x10f   :  { %p1676_p11 = pnand %p1675_p10, %p1671_p7 }
 0x111   :  { %1679 = shalt.err (!%p1676_p11)  }
 0x112   :  { %380 = dma.hbm_to_vmem [thread:$0]  %s376_s28, 16, %s378_s16, [#allocation2 + $0x15] }
 0x113   :  { %s381_s12 = scalar_lea.hbm %s2641_s3, %s2441_s8  ;;  %s2159_s20 = smov [#allocation5 + $0x15]  }
 0x114   :  { %s393_s18 = sshll.u32 %s2159_s20, 4  ;;  %s391_s22 = sshll.u32 %s381_s12, 4  ;;  %s394_s18 = int_to_ptr.vmem [resolvable:$true] %s393_s18  ;;  %s392_s22 = int_to_ptr.hbm [resolvable:$true] %s391_s22 }
 0x115   :  { %s397_s25 = scalar_lea.hbm %s2642_s4, %s2441_s8  ;;  %s1692_s14 = sshra.s32 %s392_s22, 4  ;;  %s1693_s14 = int_to_ptr.hbm [resolvable:$true] %s1692_s14 }
 0x116   :  { %s1694_s7 = scalar_lea.hbm %s1693_s14, 1  ;;  %p1697_p13 = scmp.lt.s32.totalorder %s1693_s14, %s2641_s3 }
 0x117   :  { %p1695_p12 = scmp.ne.s32.totalorder %s1693_s14, %s1694_s7  ;;  %p1698_p0 = scmp.lt.s32.totalorder %s2259_s26, %s1694_s7 }
 0x119   :  { %p1699_p1 = por %p1698_p0, %p1697_p13 }
 0x11b   :  { %p1700_p2 = pnand %p1699_p1, %p1695_p12 }
 0x11d   :  { %1703 = shalt.err (!%p1700_p2)  }
 0x11e   :  { %396 = dma.hbm_to_vmem [thread:$0]  %s392_s22, 16, %s394_s18, [#allocation2 + $0x16] }
 0x11f   :  { %s407_s11 = sshll.u32 %s397_s25, 4  ;;  %s2160_s23 = smov [#allocation5 + $0x1d]   ;;  %s408_s11 = int_to_ptr.hbm [resolvable:$true] %s407_s11 }
 0x120   :  { %s409_s27 = sshll.u32 %s2160_s23, 4  ;;  %s1716_s8 = sshra.s32 %s408_s11, 4  ;;  %s410_s27 = int_to_ptr.vmem [resolvable:$true] %s409_s27  ;;  %s1717_s8 = int_to_ptr.hbm [resolvable:$true] %s1716_s8 }
 0x121   :  { %s1718_s19 = scalar_lea.hbm %s1717_s8, 1  ;;  %p1721_p4 = scmp.lt.s32.totalorder %s1717_s8, %s2642_s4 }
 0x122   :  { %p1719_p3 = scmp.ne.s32.totalorder %s1717_s8, %s1718_s19  ;;  %p1722_p5 = scmp.lt.s32.totalorder %s2273_s30, %s1718_s19 }
 0x124   :  { %p1723_p6 = por %p1722_p5, %p1721_p4 }
 0x126   :  { %p1724_p7 = pnand %p1723_p6, %p1719_p3 }
 0x128   :  { %1727 = shalt.err (!%p1724_p7)  }
 0x129   :  { %412 = dma.hbm_to_vmem [thread:$0]  %s408_s11, 16, %s410_s27, [#allocation2 + $0x17] }
 0x12a   :  { %s2482_s15 = sld [smem:[#allocation4 + $0x6]]  ;;  %s2161_s29 = smov [#allocation5 + $0x6]  }
 0x12b   :  { %s427_s10 = sshll.u32 %s2161_s29, 4  ;;  %s2162_s12 = smov [#allocation5 + $0xe]   ;;  %s428_s10 = int_to_ptr.vmem [resolvable:$true] %s427_s10 }
 0x12c   :  { %s2484_s20 = sshll.u32 %s2162_s12, 4  ;;  %s2163_s18 = smov [#allocation5 + $0x16]   ;;  %s444_s20 = int_to_ptr.vmem [resolvable:$true] %s2484_s20 }
 0x12d   :  { %s2487_s22 = sshll.u32 %s2163_s18, 4  ;;  %s2164_s9 = smov [#allocation5 + $0x1e]   ;;  %s460_s22 = int_to_ptr.vmem [resolvable:$true] %s2487_s22 }
 0x12e   :  { %s2490_s21 = sshll.u32 %s2164_s9, 4  ;;  %s476_s21 = int_to_ptr.vmem [resolvable:$true] %s2490_s21 }
 0x130   :  { %s415_s7 = scalar_lea.hbm %s2639_s1, %s2482_s15  ;;  %s431_s11 = scalar_lea.hbm %s2640_s2, %s2482_s15 }
 0x131   :  { %s425_s23 = sshll.u32 %s415_s7, 4  ;;  %s441_s27 = sshll.u32 %s431_s11, 4  ;;  %s426_s23 = int_to_ptr.hbm [resolvable:$true] %s425_s23  ;;  %s442_s27 = int_to_ptr.hbm [resolvable:$true] %s441_s27 }
 0x132   :  { %s1740_s8 = sshra.s32 %s426_s23, 4  ;;  %s1741_s8 = int_to_ptr.hbm [resolvable:$true] %s1740_s8 }
 0x133   :  { %s1742_s19 = scalar_lea.hbm %s1741_s8, 1  ;;  %p1745_p9 = scmp.lt.s32.totalorder %s1741_s8, %s2639_s1 }
 0x134   :  { %p1743_p8 = scmp.ne.s32.totalorder %s1741_s8, %s1742_s19  ;;  %p1746_p10 = scmp.lt.s32.totalorder %s2229_s17, %s1742_s19 }
 0x136   :  { %p1747_p11 = por %p1746_p10, %p1745_p9 }
 0x138   :  { %p1748_p12 = pnand %p1747_p11, %p1743_p8 }
 0x13a   :  { %1751 = shalt.err (!%p1748_p12)  }
 0x13b   :  { %430 = dma.hbm_to_vmem [thread:$0]  %s426_s23, 16, %s428_s10, [#allocation2 + $0x18] }
 0x13c   :  { %s1764_s29 = sshra.s32 %s442_s27, 4  ;;  %s1765_s29 = int_to_ptr.hbm [resolvable:$true] %s1764_s29 }
 0x13d   :  { %s1766_s12 = scalar_lea.hbm %s1765_s29, 1  ;;  %p1769_p0 = scmp.lt.s32.totalorder %s1765_s29, %s2640_s2 }
 0x13e   :  { %p1767_p13 = scmp.ne.s32.totalorder %s1765_s29, %s1766_s12  ;;  %p1770_p1 = scmp.lt.s32.totalorder %s2240_s0, %s1766_s12 }
 0x140   :  { %p1771_p2 = por %p1770_p1, %p1769_p0 }
 0x142   :  { %p1772_p3 = pnand %p1771_p2, %p1767_p13 }
 0x144   :  { %1775 = shalt.err (!%p1772_p3)  }
 0x145   :  { %446 = dma.hbm_to_vmem [thread:$0]  %s442_s27, 16, %s444_s20, [#allocation2 + $0x19] }
 0x146   :  { %s447_s14 = scalar_lea.hbm %s2641_s3, %s2482_s15  ;;  %s463_s28 = scalar_lea.hbm %s2642_s4, %s2482_s15 }
 0x147   :  { %s457_s11 = sshll.u32 %s447_s14, 4  ;;  %s473_s23 = sshll.u32 %s463_s28, 4  ;;  %s458_s11 = int_to_ptr.hbm [resolvable:$true] %s457_s11  ;;  %s474_s23 = int_to_ptr.hbm [resolvable:$true] %s473_s23 }
 0x148   :  { %s1788_s8 = sshra.s32 %s458_s11, 4  ;;  %s1789_s8 = int_to_ptr.hbm [resolvable:$true] %s1788_s8 }
 0x149   :  { %s1790_s19 = scalar_lea.hbm %s1789_s8, 1  ;;  %p1793_p5 = scmp.lt.s32.totalorder %s1789_s8, %s2641_s3 }
 0x14a   :  { %p1791_p4 = scmp.ne.s32.totalorder %s1789_s8, %s1790_s19  ;;  %p1794_p6 = scmp.lt.s32.totalorder %s2259_s26, %s1790_s19 }
 0x14c   :  { %p1795_p7 = por %p1794_p6, %p1793_p5 }
 0x14e   :  { %p1796_p8 = pnand %p1795_p7, %p1791_p4 }
 0x150   :  { %1799 = shalt.err (!%p1796_p8)  }
 0x151   :  { %462 = dma.hbm_to_vmem [thread:$0]  %s458_s11, 16, %s460_s22, [#allocation2 + $0x1a] }
 0x152   :  { %s2525_s15 = sld [smem:[#allocation4 + $0x7]]  ;;  %s1812_s20 = sshra.s32 %s474_s23, 4  ;;  %s1813_s20 = int_to_ptr.hbm [resolvable:$true] %s1812_s20 }
 0x153   :  { %s1814_s27 = scalar_lea.hbm %s1813_s20, 1  ;;  %p1817_p10 = scmp.lt.s32.totalorder %s1813_s20, %s2642_s4 }
 0x154   :  { %p1815_p9 = scmp.ne.s32.totalorder %s1813_s20, %s1814_s27  ;;  %p1818_p11 = scmp.lt.s32.totalorder %s2273_s30, %s1814_s27 }
 0x156   :  { %p1819_p12 = por %p1818_p11, %p1817_p10 }
 0x158   :  { %p1820_p13 = pnand %p1819_p12, %p1815_p9 }
 0x15a   :  { %1823 = shalt.err (!%p1820_p13)  }
 0x15b   :  { %478 = dma.hbm_to_vmem [thread:$0]  %s474_s23, 16, %s476_s21, [#allocation2 + $0x1b] }
 0x15c   :  { %s2165_s18 = smov [#allocation5 + $0x7]   ;;  %s2166_s9 = smov [#allocation5 + $0xf]  }
 0x15d   :  { %s493_s22 = sshll.u32 %s2165_s18, 4  ;;  %s2531_s10 = sshll.u32 %s2166_s9, 4  ;;  %s494_s22 = int_to_ptr.vmem [resolvable:$true] %s493_s22  ;;  %s510_s10 = int_to_ptr.vmem [resolvable:$true] %s2531_s10 }
 0x15e   :  { %s481_s7 = scalar_lea.hbm %s2639_s1, %s2525_s15  ;;  %s497_s11 = scalar_lea.hbm %s2640_s2, %s2525_s15 }
 0x15f   :  { %s491_s21 = sshll.u32 %s481_s7, 4  ;;  %s507_s23 = sshll.u32 %s497_s11, 4  ;;  %s492_s21 = int_to_ptr.hbm [resolvable:$true] %s491_s21  ;;  %s508_s23 = int_to_ptr.hbm [resolvable:$true] %s507_s23 }
 0x160   :  { %s1836_s8 = sshra.s32 %s492_s21, 4  ;;  %s1837_s8 = int_to_ptr.hbm [resolvable:$true] %s1836_s8 }
 0x161   :  { %s1838_s19 = scalar_lea.hbm %s1837_s8, 1  ;;  %p1841_p1 = scmp.lt.s32.totalorder %s1837_s8, %s2639_s1 }
 0x162   :  { %p1839_p0 = scmp.ne.s32.totalorder %s1837_s8, %s1838_s19  ;;  %p1842_p2 = scmp.lt.s32.totalorder %s2229_s17, %s1838_s19 }
 0x164   :  { %p1843_p3 = por %p1842_p2, %p1841_p1 }
 0x166   :  { %p1844_p4 = pnand %p1843_p3, %p1839_p0 }
 0x168   :  { %1847 = shalt.err (!%p1844_p4)  }
 0x169   :  { %496 = dma.hbm_to_vmem [thread:$0]  %s492_s21, 16, %s494_s22, [#allocation2 + $0x1c] }
 0x16a   :  { %s1860_s20 = sshra.s32 %s508_s23, 4  ;;  %s1861_s20 = int_to_ptr.hbm [resolvable:$true] %s1860_s20 }
 0x16b   :  { %s1862_s27 = scalar_lea.hbm %s1861_s20, 1  ;;  %p1865_p6 = scmp.lt.s32.totalorder %s1861_s20, %s2640_s2 }
 0x16c   :  { %p1863_p5 = scmp.ne.s32.totalorder %s1861_s20, %s1862_s27  ;;  %p1866_p7 = scmp.lt.s32.totalorder %s2240_s0, %s1862_s27 }
 0x16e   :  { %p1867_p8 = por %p1866_p7, %p1865_p6 }
 0x170   :  { %p1868_p9 = pnand %p1867_p8, %p1863_p5 }
 0x172   :  { %1871 = shalt.err (!%p1868_p9)  }
 0x173   :  { %512 = dma.hbm_to_vmem [thread:$0]  %s508_s23, 16, %s510_s10, [#allocation2 + $0x1d] }
 0x174   :  { %s513_s22 = scalar_lea.hbm %s2641_s3, %s2525_s15  ;;  %s2167_s25 = smov [#allocation5 + $0x17]  }
 0x175   :  { %s525_s14 = sshll.u32 %s2167_s25, 4  ;;  %s523_s7 = sshll.u32 %s513_s22, 4  ;;  %s526_s14 = int_to_ptr.vmem [resolvable:$true] %s525_s14  ;;  %s524_s7 = int_to_ptr.hbm [resolvable:$true] %s523_s7 }
 0x176   :  { %s529_s11 = scalar_lea.hbm %s2642_s4, %s2525_s15  ;;  %s1884_s21 = sshra.s32 %s524_s7, 4  ;;  %s1885_s21 = int_to_ptr.hbm [resolvable:$true] %s1884_s21 }
 0x177   :  { %s1886_s8 = scalar_lea.hbm %s1885_s21, 1  ;;  %p1889_p11 = scmp.lt.s32.totalorder %s1885_s21, %s2641_s3 }
 0x178   :  { %p1887_p10 = scmp.ne.s32.totalorder %s1885_s21, %s1886_s8  ;;  %p1890_p12 = scmp.lt.s32.totalorder %s2259_s26, %s1886_s8 }
 0x17a   :  { %p1891_p13 = por %p1890_p12, %p1889_p11 }
 0x17c   :  { %p1892_p0 = pnand %p1891_p13, %p1887_p10 }
 0x17e   :  { %1895 = shalt.err (!%p1892_p0)  }
 0x17f   :  { %528 = dma.hbm_to_vmem [thread:$0]  %s524_s7, 16, %s526_s14, [#allocation2 + $0x1e] }
 0x180   :  { %s539_s19 = sshll.u32 %s529_s11, 4  ;;  %s2168_s6 = smov [#allocation5 + $0x1f]   ;;  %s540_s19 = int_to_ptr.hbm [resolvable:$true] %s539_s19 }
 0x181   :  { %s541_s13 = sshll.u32 %s2168_s6, 4  ;;  %s1908_s15 = sshra.s32 %s540_s19, 4  ;;  %s542_s13 = int_to_ptr.vmem [resolvable:$true] %s541_s13  ;;  %s1909_s15 = int_to_ptr.hbm [resolvable:$true] %s1908_s15 }
 0x182   :  { %s1910_s20 = scalar_lea.hbm %s1909_s15, 1  ;;  %p1913_p2 = scmp.lt.s32.totalorder %s1909_s15, %s2642_s4 }
 0x183   :  { %p1911_p1 = scmp.ne.s32.totalorder %s1909_s15, %s1910_s20  ;;  %p1914_p3 = scmp.lt.s32.totalorder %s2273_s30, %s1910_s20 }
 0x185   :  { %p1915_p4 = por %p1914_p3, %p1913_p2 }
 0x187   :  { %p1916_p5 = pnand %p1915_p4, %p1911_p1 }
 0x189   :  { %1919 = shalt.err (!%p1916_p5)  }
 0x18a   :  { %544 = dma.hbm_to_vmem [thread:$0]  %s540_s19, 16, %s542_s13, [#allocation2 + $0x1f] }
 0x18b   :  { %s2566_s12 = smov 0  }
 0x18c LB: > { %p551_p6 = scmp.lt.s32.totalorder %s2134_s12, 0  ;;  %s552_s18 = ssub.s32 0, %s2134_s12  ;;  %s2134_s12 = sphi %s2566_s12, %s550_s12  }
 0x18d   : > { %s1059_s9 = smin.u32 %s2134_s12, %s552_s18 }
 0x18e   : > { %s554_s22 = sand.u32 7, %s1059_s9  }
 0x18f   : > { %s555_s25 = ssub.s32 0, %s554_s22 }
 0x190   : > { %s2645_s25 = smov (!%p551_p6, %s555_s25), %s554_s22 }
 0x191   : > { %p1061_p7 = scmp.lt.s32.totalorder %s2645_s25, 0  ;;  %s561_s14 = sadd.s32 8, %s2645_s25 }
 0x193   : > { %s2647_s14 = smov (!%p1061_p7, %s561_s14), %s2645_s25 }
 0x194   : > { %s1062_s7 = sshll.u32 %s2647_s14, 2 }
 0x195   : > { %s564_s16 = scalar_lea.sflag [#allocation2], %s1062_s7 }
 0x196   : > { %2058 = dma.done.wait %s564_s16, 16 }
 0x197   : > { %2059 = vsyncadd %s564_s16, 4294967280  ;;  %s1010_s28 = scalar_lea.sflag %s564_s16, 1 [#allocation2] }
 0x198   : > { %2060 = dma.done.wait %s1010_s28, 16 }
 0x199   : > { %2061 = vsyncadd %s1010_s28, 4294967280  ;;  %s1013_s11 = scalar_lea.sflag %s564_s16, 2 [#allocation2] }
 0x19a   : > { %2062 = dma.done.wait %s1013_s11, 16 }
 0x19b   : > { %2063 = vsyncadd %s1013_s11, 4294967280  ;;  %s1016_s21 = scalar_lea.sflag %s564_s16, 3 [#allocation2] }
 0x19c   : > { %2064 = dma.done.wait %s1016_s21, 16 }
 0x19d   : > { %2065 = vsyncadd %s1016_s21, 4294967280  ;;  %s579_s8 = sadd.s32 8, %s2134_s12 }
 0x19e   : > { %s2575_s10 = sld [smem:[#allocation4 + %s579_s8]]  ;;  %p580_p8 = scmp.lt.s32.totalorder %s579_s8, 0 }
 0x19f   : > { %s581_s23 = ssub.s32 0, %s579_s8  ;;  %s595_s19 = sshrl.u32 %s579_s8, 3 }
 0x1a0   : > { %s1066_s6 = smin.u32 %s581_s23, %s579_s8  ;;  %s596_s13 = sand.u32 7, %s579_s8  }
 0x1a1   : > { %s583_s15 = sand.u32 7, %s1066_s6   ;;  %s1069_s20 = sshll.u32 %s595_s19, 5 }
 0x1a2   : > { %s584_s27 = ssub.s32 0, %s583_s15  ;;  %s598_s29 = sadd.s32 %s1069_s20, %s596_s13 }
 0x1a3   : > { %s2649_s27 = smov (!%p580_p8, %s584_s27), %s583_s15  ;;  %s2583_s7 = scalar_lea.vmem [#allocation5], %s598_s29 }
 0x1a4   : > { %s594_s22 = scalar_lea.hbm %s2639_s1, %s2575_s10  ;;  %p1068_p9 = scmp.lt.s32.totalorder %s2649_s27, 0 }
 0x1a5   : > { %s590_s25 = sadd.s32 8, %s2649_s27  ;;  %s2581_s14 = sshll.u32 %s594_s22, 4  ;;  %s610_s14 = int_to_ptr.hbm [resolvable:$true] %s2581_s14 }
 0x1a6   : > { %s611_s16 = sshll.u32 %s2583_s7, 4  ;;  %s2651_s25 = smov (!%p1068_p9, %s590_s25), %s2649_s27  ;;  %s612_s16 = int_to_ptr.vmem [resolvable:$true] %s611_s16 }
 0x1a7   : > { %s1070_s28 = sshll.u32 %s2651_s25, 2  ;;  %s615_s8 = scalar_lea.hbm %s2640_s2, %s2575_s10 }
 0x1a8   : > { %s1027_s23 = scalar_lea.vmem %s2583_s7, 8 [#allocation5]  ;;  %s2592_s19 = scalar_lea.sflag [#allocation2], %s1070_s28 }
 0x1a9   : > { %s1932_s6 = sshra.s32 %s610_s14, 4  ;;  %s1933_s6 = int_to_ptr.hbm [resolvable:$true] %s1932_s6 }
 0x1aa   : > { %s1934_s13 = scalar_lea.hbm %s1933_s6, 1  ;;  %p1937_p11 = scmp.lt.s32.totalorder %s1933_s6, %s2639_s1 }
 0x1ab   : > { %p1935_p10 = scmp.ne.s32.totalorder %s1933_s6, %s1934_s13  ;;  %p1938_p12 = scmp.lt.s32.totalorder %s2229_s17, %s1934_s13 }
 0x1ad   : > { %p1939_p13 = por %p1938_p12, %p1937_p11 }
 0x1af   : > { %p1940_p0 = pnand %p1939_p13, %p1935_p10 }
 0x1b1   : > { %1943 = shalt.err (!%p1940_p0)  }
 0x1b2   : > { %s1944_s27 = sshra.s32 %s612_s16, 4  ;;  %s2169_s18 = smov [#allocation5]   ;;  %s1945_s27 = int_to_ptr.vmem [resolvable:$true] %s1944_s27 }
 0x1b3   : > { %s1946_s29 = scalar_lea.vmem %s1945_s27, 1  ;;  %s2598_s9 = scalar_lea.vmem %s2169_s18, 1024 }
 0x1b4   : > { %p1947_p1 = scmp.ne.s32.totalorder %s1945_s27, %s1946_s29  ;;  %p1949_p2 = scmp.lt.s32.totalorder %s1945_s27, [#allocation5] }
 0x1b5   : > { %p1950_p3 = scmp.lt.s32.totalorder %s2598_s9, %s1946_s29 }
 0x1b7   : > { %p1951_p4 = por %p1950_p3, %p1949_p2 }
 0x1b9   : > { %p1952_p5 = pnand %p1951_p4, %p1947_p1 }
 0x1bb   : > { %1955 = shalt.err (!%p1952_p5)  }
 0x1bc   : > { %614 = dma.hbm_to_vmem [thread:$0]  %s610_s14, 16, %s612_s16, %s2592_s19 }
 0x1bd   : > { %s1030_s22 = scalar_lea.sflag %s2592_s19, 1 [#allocation2]  ;;  %s627_s25 = sshll.u32 %s615_s8, 4  ;;  %s628_s25 = int_to_ptr.hbm [resolvable:$true] %s627_s25 }
 0x1be   : > { %s629_s28 = sshll.u32 %s1027_s23, 4  ;;  %s633_s6 = scalar_lea.hbm %s2641_s3, %s2575_s10  ;;  %s630_s28 = int_to_ptr.vmem [resolvable:$true] %s629_s28 }
 0x1bf   : > { %s1956_s13 = sshra.s32 %s628_s25, 4  ;;  %s1957_s13 = int_to_ptr.hbm [resolvable:$true] %s1956_s13 }
 0x1c0   : > { %s1958_s15 = scalar_lea.hbm %s1957_s13, 1  ;;  %p1961_p7 = scmp.lt.s32.totalorder %s1957_s13, %s2640_s2 }
 0x1c1   : > { %p1959_p6 = scmp.ne.s32.totalorder %s1957_s13, %s1958_s15  ;;  %p1962_p8 = scmp.lt.s32.totalorder %s2240_s0, %s1958_s15 }
 0x1c3   : > { %p1963_p9 = por %p1962_p8, %p1961_p7 }
 0x1c5   : > { %p1964_p10 = pnand %p1963_p9, %p1959_p6 }
 0x1c7   : > { %1967 = shalt.err (!%p1964_p10)  }
 0x1c8   : > { %s1968_s14 = sshra.s32 %s630_s28, 4  ;;  %s1969_s14 = int_to_ptr.vmem [resolvable:$true] %s1968_s14 }
 0x1c9   : > { %s1970_s16 = scalar_lea.vmem %s1969_s14, 1  ;;  %p1973_p12 = scmp.lt.s32.totalorder %s1969_s14, [#allocation5] }
 0x1ca   : > { %p1971_p11 = scmp.ne.s32.totalorder %s1969_s14, %s1970_s16  ;;  %p1974_p13 = scmp.lt.s32.totalorder %s2598_s9, %s1970_s16 }
 0x1cc   : > { %p1975_p0 = por %p1974_p13, %p1973_p12 }
 0x1ce   : > { %p1976_p1 = pnand %p1975_p0, %p1971_p11 }
 0x1d0   : > { %1979 = shalt.err (!%p1976_p1)  }
 0x1d1   : > { %632 = dma.hbm_to_vmem [thread:$0]  %s628_s25, 16, %s630_s28, %s1030_s22 }
 0x1d2   : > { %s1035_s8 = scalar_lea.vmem %s2583_s7, 16 [#allocation5]  ;;  %s1038_s23 = scalar_lea.sflag %s2592_s19, 2 [#allocation2] }
 0x1d3   : > { %s645_s29 = sshll.u32 %s633_s6, 4  ;;  %s647_s18 = sshll.u32 %s1035_s8, 4  ;;  %s646_s29 = int_to_ptr.hbm [resolvable:$true] %s645_s29  ;;  %s648_s18 = int_to_ptr.vmem [resolvable:$true] %s647_s18 }
 0x1d4   : > { %s1980_s11 = sshra.s32 %s646_s29, 4  ;;  %s1981_s11 = int_to_ptr.hbm [resolvable:$true] %s1980_s11 }
 0x1d5   : > { %s1982_s21 = scalar_lea.hbm %s1981_s11, 1  ;;  %p1985_p3 = scmp.lt.s32.totalorder %s1981_s11, %s2641_s3 }
 0x1d6   : > { %p1983_p2 = scmp.ne.s32.totalorder %s1981_s11, %s1982_s21  ;;  %p1986_p4 = scmp.lt.s32.totalorder %s2259_s26, %s1982_s21 }
 0x1d8   : > { %p1987_p5 = por %p1986_p4, %p1985_p3 }
 0x1da   : > { %p1988_p6 = pnand %p1987_p5, %p1983_p2 }
 0x1dc   : > { %1991 = shalt.err (!%p1988_p6)  }
 0x1dd   : > { %s1992_s22 = sshra.s32 %s648_s18, 4  ;;  %s1993_s22 = int_to_ptr.vmem [resolvable:$true] %s1992_s22 }
 0x1de   : > { %s1994_s25 = scalar_lea.vmem %s1993_s22, 1  ;;  %p1997_p8 = scmp.lt.s32.totalorder %s1993_s22, [#allocation5] }
 0x1df   : > { %p1995_p7 = scmp.ne.s32.totalorder %s1993_s22, %s1994_s25  ;;  %p1998_p9 = scmp.lt.s32.totalorder %s2598_s9, %s1994_s25 }
 0x1e1   : > { %p1999_p10 = por %p1998_p9, %p1997_p8 }
 0x1e3   : > { %p2000_p11 = pnand %p1999_p10, %p1995_p7 }
 0x1e5   : > { %2003 = shalt.err (!%p2000_p11)  }
 0x1e6   : > { %650 = dma.hbm_to_vmem [thread:$0]  %s646_s29, 16, %s648_s18, %s1038_s23 }
 0x1e7   : > { %s651_s20 = scalar_lea.hbm %s2642_s4, %s2575_s10  ;;  %s1043_s27 = scalar_lea.vmem %s2583_s7, 24 [#allocation5] }
 0x1e8   : > { %s1046_s14 = scalar_lea.sflag %s2592_s19, 3 [#allocation2]  ;;  %s663_s16 = sshll.u32 %s651_s20, 4  ;;  %s664_s16 = int_to_ptr.hbm [resolvable:$true] %s663_s16 }
 0x1e9   : > { %s665_s8 = sshll.u32 %s1043_s27, 4  ;;  %s2004_s11 = sshra.s32 %s664_s16, 4  ;;  %s666_s8 = int_to_ptr.vmem [resolvable:$true] %s665_s8  ;;  %s2005_s11 = int_to_ptr.hbm [resolvable:$true] %s2004_s11 }
 0x1ea   : > { %s2006_s21 = scalar_lea.hbm %s2005_s11, 1  ;;  %p2009_p13 = scmp.lt.s32.totalorder %s2005_s11, %s2642_s4 }
 0x1eb   : > { %p2007_p12 = scmp.ne.s32.totalorder %s2005_s11, %s2006_s21  ;;  %p2010_p0 = scmp.lt.s32.totalorder %s2273_s30, %s2006_s21 }
 0x1ed   : > { %p2011_p1 = por %p2010_p0, %p2009_p13 }
 0x1ef   : > { %p2012_p2 = pnand %p2011_p1, %p2007_p12 }
 0x1f1   : > { %2015 = shalt.err (!%p2012_p2)  }
 0x1f2   : > { %s2016_s29 = sshra.s32 %s666_s8, 4  ;;  %s2017_s29 = int_to_ptr.vmem [resolvable:$true] %s2016_s29 }
 0x1f3   : > { %s2018_s10 = scalar_lea.vmem %s2017_s29, 1  ;;  %p2021_p4 = scmp.lt.s32.totalorder %s2017_s29, [#allocation5] }
 0x1f4   : > { %p2019_p3 = scmp.ne.s32.totalorder %s2017_s29, %s2018_s10  ;;  %p2022_p5 = scmp.lt.s32.totalorder %s2598_s9, %s2018_s10 }
 0x1f6   : > { %p2023_p6 = por %p2022_p5, %p2021_p4 }
 0x1f8   : > { %p2024_p7 = pnand %p2023_p6, %p2019_p3 }
 0x1fa   : > { %2027 = shalt.err (!%p2024_p7)  }
 0x1fb   : > { %668 = dma.hbm_to_vmem [thread:$0]  %s664_s16, 16, %s666_s8, %s1046_s14 }
 0x1fc   : > { %s550_s12 = sadd.s32 1, %s2134_s12  }
 0x1fd   : > { %p547_p8 = scmp.ge.s32.totalorder %s550_s12, 248  }
 0x1ff   :  { %549 = sbr.rel (!%p547_p8) target bundleno = 396 (0x18c), region = 312 }
 0x204   :  { %2066 = dma.done.wait [#allocation2], 16 }
 0x205   :  { %2067 = vsyncadd [#allocation2], 4294967280 }
 0x206   :  { %2068 = dma.done.wait [#allocation2 + $0x1], 16 }
 0x207   :  { %2069 = vsyncadd [#allocation2 + $0x1], 4294967280 }
 0x208   :  { %2070 = dma.done.wait [#allocation2 + $0x2], 16 }
 0x209   :  { %2071 = vsyncadd [#allocation2 + $0x2], 4294967280 }
 0x20a   :  { %2072 = dma.done.wait [#allocation2 + $0x3], 16 }
 0x20b   :  { %2073 = vsyncadd [#allocation2 + $0x3], 4294967280 }
 0x20c   :  { %2074 = dma.done.wait [#allocation2 + $0x4], 16 }
 0x20d   :  { %2075 = vsyncadd [#allocation2 + $0x4], 4294967280 }
 0x20e   :  { %2076 = dma.done.wait [#allocation2 + $0x5], 16 }
 0x20f   :  { %2077 = vsyncadd [#allocation2 + $0x5], 4294967280 }
 0x210   :  { %2078 = dma.done.wait [#allocation2 + $0x6], 16 }
 0x211   :  { %2079 = vsyncadd [#allocation2 + $0x6], 4294967280 }
 0x212   :  { %2080 = dma.done.wait [#allocation2 + $0x7], 16 }
 0x213   :  { %2081 = vsyncadd [#allocation2 + $0x7], 4294967280 }
 0x214   :  { %2082 = dma.done.wait [#allocation2 + $0x8], 16 }
 0x215   :  { %2083 = vsyncadd [#allocation2 + $0x8], 4294967280 }
 0x216   :  { %2084 = dma.done.wait [#allocation2 + $0x9], 16 }
 0x217   :  { %2085 = vsyncadd [#allocation2 + $0x9], 4294967280 }
 0x218   :  { %2086 = dma.done.wait [#allocation2 + $0xa], 16 }
 0x219   :  { %2087 = vsyncadd [#allocation2 + $0xa], 4294967280 }
 0x21a   :  { %2088 = dma.done.wait [#allocation2 + $0xb], 16 }
 0x21b   :  { %2089 = vsyncadd [#allocation2 + $0xb], 4294967280 }
 0x21c   :  { %2090 = dma.done.wait [#allocation2 + $0xc], 16 }
 0x21d   :  { %2091 = vsyncadd [#allocation2 + $0xc], 4294967280 }
 0x21e   :  { %2092 = dma.done.wait [#allocation2 + $0xd], 16 }
 0x21f   :  { %2093 = vsyncadd [#allocation2 + $0xd], 4294967280 }
 0x220   :  { %2094 = dma.done.wait [#allocation2 + $0xe], 16 }
 0x221   :  { %2095 = vsyncadd [#allocation2 + $0xe], 4294967280 }
 0x222   :  { %2096 = dma.done.wait [#allocation2 + $0xf], 16 }
 0x223   :  { %2097 = vsyncadd [#allocation2 + $0xf], 4294967280 }
 0x224   :  { %2098 = dma.done.wait [#allocation2 + $0x10], 16 }
 0x225   :  { %2099 = vsyncadd [#allocation2 + $0x10], 4294967280 }
 0x226   :  { %2100 = dma.done.wait [#allocation2 + $0x11], 16 }
 0x227   :  { %2101 = vsyncadd [#allocation2 + $0x11], 4294967280 }
 0x228   :  { %2102 = dma.done.wait [#allocation2 + $0x12], 16 }
 0x229   :  { %2103 = vsyncadd [#allocation2 + $0x12], 4294967280 }
 0x22a   :  { %2104 = dma.done.wait [#allocation2 + $0x13], 16 }
 0x22b   :  { %2105 = vsyncadd [#allocation2 + $0x13], 4294967280 }
 0x22c   :  { %2106 = dma.done.wait [#allocation2 + $0x14], 16 }
 0x22d   :  { %2107 = vsyncadd [#allocation2 + $0x14], 4294967280 }
 0x22e   :  { %2108 = dma.done.wait [#allocation2 + $0x15], 16 }
 0x22f   :  { %2109 = vsyncadd [#allocation2 + $0x15], 4294967280 }
 0x230   :  { %2110 = dma.done.wait [#allocation2 + $0x16], 16 }
 0x231   :  { %2111 = vsyncadd [#allocation2 + $0x16], 4294967280 }
 0x232   :  { %2112 = dma.done.wait [#allocation2 + $0x17], 16 }
 0x233   :  { %2113 = vsyncadd [#allocation2 + $0x17], 4294967280 }
 0x234   :  { %2114 = dma.done.wait [#allocation2 + $0x18], 16 }
 0x235   :  { %2115 = vsyncadd [#allocation2 + $0x18], 4294967280 }
 0x236   :  { %2116 = dma.done.wait [#allocation2 + $0x19], 16 }
 0x237   :  { %2117 = vsyncadd [#allocation2 + $0x19], 4294967280 }
 0x238   :  { %2118 = dma.done.wait [#allocation2 + $0x1a], 16 }
 0x239   :  { %2119 = vsyncadd [#allocation2 + $0x1a], 4294967280 }
 0x23a   :  { %2120 = dma.done.wait [#allocation2 + $0x1b], 16 }
 0x23b   :  { %2121 = vsyncadd [#allocation2 + $0x1b], 4294967280 }
 0x23c   :  { %2122 = dma.done.wait [#allocation2 + $0x1c], 16 }
 0x23d   :  { %2123 = vsyncadd [#allocation2 + $0x1c], 4294967280 }
 0x23e   :  { %2124 = dma.done.wait [#allocation2 + $0x1d], 16 }
 0x23f   :  { %2125 = vsyncadd [#allocation2 + $0x1d], 4294967280 }
 0x240   :  { %2126 = dma.done.wait [#allocation2 + $0x1e], 16 }
 0x241   :  { %2127 = vsyncadd [#allocation2 + $0x1e], 4294967280 }
 0x242   :  { %2128 = dma.done.wait [#allocation2 + $0x1f], 16 }
 0x243   :  { %2129 = vsyncadd [#allocation2 + $0x1f], 4294967280  ;;  %s739_s3 = sshll.u32 %s2643_s5, 4  ;;  %s2170_s4 = smov 512   ;;  %s740_s3 = int_to_ptr.hbm [resolvable:$true] %s739_s3 }
 0x244   :  { %s2171_s17 = smov 32  }
 0x245   :  { %745 = dma.vmem_to_hbm [thread:$0]  %s32_s24, 16384, %s740_s3, [#allocation6], %s2170_s4, %s2170_s4, %s2171_s17  }
 0x246   :  { %2130 = dma.done.wait [#allocation6], 16384  }
 0x247   :  { %2131 = vsyncadd [#allocation6], 4294950912 }
 0x248   :  { %750 = vsyncpa [#allocation6], 1 }
 0x249   :  { %751 = vsyncmov [#allocation2] }
 0x24c   :  { %s752_s0 = vpop.sfrf %751 }
 0x24d   :  { %p1077_p9 = scmp.ne.s32.totalorder %s752_s0, 0 }
 0x24f   :  { %756 = shalt.err (%p1077_p9)  }
 0x250   :  { %758 = vsyncmov [#allocation2 + $0x1] }
 0x253   :  { %s759_s26 = vpop.sfrf %758 }
 0x254   :  { %p1078_p10 = scmp.ne.s32.totalorder %s759_s26, 0 }
 0x256   :  { %763 = shalt.err (%p1078_p10)  }
 0x257   :  { %765 = vsyncmov [#allocation2 + $0x2] }
 0x25a   :  { %s766_s30 = vpop.sfrf %765 }
 0x25b   :  { %p1079_p11 = scmp.ne.s32.totalorder %s766_s30, 0 }
 0x25d   :  { %770 = shalt.err (%p1079_p11)  }
 0x25e   :  { %772 = vsyncmov [#allocation2 + $0x3] }
 0x261   :  { %s773_s5 = vpop.sfrf %772 }
 0x262   :  { %p1080_p12 = scmp.ne.s32.totalorder %s773_s5, 0 }
 0x264   :  { %777 = shalt.err (%p1080_p12)  }
 0x265   :  { %779 = vsyncmov [#allocation2 + $0x4] }
 0x268   :  { %s780_s24 = vpop.sfrf %779 }
 0x269   :  { %p1081_p13 = scmp.ne.s32.totalorder %s780_s24, 0 }
 0x26b   :  { %784 = shalt.err (%p1081_p13)  }
 0x26c   :  { %786 = vsyncmov [#allocation2 + $0x5] }
 0x26f   :  { %s787_s12 = vpop.sfrf %786 }
 0x270   :  { %p1082_p0 = scmp.ne.s32.totalorder %s787_s12, 0 }
 0x272   :  { %791 = shalt.err (%p1082_p0)  }
 0x273   :  { %793 = vsyncmov [#allocation2 + $0x6] }
 0x276   :  { %s794_s7 = vpop.sfrf %793 }
 0x277   :  { %p1083_p1 = scmp.ne.s32.totalorder %s794_s7, 0 }
 0x279   :  { %798 = shalt.err (%p1083_p1)  }
 0x27a   :  { %800 = vsyncmov [#allocation2 + $0x7] }
 0x27d   :  { %s801_s19 = vpop.sfrf %800 }
 0x27e   :  { %p1084_p2 = scmp.ne.s32.totalorder %s801_s19, 0 }
 0x280   :  { %805 = shalt.err (%p1084_p2)  }
 0x281   :  { %807 = vsyncmov [#allocation2 + $0x8] }
 0x284   :  { %s808_s9 = vpop.sfrf %807 }
 0x285   :  { %p1085_p3 = scmp.ne.s32.totalorder %s808_s9, 0 }
 0x287   :  { %812 = shalt.err (%p1085_p3)  }
 0x288   :  { %814 = vsyncmov [#allocation2 + $0x9] }
 0x28b   :  { %s815_s18 = vpop.sfrf %814 }
 0x28c   :  { %p1086_p4 = scmp.ne.s32.totalorder %s815_s18, 0 }
 0x28e   :  { %819 = shalt.err (%p1086_p4)  }
 0x28f   :  { %821 = vsyncmov [#allocation2 + $0xa] }
 0x292   :  { %s822_s15 = vpop.sfrf %821 }
 0x293   :  { %p1087_p5 = scmp.ne.s32.totalorder %s822_s15, 0 }
 0x295   :  { %826 = shalt.err (%p1087_p5)  }
 0x296   :  { %828 = vsyncmov [#allocation2 + $0xb] }
 0x299   :  { %s829_s22 = vpop.sfrf %828 }
 0x29a   :  { %p1088_p6 = scmp.ne.s32.totalorder %s829_s22, 0 }
 0x29c   :  { %833 = shalt.err (%p1088_p6)  }
 0x29d   :  { %835 = vsyncmov [#allocation2 + $0xc] }
 0x2a0   :  { %s836_s25 = vpop.sfrf %835 }
 0x2a1   :  { %p1089_p7 = scmp.ne.s32.totalorder %s836_s25, 0 }
 0x2a3   :  { %840 = shalt.err (%p1089_p7)  }
 0x2a4   :  { %842 = vsyncmov [#allocation2 + $0xd] }
 0x2a7   :  { %s843_s28 = vpop.sfrf %842 }
 0x2a8   :  { %p1090_p8 = scmp.ne.s32.totalorder %s843_s28, 0 }
 0x2aa   :  { %847 = shalt.err (%p1090_p8)  }
 0x2ab   :  { %849 = vsyncmov [#allocation2 + $0xe] }
 0x2ae   :  { %s850_s6 = vpop.sfrf %849 }
 0x2af   :  { %p1091_p9 = scmp.ne.s32.totalorder %s850_s6, 0 }
 0x2b1   :  { %854 = shalt.err (%p1091_p9)  }
 0x2b2   :  { %856 = vsyncmov [#allocation2 + $0xf] }
 0x2b5   :  { %s857_s20 = vpop.sfrf %856 }
 0x2b6   :  { %p1092_p10 = scmp.ne.s32.totalorder %s857_s20, 0 }
 0x2b8   :  { %861 = shalt.err (%p1092_p10)  }
 0x2b9   :  { %863 = vsyncmov [#allocation2 + $0x10] }
 0x2bc   :  { %s864_s27 = vpop.sfrf %863 }
 0x2bd   :  { %p1093_p11 = scmp.ne.s32.totalorder %s864_s27, 0 }
 0x2bf   :  { %868 = shalt.err (%p1093_p11)  }
 0x2c0   :  { %870 = vsyncmov [#allocation2 + $0x11] }
 0x2c3   :  { %s871_s14 = vpop.sfrf %870 }
 0x2c4   :  { %p1094_p12 = scmp.ne.s32.totalorder %s871_s14, 0 }
 0x2c6   :  { %875 = shalt.err (%p1094_p12)  }
 0x2c7   :  { %877 = vsyncmov [#allocation2 + $0x12] }
 0x2ca   :  { %s878_s16 = vpop.sfrf %877 }
 0x2cb   :  { %p1095_p13 = scmp.ne.s32.totalorder %s878_s16, 0 }
 0x2cd   :  { %882 = shalt.err (%p1095_p13)  }
 0x2ce   :  { %884 = vsyncmov [#allocation2 + $0x13] }
 0x2d1   :  { %s885_s8 = vpop.sfrf %884 }
 0x2d2   :  { %p1096_p0 = scmp.ne.s32.totalorder %s885_s8, 0 }
 0x2d4   :  { %889 = shalt.err (%p1096_p0)  }
 0x2d5   :  { %891 = vsyncmov [#allocation2 + $0x14] }
 0x2d8   :  { %s892_s11 = vpop.sfrf %891 }
 0x2d9   :  { %p1097_p1 = scmp.ne.s32.totalorder %s892_s11, 0 }
 0x2db   :  { %896 = shalt.err (%p1097_p1)  }
 0x2dc   :  { %898 = vsyncmov [#allocation2 + $0x15] }
 0x2df   :  { %s899_s21 = vpop.sfrf %898 }
 0x2e0   :  { %p1098_p2 = scmp.ne.s32.totalorder %s899_s21, 0 }
 0x2e2   :  { %903 = shalt.err (%p1098_p2)  }
 0x2e3   :  { %905 = vsyncmov [#allocation2 + $0x16] }
 0x2e6   :  { %s906_s13 = vpop.sfrf %905 }
 0x2e7   :  { %p1099_p3 = scmp.ne.s32.totalorder %s906_s13, 0 }
 0x2e9   :  { %910 = shalt.err (%p1099_p3)  }
 0x2ea   :  { %912 = vsyncmov [#allocation2 + $0x17] }
 0x2ed   :  { %s913_s23 = vpop.sfrf %912 }
 0x2ee   :  { %p1100_p4 = scmp.ne.s32.totalorder %s913_s23, 0 }
 0x2f0   :  { %917 = shalt.err (%p1100_p4)  }
 0x2f1   :  { %919 = vsyncmov [#allocation2 + $0x18] }
 0x2f4   :  { %s920_s29 = vpop.sfrf %919 }
 0x2f5   :  { %p1101_p5 = scmp.ne.s32.totalorder %s920_s29, 0 }
 0x2f7   :  { %924 = shalt.err (%p1101_p5)  }
 0x2f8   :  { %926 = vsyncmov [#allocation2 + $0x19] }
 0x2fb   :  { %s927_s10 = vpop.sfrf %926 }
 0x2fc   :  { %p1102_p6 = scmp.ne.s32.totalorder %s927_s10, 0 }
 0x2fe   :  { %931 = shalt.err (%p1102_p6)  }
 0x2ff   :  { %933 = vsyncmov [#allocation2 + $0x1a] }
 0x302   :  { %s934_s1 = vpop.sfrf %933 }
 0x303   :  { %p1103_p7 = scmp.ne.s32.totalorder %s934_s1, 0 }
 0x305   :  { %938 = shalt.err (%p1103_p7)  }
 0x306   :  { %940 = vsyncmov [#allocation2 + $0x1b] }
 0x309   :  { %s941_s2 = vpop.sfrf %940 }
 0x30a   :  { %p1104_p8 = scmp.ne.s32.totalorder %s941_s2, 0 }
 0x30c   :  { %945 = shalt.err (%p1104_p8)  }
 0x30d   :  { %947 = vsyncmov [#allocation2 + $0x1c] }
 0x310   :  { %s948_s3 = vpop.sfrf %947 }
 0x311   :  { %p1105_p9 = scmp.ne.s32.totalorder %s948_s3, 0 }
 0x313   :  { %952 = shalt.err (%p1105_p9)  }
 0x314   :  { %954 = vsyncmov [#allocation2 + $0x1d] }
 0x317   :  { %s955_s4 = vpop.sfrf %954 }
 0x318   :  { %p1106_p10 = scmp.ne.s32.totalorder %s955_s4, 0 }
 0x31a   :  { %959 = shalt.err (%p1106_p10)  }
 0x31b   :  { %961 = vsyncmov [#allocation2 + $0x1e] }
 0x31e   :  { %s962_s17 = vpop.sfrf %961 }
 0x31f   :  { %p1107_p11 = scmp.ne.s32.totalorder %s962_s17, 0 }
 0x321   :  { %966 = shalt.err (%p1107_p11)  }
 0x322   :  { %968 = vsyncmov [#allocation2 + $0x1f] }
 0x325   :  { %s969_s0 = vpop.sfrf %968 }
 0x326   :  { %p1108_p12 = scmp.ne.s32.totalorder %s969_s0, 0 }
 0x328   :  { %973 = shalt.err (%p1108_p12)  }

</bundles_post_ra>
